<compile_context>
chip_gen: v6e
topology: v6e:2x2x1
jax: 0.10.0
libtpu: 0.0.40
codegen_flags: <defaults>
</compile_context>

<pallas_src>
import math

import jax
import jax.numpy as jnp
from jax import lax
from jax.experimental import pallas as pl
from jax.experimental.pallas import tpu as pltpu

# --- small hyperparameters consistent with the module's structure -----------
INPUT_DIM = 16      # data.shape[1]
EMBED = 32          # embed_size
HEADS = 4
HEAD_DIM = EMBED // HEADS
HEAD_QKV = 3 * HEAD_DIM
FWD_EXP = 2         # forward_expansion
HIDDEN = FWD_EXP * EMBED
NUM_LAYERS = 2
MAX_LENGTH = 50
EPS = 1e-5

# --- 128-lane-aligned packing of the small per-layer vectors -----------------
VEC_LANES = 128
_VEC_FIELDS = ("in_b", "out_b", "g1", "be1", "g2", "be2", "b1", "b2")
_VEC_SIZE = {"in_b": 3 * EMBED, "out_b": EMBED, "g1": EMBED, "be1": EMBED,
             "g2": EMBED, "be2": EMBED, "b1": HIDDEN, "b2": EMBED}
_VEC_ROW = {name: i for i, name in enumerate(_VEC_FIELDS)}
NUM_VEC_FIELDS = len(_VEC_FIELDS)


# --------------------------- in-kernel helpers ------------------------------
def _vec(vslab, name):
    """One packed field: aligned (lane offset 0) slice of its own sublane row."""
    r = _VEC_ROW[name]
    return vslab[r:r + 1, :_VEC_SIZE[name]]                      # (1, size)


def _layernorm(x2d, gamma, beta):
    mu = jnp.mean(x2d, axis=-1, keepdims=True)
    var = jnp.mean(jnp.square(x2d - mu), axis=-1, keepdims=True)
    return (x2d - mu) * lax.rsqrt(var + EPS) * gamma + beta


# ------------------------------- fused kernel --------------------------------
def _fused_kernel(x_ref, wemb_ref, pos_ref, inw_ref, outw_ref, w1_ref, w2_ref,
                  vec_ref, fcp_ref, o_ref, qkvh_ref, attn_ref):
    # x:    (TS, N, D) s-major tile          wemb: (D, E)
    # pos:  (TS*N, E) pre-expanded bias      inw:  (L, E, 3E) head-interleaved,
    #                                              Q columns pre-scaled
    # outw: (L, E, E)  w1: (L, E, HIDDEN)    w2:   (L, HIDDEN, E)
    # vec:  (L, NUM_VEC_FIELDS, 128)         fcp:  (2, 128) [fc_w row; fc_b row]
    # o:    (1, TS*N) lane-dense output row
    # qkvh_ref: (H*TS, N, 3*hd) scratch      attn_ref: (TS*N, E) scratch
    S_t, N, D = x_ref.shape
    E = EMBED
    T = S_t * N

    # ---- embedding: (T, D) @ (D, E) + pre-expanded positional bias ----------
    x2 = x_ref[...].reshape(T, D)
    cur = jnp.dot(x2, wemb_ref[...],
                  preferred_element_type=jnp.float32) + pos_ref[...]

    # ---- statically unrolled transformer blocks (activation stays on-chip) --
    for l in range(NUM_LAYERS):
        in_w = inw_ref[l]                                  # (E, 3E)
        out_w = outw_ref[l]                                # (E, E)
        w1 = w1_ref[l]                                     # (E, HIDDEN)
        w2 = w2_ref[l]                                     # (HIDDEN, E)
        vslab = vec_ref[l]                                 # (NUM_VEC_FIELDS, 128)

        # fused QKV projection; column block h is [q_h | k_h | v_h] (pack-time
        # permutation), Q already scaled by 1/sqrt(hd).
        qkv = jnp.dot(cur, in_w,
                      preferred_element_type=jnp.float32) + _vec(vslab, "in_b")
        qkv3 = qkv.reshape(S_t, N, 3 * E)

        # Stack the heads along the major (batch) axis in VMEM scratch:
        # batch element b = h*S_t + s.
        for h in range(HEADS):
            qkvh_ref[h * S_t:(h + 1) * S_t] = (
                qkv3[:, :, h * HEAD_QKV:(h + 1) * HEAD_QKV])
        qkvh = qkvh_ref[...]                               # (H*S_t, N, 3*hd)
        qh = qkvh[:, :, :HEAD_DIM]
        kh = qkvh[:, :, HEAD_DIM:2 * HEAD_DIM]
        vh = qkvh[:, :, 2 * HEAD_DIM:]

        # One batched score einsum, one softmax, one batched PV einsum
        # (attention mixes over the N axis; S and heads are the batch).
        sc = jnp.einsum("bnd,bmd->bnm", qh, kh,
                        preferred_element_type=jnp.float32)      # (H*S_t, N, N)
        sc = sc - jnp.max(sc, axis=-1, keepdims=True)
        p = jnp.exp(sc)
        p = p / jnp.sum(p, axis=-1, keepdims=True)               # exact softmax
        ctx = jnp.einsum("bnm,bmd->bnd", p, vh,
                         preferred_element_type=jnp.float32)     # (H*S_t, N, hd)

        # Merge heads back onto the lane axis in scratch, then a single
        # (T, E) @ (E, E) output projection on the MXU.
        for h in range(HEADS):
            attn_ref[:, h * HEAD_DIM:(h + 1) * HEAD_DIM] = (
                ctx[h * S_t:(h + 1) * S_t].reshape(T, HEAD_DIM))
        attn = jnp.dot(attn_ref[...], out_w,
                       preferred_element_type=jnp.float32) + _vec(vslab, "out_b")

        # residual + norm1 (dropout = identity in eval mode)
        h1 = _layernorm(attn + cur, _vec(vslab, "g1"), _vec(vslab, "be1"))
        # feed-forward: Linear -> ReLU -> Linear
        ff = jnp.maximum(
            jnp.dot(h1, w1, preferred_element_type=jnp.float32)
            + _vec(vslab, "b1"), 0.0)
        ff = jnp.dot(ff, w2,
                     preferred_element_type=jnp.float32) + _vec(vslab, "b2")
        # residual + norm2 (dropout = identity)
        cur = _layernorm(ff + h1, _vec(vslab, "g2"), _vec(vslab, "be2"))

    # ---- fc_out, stored lane-dense as one (1, T) row vector ------------------
    # (cur is the transposed MXU operand once per tile; cheaper than a masked
    #  single-lane (T, 1) store.)
    fcw = fcp_ref[0:1, :E]                                 # (1, E)
    fcb = fcp_ref[1:2, 0:1]                                # (1, 1)
    o_ref[...] = lax.dot_general(fcw, cur, (((1,), (1,)), ((), ())),
                                 preferred_element_type=jnp.float32) + fcb


# ----------------------------- wrapper / glue ---------------------------------
@jax.jit
def transformer_discriminator(packed, x):
    if x.ndim != 4 or x.shape[1] != 1:
        raise ValueError("expected input of shape (N, 1, seq_length, input_dim)")
    x = jnp.squeeze(x, axis=1)                       # (N, S, D_in)
    N, S, D = x.shape
    # nn.MultiheadAttention batch_first=False: tokens mix along axis 0 (N),
    # S is the attention batch.  Kernel works on an s-major (S*N, E) slab.
    x_t = jnp.transpose(x, (1, 0, 2))                # (S, N, D)
    # positional + embedding bias pre-expanded to one row per token (t = s*N+n)
    pos_tok = jnp.repeat(packed["pos_bias"][:S], N, axis=0)   # (S*N, E)

    TS = S            # one S-tile at these sizes (grid of 1); tiles are
    if S % TS:        # independent because attention is batched over S.
        raise ValueError("S must be divisible by the S-tile size")
    grid = (S // TS,)
    t_tile = TS * N

    def weight_spec(shape):
        return pl.BlockSpec(shape, lambda i, _s=shape: (0,) * len(_s))

    args = (x_t, packed["w_emb"], pos_tok, packed["in_w"], packed["out_w"],
            packed["w1"], packed["w2"], packed["vecs"], packed["fcp"])
    out = pl.pallas_call(
        _fused_kernel,
        grid=grid,
        in_specs=[
            pl.BlockSpec((TS, N, D), lambda i: (i, 0, 0)),        # x tile
            weight_spec(packed["w_emb"].shape),                   # (D, E)
            pl.BlockSpec((t_tile, EMBED), lambda i: (i, 0)),      # pos tile
            weight_spec(packed["in_w"].shape),                    # (L, E, 3E)
            weight_spec(packed["out_w"].shape),                   # (L, E, E)
            weight_spec(packed["w1"].shape),                      # (L, E, H)
            weight_spec(packed["w2"].shape),                      # (L, H, E)
            weight_spec(packed["vecs"].shape),                    # (L, F, 128)
            weight_spec(packed["fcp"].shape),                     # (2, 128)
        ],
        out_specs=pl.BlockSpec((1, t_tile), lambda i: (0, i)),
        out_shape=jax.ShapeDtypeStruct((1, S * N), jnp.float32),
        scratch_shapes=[
            pltpu.VMEM((HEADS * TS, N, HEAD_QKV), jnp.float32),   # head-stacked QKV
            pltpu.VMEM((t_tile, EMBED), jnp.float32),             # head-concat buf
        ],
        compiler_params=pltpu.CompilerParams(
            dimension_semantics=("parallel",),
            vmem_limit_bytes=32 * 1024 * 1024),
    )(*args)
    # kernel column index = s*N + n  ->  (S, N) -> (N, S, 1)
    return jnp.transpose(out.reshape(S, N), (1, 0))[..., None]


# --------------------------- parameter construction --------------------------
def init_params(key):
    scale = 0.1

    def rnd(k, shape):
        return jax.random.normal(k, shape, jnp.float32) * scale

    keys = jax.random.split(key, 5 + NUM_LAYERS)
    params = {
        "w_emb": rnd(keys[0], (EMBED, INPUT_DIM)),
        "b_emb": rnd(keys[1], (1, EMBED)),
        "pos_emb": rnd(keys[2], (MAX_LENGTH, EMBED)),
        "fc_w": rnd(keys[3], (1, EMBED)),
        "fc_b": rnd(keys[4], (1, 1)),
        "layers": [],
    }
    for l in range(NUM_LAYERS):
        lk = jax.random.split(keys[5 + l], 8)
        params["layers"].append({
            "in_w": rnd(lk[0], (3 * EMBED, EMBED)),
            "in_b": rnd(lk[1], (1, 3 * EMBED)),
            "out_w": rnd(lk[2], (EMBED, EMBED)),
            "out_b": rnd(lk[3], (1, EMBED)),
            "g1": jnp.ones((1, EMBED), jnp.float32),
            "be1": jnp.zeros((1, EMBED), jnp.float32),
            "g2": jnp.ones((1, EMBED), jnp.float32),
            "be2": jnp.zeros((1, EMBED), jnp.float32),
            "w1": rnd(lk[4], (HIDDEN, EMBED)),
            "b1": rnd(lk[5], (1, HIDDEN)),
            "w2": rnd(lk[6], (EMBED, HIDDEN)),
            "b2": rnd(lk[7], (1, EMBED)),
        })
    return params


def _qkv_head_perm():
    """Column permutation that interleaves QKV per head: [q_h | k_h | v_h]."""
    cols = []
    for h in range(HEADS):
        base = h * HEAD_DIM
        cols.append(jnp.arange(HEAD_DIM) + base)                 # q_h
        cols.append(jnp.arange(HEAD_DIM) + EMBED + base)         # k_h
        cols.append(jnp.arange(HEAD_DIM) + 2 * EMBED + base)     # v_h
    return jnp.concatenate(cols)


def pack_params(params):
    """One-time repacking (all in XLA, outside the kernel):
       * transpose every weight to (K, N_out),
       * fold 1/sqrt(hd) into the Q columns of in_proj weight/bias,
       * interleave QKV columns per head,
       * 128-lane-align bias/LayerNorm vectors (one field per sublane row),
       * fold the embedding bias into the positional table."""
    qkv_scale = jnp.concatenate(
        [jnp.full((EMBED,), 1.0 / math.sqrt(HEAD_DIM), jnp.float32),
         jnp.ones((2 * EMBED,), jnp.float32)])
    perm = _qkv_head_perm()

    def pad_row(v):                                   # (1, n) -> (1, 128)
        return jnp.pad(v, ((0, 0), (0, VEC_LANES - v.shape[1])))

    in_w, out_w, w1, w2, vecs = [], [], [], [], []
    for lp in params["layers"]:
        in_w.append((lp["in_w"].T * qkv_scale[None, :])[:, perm])   # (E, 3E)
        out_w.append(lp["out_w"].T)                                 # (E, E)
        w1.append(lp["w1"].T)                                       # (E, HIDDEN)
        w2.append(lp["w2"].T)                                       # (HIDDEN, E)
        fields = {
            "in_b": (lp["in_b"] * qkv_scale[None, :])[:, perm],
            "out_b": lp["out_b"], "g1": lp["g1"], "be1": lp["be1"],
            "g2": lp["g2"], "be2": lp["be2"], "b1": lp["b1"], "b2": lp["b2"],
        }
        vecs.append(jnp.concatenate([pad_row(fields[n]) for n in _VEC_FIELDS],
                                    axis=0))                        # (F, 128)
    fcp = jnp.concatenate([pad_row(params["fc_w"]), pad_row(params["fc_b"])],
                          axis=0)                                   # (2, 128)
    return {
        "w_emb": params["w_emb"].T,                                 # (D, E)
        "pos_bias": params["pos_emb"] + params["b_emb"],            # (MAXLEN, E)
        "in_w": jnp.stack(in_w),
        "out_w": jnp.stack(out_w),
        "w1": jnp.stack(w1),
        "w2": jnp.stack(w2),
        "vecs": jnp.stack(vecs),                                    # (L, F, 128)
        "fcp": fcp,
    }


# ------------------------------ pure-JAX reference ---------------------------
def _ln_ref(x, g, b):
    mu = jnp.mean(x, axis=-1, keepdims=True)
    var = jnp.mean(jnp.square(x - mu), axis=-1, keepdims=True)
    return (x - mu) / jnp.sqrt(var + EPS) * g + b


def reference_forward(params, x):
    x = jnp.squeeze(x, axis=1)
    N, S, _ = x.shape
    out = (jnp.einsum("nsd,ed->nse", x, params["w_emb"])
           + params["b_emb"][0] + params["pos_emb"][:S][None])
    for lp in params["layers"]:
        q_in = out
        qkv = jnp.einsum("nse,fe->nsf", q_in, lp["in_w"]) + lp["in_b"][0]
        q = qkv[..., :EMBED].reshape(N, S, HEADS, HEAD_DIM)
        k = qkv[..., EMBED:2 * EMBED].reshape(N, S, HEADS, HEAD_DIM)
        v = qkv[..., 2 * EMBED:].reshape(N, S, HEADS, HEAD_DIM)
        scores = jnp.einsum("nshd,mshd->shnm", q, k) / math.sqrt(HEAD_DIM)
        p = jax.nn.softmax(scores, axis=-1)
        attn = jnp.einsum("shnm,mshd->nshd", p, v).reshape(N, S, EMBED)
        attn = jnp.einsum("nse,fe->nsf", attn, lp["out_w"]) + lp["out_b"][0]
        h = _ln_ref(attn + q_in, lp["g1"][0], lp["be1"][0])
        ff = jax.nn.relu(jnp.einsum("nse,fe->nsf", h, lp["w1"]) + lp["b1"][0])
        ff = jnp.einsum("nsf,ef->nse", ff, lp["w2"]) + lp["b2"][0]
        out = _ln_ref(ff + h, lp["g2"][0], lp["be2"][0])
    return jnp.einsum("nse,fe->nsf", out, params["fc_w"]) + params["fc_b"][0]


# ----------------------------------- main ------------------------------------
if __name__ == "__main__":
    key = jax.random.PRNGKey(0)
    pkey, xkey = jax.random.split(key)
    params = init_params(pkey)
    packed = pack_params(params)

    N, S = 2, 8
    x = jax.random.normal(xkey, (N, 1, S, INPUT_DIM), jnp.float32)

    out = jax.block_until_ready(transformer_discriminator(packed, x))
    assert out.shape == (N, S, 1), out.shape

    ref = reference_forward(params, x)
    err = float(jnp.max(jnp.abs(out - ref)))
    # exact softmax normalization + f32 math everywhere -> tight tolerance
    assert err < 1e-3, f"mismatch vs reference: {err}"

    print("KERNEL_OK")
</pallas_src>

<mosaic_0001>
module attributes {stable_mosaic.version = 11 : i64} {
  func.func @_fused_kernel(%arg0: i32, %arg1: memref<8x2x16xf32, #tpu.memory_space<vmem>>, %arg2: memref<16x32xf32, #tpu.memory_space<vmem>>, %arg3: memref<16x32xf32, #tpu.memory_space<vmem>>, %arg4: memref<2x32x96xf32, #tpu.memory_space<vmem>>, %arg5: memref<2x32x32xf32, #tpu.memory_space<vmem>>, %arg6: memref<2x32x64xf32, #tpu.memory_space<vmem>>, %arg7: memref<2x64x32xf32, #tpu.memory_space<vmem>>, %arg8: memref<2x8x128xf32, #tpu.memory_space<vmem>>, %arg9: memref<2x128xf32, #tpu.memory_space<vmem>>, %arg10: memref<1x16xf32, #tpu.memory_space<vmem>>, %arg11: memref<32x2x24xf32, #tpu.memory_space<vmem>>, %arg12: memref<16x32xf32, #tpu.memory_space<vmem>>) attributes {dimension_semantics = [#tpu.dimension_semantics<parallel>], iteration_bounds = array<i64: 1>, scalar_prefetch = 0 : i64, scratch_operands = 2 : i64, tpu.core_type = #tpu.core_type<tc>, window_params = [{transform_indices = @transform_0, window_bounds = array<i64: 8, 2, 16>}, {pipeline_mode = #tpu.pipeline_mode<synchronous>, transform_indices = @transform_1, window_bounds = array<i64: 16, 32>}, {transform_indices = @transform_2, window_bounds = array<i64: 16, 32>}, {pipeline_mode = #tpu.pipeline_mode<synchronous>, transform_indices = @transform_3, window_bounds = array<i64: 2, 32, 96>}, {pipeline_mode = #tpu.pipeline_mode<synchronous>, transform_indices = @transform_4, window_bounds = array<i64: 2, 32, 32>}, {pipeline_mode = #tpu.pipeline_mode<synchronous>, transform_indices = @transform_5, window_bounds = array<i64: 2, 32, 64>}, {pipeline_mode = #tpu.pipeline_mode<synchronous>, transform_indices = @transform_6, window_bounds = array<i64: 2, 64, 32>}, {pipeline_mode = #tpu.pipeline_mode<synchronous>, transform_indices = @transform_7, window_bounds = array<i64: 2, 8, 128>}, {pipeline_mode = #tpu.pipeline_mode<synchronous>, transform_indices = @transform_8, window_bounds = array<i64: 2, 128>}, {transform_indices = @transform_9, window_bounds = array<i64: 1, 16>}]} {
    %c0 = arith.constant 0 : index
    %c0_0 = arith.constant 0 : index
    %c0_1 = arith.constant 0 : index
    %0 = vector.load %arg1[%c0, %c0_0, %c0_1] : memref<8x2x16xf32, #tpu.memory_space<vmem>>, vector<8x2x16xf32>
    %1 = vector.shape_cast %0 : vector<8x2x16xf32> to vector<16x16xf32>
    %c0_2 = arith.constant 0 : index
    %c0_3 = arith.constant 0 : index
    %2 = vector.load %arg2[%c0_2, %c0_3] : memref<16x32xf32, #tpu.memory_space<vmem>>, vector<16x32xf32>
    %cst = arith.constant dense<0.000000e+00> : vector<16x32xf32>
    %3 = tpu.matmul %1, %2, %cst {dimension_numbers = #tpu.dot_dimension_numbers<[1], [0], [0], [1], [0, 0, 1, 1], [], []>} : vector<16x16xf32>, vector<16x32xf32>, vector<16x32xf32> -> vector<16x32xf32>
    %c0_4 = arith.constant 0 : index
    %c0_5 = arith.constant 0 : index
    %4 = vector.load %arg3[%c0_4, %c0_5] : memref<16x32xf32, #tpu.memory_space<vmem>>, vector<16x32xf32>
    %5 = arith.addf %3, %4 : vector<16x32xf32>
    %c0_6 = arith.constant 0 : index
    %c0_7 = arith.constant 0 : index
    %c0_8 = arith.constant 0 : index
    %6 = vector.load %arg4[%c0_6, %c0_7, %c0_8] : memref<2x32x96xf32, #tpu.memory_space<vmem>>, vector<1x32x96xf32>
    %7 = vector.shape_cast %6 : vector<1x32x96xf32> to vector<32x96xf32>
    %c0_9 = arith.constant 0 : index
    %c0_10 = arith.constant 0 : index
    %c0_11 = arith.constant 0 : index
    %8 = vector.load %arg5[%c0_9, %c0_10, %c0_11] : memref<2x32x32xf32, #tpu.memory_space<vmem>>, vector<1x32x32xf32>
    %9 = vector.shape_cast %8 : vector<1x32x32xf32> to vector<32x32xf32>
    %c0_12 = arith.constant 0 : index
    %c0_13 = arith.constant 0 : index
    %c0_14 = arith.constant 0 : index
    %10 = vector.load %arg6[%c0_12, %c0_13, %c0_14] : memref<2x32x64xf32, #tpu.memory_space<vmem>>, vector<1x32x64xf32>
    %11 = vector.shape_cast %10 : vector<1x32x64xf32> to vector<32x64xf32>
    %c0_15 = arith.constant 0 : index
    %c0_16 = arith.constant 0 : index
    %c0_17 = arith.constant 0 : index
    %12 = vector.load %arg7[%c0_15, %c0_16, %c0_17] : memref<2x64x32xf32, #tpu.memory_space<vmem>>, vector<1x64x32xf32>
    %13 = vector.shape_cast %12 : vector<1x64x32xf32> to vector<64x32xf32>
    %c0_18 = arith.constant 0 : index
    %c0_19 = arith.constant 0 : index
    %c0_20 = arith.constant 0 : index
    %14 = vector.load %arg8[%c0_18, %c0_19, %c0_20] : memref<2x8x128xf32, #tpu.memory_space<vmem>>, vector<1x8x128xf32>
    %15 = vector.shape_cast %14 : vector<1x8x128xf32> to vector<8x128xf32>
    %cst_21 = arith.constant dense<0.000000e+00> : vector<16x96xf32>
    %16 = tpu.matmul %5, %7, %cst_21 {dimension_numbers = #tpu.dot_dimension_numbers<[1], [0], [0], [1], [0, 0, 1, 1], [], []>} : vector<16x32xf32>, vector<32x96xf32>, vector<16x96xf32> -> vector<16x96xf32>
    %17 = vector.extract_strided_slice %15 {offsets = [0, 0], sizes = [1, 96], strides = [1, 1]} : vector<8x128xf32> to vector<1x96xf32>
    %18 = vector.broadcast %17 : vector<1x96xf32> to vector<16x96xf32>
    %19 = arith.addf %16, %18 : vector<16x96xf32>
    %20 = vector.shape_cast %19 : vector<16x96xf32> to vector<8x2x96xf32>
    %21 = vector.extract_strided_slice %20 {offsets = [0, 0, 0], sizes = [8, 2, 24], strides = [1, 1, 1]} : vector<8x2x96xf32> to vector<8x2x24xf32>
    %c0_22 = arith.constant 0 : index
    %c0_23 = arith.constant 0 : index
    %c0_24 = arith.constant 0 : index
    %22 = vector.load %arg11[%c0_22, %c0_23, %c0_24] : memref<32x2x24xf32, #tpu.memory_space<vmem>>, vector<8x2x24xf32>
    tpu.vector_store %arg11[%c0_22, %c0_23, %c0_24], %21 {strides = array<i32>} : memref<32x2x24xf32, #tpu.memory_space<vmem>>, vector<8x2x24xf32>,
    %23 = vector.extract_strided_slice %20 {offsets = [0, 0, 24], sizes = [8, 2, 24], strides = [1, 1, 1]} : vector<8x2x96xf32> to vector<8x2x24xf32>
    %c8 = arith.constant 8 : index
    %c0_25 = arith.constant 0 : index
    %c0_26 = arith.constant 0 : index
    %24 = vector.load %arg11[%c8, %c0_25, %c0_26] : memref<32x2x24xf32, #tpu.memory_space<vmem>>, vector<8x2x24xf32>
    tpu.vector_store %arg11[%c8, %c0_25, %c0_26], %23 {strides = array<i32>} : memref<32x2x24xf32, #tpu.memory_space<vmem>>, vector<8x2x24xf32>,
    %25 = vector.extract_strided_slice %20 {offsets = [0, 0, 48], sizes = [8, 2, 24], strides = [1, 1, 1]} : vector<8x2x96xf32> to vector<8x2x24xf32>
    %c16 = arith.constant 16 : index
    %c0_27 = arith.constant 0 : index
    %c0_28 = arith.constant 0 : index
    %26 = vector.load %arg11[%c16, %c0_27, %c0_28] : memref<32x2x24xf32, #tpu.memory_space<vmem>>, vector<8x2x24xf32>
    tpu.vector_store %arg11[%c16, %c0_27, %c0_28], %25 {strides = array<i32>} : memref<32x2x24xf32, #tpu.memory_space<vmem>>, vector<8x2x24xf32>,
    %27 = vector.extract_strided_slice %20 {offsets = [0, 0, 72], sizes = [8, 2, 24], strides = [1, 1, 1]} : vector<8x2x96xf32> to vector<8x2x24xf32>
    %c24 = arith.constant 24 : index
    %c0_29 = arith.constant 0 : index
    %c0_30 = arith.constant 0 : index
    %28 = vector.load %arg11[%c24, %c0_29, %c0_30] : memref<32x2x24xf32, #tpu.memory_space<vmem>>, vector<8x2x24xf32>
    tpu.vector_store %arg11[%c24, %c0_29, %c0_30], %27 {strides = array<i32>} : memref<32x2x24xf32, #tpu.memory_space<vmem>>, vector<8x2x24xf32>,
    %c0_31 = arith.constant 0 : index
    %c0_32 = arith.constant 0 : index
    %c0_33 = arith.constant 0 : index
    %29 = vector.load %arg11[%c0_31, %c0_32, %c0_33] : memref<32x2x24xf32, #tpu.memory_space<vmem>>, vector<32x2x24xf32>
    %30 = vector.extract_strided_slice %29 {offsets = [0, 0, 0], sizes = [32, 2, 8], strides = [1, 1, 1]} : vector<32x2x24xf32> to vector<32x2x8xf32>
    %31 = vector.extract_strided_slice %29 {offsets = [0, 0, 8], sizes = [32, 2, 8], strides = [1, 1, 1]} : vector<32x2x24xf32> to vector<32x2x8xf32>
    %32 = vector.extract_strided_slice %29 {offsets = [0, 0, 16], sizes = [32, 2, 8], strides = [1, 1, 1]} : vector<32x2x24xf32> to vector<32x2x8xf32>
    "tpu.trace_start"() <{level = 10 : i32, message = "bnd,bmd->bnm"}> : () -> ()
    %cst_34 = arith.constant dense<0.000000e+00> : vector<32x2x2xf32>
    %33 = tpu.matmul %30, %31, %cst_34 {dimension_numbers = #tpu.dot_dimension_numbers<[2], [2], [1], [1], [0, 0, 0, 1, 1, 1], [0], [0]>} : vector<32x2x8xf32>, vector<32x2x8xf32>, vector<32x2x2xf32> -> vector<32x2x2xf32>
    "tpu.trace_stop"() : () -> ()
    %cst_35 = arith.constant dense<0xFF800000> : vector<32x2xf32>
    %34 = vector.multi_reduction <maximumf>, %33, %cst_35 [2] : vector<32x2x2xf32> to vector<32x2xf32>
    %35 = vector.shape_cast %34 : vector<32x2xf32> to vector<32x2x1xf32>
    %36 = vector.broadcast %35 : vector<32x2x1xf32> to vector<32x2x2xf32>
    %37 = arith.subf %33, %36 : vector<32x2x2xf32>
    %38 = math.exp %37 : vector<32x2x2xf32>
    %cst_36 = arith.constant dense<0.000000e+00> : vector<32x2xf32>
    %39 = vector.multi_reduction <add>, %38, %cst_36 [2] : vector<32x2x2xf32> to vector<32x2xf32>
    %40 = vector.shape_cast %39 : vector<32x2xf32> to vector<32x2x1xf32>
    %41 = vector.broadcast %40 : vector<32x2x1xf32> to vector<32x2x2xf32>
    %42 = arith.divf %38, %41 : vector<32x2x2xf32>
    "tpu.trace_start"() <{level = 10 : i32, message = "bnm,bmd->bnd"}> : () -> ()
    %cst_37 = arith.constant dense<0.000000e+00> : vector<32x2x8xf32>
    %43 = tpu.matmul %42, %32, %cst_37 {dimension_numbers = #tpu.dot_dimension_numbers<[2], [1], [1], [2], [0, 0, 0, 1, 1, 2], [0], [0]>} : vector<32x2x2xf32>, vector<32x2x8xf32>, vector<32x2x8xf32> -> vector<32x2x8xf32>
    "tpu.trace_stop"() : () -> ()
    %44 = vector.extract_strided_slice %43 {offsets = [0, 0, 0], sizes = [8, 2, 8], strides = [1, 1, 1]} : vector<32x2x8xf32> to vector<8x2x8xf32>
    %45 = vector.shape_cast %44 : vector<8x2x8xf32> to vector<16x8xf32>
    %c0_38 = arith.constant 0 : index
    %c0_39 = arith.constant 0 : index
    %46 = vector.load %arg12[%c0_38, %c0_39] : memref<16x32xf32, #tpu.memory_space<vmem>>, vector<16x8xf32>
    tpu.vector_store %arg12[%c0_38, %c0_39], %45 {strides = array<i32>} : memref<16x32xf32, #tpu.memory_space<vmem>>, vector<16x8xf32>,
    %47 = vector.extract_strided_slice %43 {offsets = [8, 0, 0], sizes = [8, 2, 8], strides = [1, 1, 1]} : vector<32x2x8xf32> to vector<8x2x8xf32>
    %48 = vector.shape_cast %47 : vector<8x2x8xf32> to vector<16x8xf32>
    %c0_40 = arith.constant 0 : index
    %c8_41 = arith.constant 8 : index
    %49 = vector.load %arg12[%c0_40, %c8_41] : memref<16x32xf32, #tpu.memory_space<vmem>>, vector<16x8xf32>
    tpu.vector_store %arg12[%c0_40, %c8_41], %48 {strides = array<i32>} : memref<16x32xf32, #tpu.memory_space<vmem>>, vector<16x8xf32>,
    %50 = vector.extract_strided_slice %43 {offsets = [16, 0, 0], sizes = [8, 2, 8], strides = [1, 1, 1]} : vector<32x2x8xf32> to vector<8x2x8xf32>
    %51 = vector.shape_cast %50 : vector<8x2x8xf32> to vector<16x8xf32>
    %c0_42 = arith.constant 0 : index
    %c16_43 = arith.constant 16 : index
    %52 = vector.load %arg12[%c0_42, %c16_43] : memref<16x32xf32, #tpu.memory_space<vmem>>, vector<16x8xf32>
    tpu.vector_store %arg12[%c0_42, %c16_43], %51 {strides = array<i32>} : memref<16x32xf32, #tpu.memory_space<vmem>>, vector<16x8xf32>,
    %53 = vector.extract_strided_slice %43 {offsets = [24, 0, 0], sizes = [8, 2, 8], strides = [1, 1, 1]} : vector<32x2x8xf32> to vector<8x2x8xf32>
    %54 = vector.shape_cast %53 : vector<8x2x8xf32> to vector<16x8xf32>
    %c0_44 = arith.constant 0 : index
    %c24_45 = arith.constant 24 : index
    %55 = vector.load %arg12[%c0_44, %c24_45] : memref<16x32xf32, #tpu.memory_space<vmem>>, vector<16x8xf32>
    tpu.vector_store %arg12[%c0_44, %c24_45], %54 {strides = array<i32>} : memref<16x32xf32, #tpu.memory_space<vmem>>, vector<16x8xf32>,
    %c0_46 = arith.constant 0 : index
    %c0_47 = arith.constant 0 : index
    %56 = vector.load %arg12[%c0_46, %c0_47] : memref<16x32xf32, #tpu.memory_space<vmem>>, vector<16x32xf32>
    %cst_48 = arith.constant dense<0.000000e+00> : vector<16x32xf32>
    %57 = tpu.matmul %56, %9, %cst_48 {dimension_numbers = #tpu.dot_dimension_numbers<[1], [0], [0], [1], [0, 0, 1, 1], [], []>} : vector<16x32xf32>, vector<32x32xf32>, vector<16x32xf32> -> vector<16x32xf32>
    %58 = vector.extract_strided_slice %15 {offsets = [1, 0], sizes = [1, 32], strides = [1, 1]} : vector<8x128xf32> to vector<1x32xf32>
    %59 = vector.broadcast %58 : vector<1x32xf32> to vector<16x32xf32>
    %60 = arith.addf %57, %59 : vector<16x32xf32>
    %61 = arith.addf %60, %5 : vector<16x32xf32>
    %62 = vector.extract_strided_slice %15 {offsets = [2, 0], sizes = [1, 32], strides = [1, 1]} : vector<8x128xf32> to vector<1x32xf32>
    %63 = vector.extract_strided_slice %15 {offsets = [3, 0], sizes = [1, 32], strides = [1, 1]} : vector<8x128xf32> to vector<1x32xf32>
    %cst_49 = arith.constant dense<0.000000e+00> : vector<16xf32>
    %64 = vector.multi_reduction <add>, %61, %cst_49 [1] : vector<16x32xf32> to vector<16xf32>
    %65 = vector.shape_cast %64 : vector<16xf32> to vector<16x1xf32>
    %cst_50 = arith.constant 3.200000e+01 : f32
    %66 = vector.broadcast %cst_50 : f32 to vector<16x1xf32>
    %67 = arith.divf %65, %66 : vector<16x1xf32>
    %68 = vector.broadcast %67 : vector<16x1xf32> to vector<16x32xf32>
    %69 = arith.subf %61, %68 : vector<16x32xf32>
    %70 = arith.mulf %69, %69 : vector<16x32xf32>
    %cst_51 = arith.constant dense<0.000000e+00> : vector<16xf32>
    %71 = vector.multi_reduction <add>, %70, %cst_51 [1] : vector<16x32xf32> to vector<16xf32>
    %72 = vector.shape_cast %71 : vector<16xf32> to vector<16x1xf32>
    %cst_52 = arith.constant 3.200000e+01 : f32
    %73 = vector.broadcast %cst_52 : f32 to vector<16x1xf32>
    %74 = arith.divf %72, %73 : vector<16x1xf32>
    %75 = vector.broadcast %67 : vector<16x1xf32> to vector<16x32xf32>
    %76 = arith.subf %61, %75 : vector<16x32xf32>
    %cst_53 = arith.constant 9.99999974E-6 : f32
    %77 = vector.broadcast %cst_53 : f32 to vector<16x1xf32>
    %78 = arith.addf %74, %77 : vector<16x1xf32>
    %79 = math.rsqrt %78 : vector<16x1xf32>
    %80 = vector.broadcast %79 : vector<16x1xf32> to vector<16x32xf32>
    %81 = arith.mulf %76, %80 : vector<16x32xf32>
    %82 = vector.broadcast %62 : vector<1x32xf32> to vector<16x32xf32>
    %83 = arith.mulf %81, %82 : vector<16x32xf32>
    %84 = vector.broadcast %63 : vector<1x32xf32> to vector<16x32xf32>
    %85 = arith.addf %83, %84 : vector<16x32xf32>
    %cst_54 = arith.constant dense<0.000000e+00> : vector<16x64xf32>
    %86 = tpu.matmul %85, %11, %cst_54 {dimension_numbers = #tpu.dot_dimension_numbers<[1], [0], [0], [1], [0, 0, 1, 1], [], []>} : vector<16x32xf32>, vector<32x64xf32>, vector<16x64xf32> -> vector<16x64xf32>
    %87 = vector.extract_strided_slice %15 {offsets = [6, 0], sizes = [1, 64], strides = [1, 1]} : vector<8x128xf32> to vector<1x64xf32>
    %88 = vector.broadcast %87 : vector<1x64xf32> to vector<16x64xf32>
    %89 = arith.addf %86, %88 : vector<16x64xf32>
    %cst_55 = arith.constant 0.000000e+00 : f32
    %90 = vector.broadcast %cst_55 : f32 to vector<16x64xf32>
    %91 = arith.maximumf %89, %90 : vector<16x64xf32>
    %cst_56 = arith.constant dense<0.000000e+00> : vector<16x32xf32>
    %92 = tpu.matmul %91, %13, %cst_56 {dimension_numbers = #tpu.dot_dimension_numbers<[1], [0], [0], [1], [0, 0, 1, 1], [], []>} : vector<16x64xf32>, vector<64x32xf32>, vector<16x32xf32> -> vector<16x32xf32>
    %93 = vector.extract_strided_slice %15 {offsets = [7, 0], sizes = [1, 32], strides = [1, 1]} : vector<8x128xf32> to vector<1x32xf32>
    %94 = vector.broadcast %93 : vector<1x32xf32> to vector<16x32xf32>
    %95 = arith.addf %92, %94 : vector<16x32xf32>
    %96 = arith.addf %95, %85 : vector<16x32xf32>
    %97 = vector.extract_strided_slice %15 {offsets = [4, 0], sizes = [1, 32], strides = [1, 1]} : vector<8x128xf32> to vector<1x32xf32>
    %98 = vector.extract_strided_slice %15 {offsets = [5, 0], sizes = [1, 32], strides = [1, 1]} : vector<8x128xf32> to vector<1x32xf32>
    %cst_57 = arith.constant dense<0.000000e+00> : vector<16xf32>
    %99 = vector.multi_reduction <add>, %96, %cst_57 [1] : vector<16x32xf32> to vector<16xf32>
    %100 = vector.shape_cast %99 : vector<16xf32> to vector<16x1xf32>
    %cst_58 = arith.constant 3.200000e+01 : f32
    %101 = vector.broadcast %cst_58 : f32 to vector<16x1xf32>
    %102 = arith.divf %100, %101 : vector<16x1xf32>
    %103 = vector.broadcast %102 : vector<16x1xf32> to vector<16x32xf32>
    %104 = arith.subf %96, %103 : vector<16x32xf32>
    %105 = arith.mulf %104, %104 : vector<16x32xf32>
    %cst_59 = arith.constant dense<0.000000e+00> : vector<16xf32>
    %106 = vector.multi_reduction <add>, %105, %cst_59 [1] : vector<16x32xf32> to vector<16xf32>
    %107 = vector.shape_cast %106 : vector<16xf32> to vector<16x1xf32>
    %cst_60 = arith.constant 3.200000e+01 : f32
    %108 = vector.broadcast %cst_60 : f32 to vector<16x1xf32>
    %109 = arith.divf %107, %108 : vector<16x1xf32>
    %110 = vector.broadcast %102 : vector<16x1xf32> to vector<16x32xf32>
    %111 = arith.subf %96, %110 : vector<16x32xf32>
    %cst_61 = arith.constant 9.99999974E-6 : f32
    %112 = vector.broadcast %cst_61 : f32 to vector<16x1xf32>
    %113 = arith.addf %109, %112 : vector<16x1xf32>
    %114 = math.rsqrt %113 : vector<16x1xf32>
    %115 = vector.broadcast %114 : vector<16x1xf32> to vector<16x32xf32>
    %116 = arith.mulf %111, %115 : vector<16x32xf32>
    %117 = vector.broadcast %97 : vector<1x32xf32> to vector<16x32xf32>
    %118 = arith.mulf %116, %117 : vector<16x32xf32>
    %119 = vector.broadcast %98 : vector<1x32xf32> to vector<16x32xf32>
    %120 = arith.addf %118, %119 : vector<16x32xf32>
    %c1 = arith.constant 1 : index
    %c0_62 = arith.constant 0 : index
    %c0_63 = arith.constant 0 : index
    %121 = vector.load %arg4[%c1, %c0_62, %c0_63] : memref<2x32x96xf32, #tpu.memory_space<vmem>>, vector<1x32x96xf32>
    %122 = vector.shape_cast %121 : vector<1x32x96xf32> to vector<32x96xf32>
    %c1_64 = arith.constant 1 : index
    %c0_65 = arith.constant 0 : index
    %c0_66 = arith.constant 0 : index
    %123 = vector.load %arg5[%c1_64, %c0_65, %c0_66] : memref<2x32x32xf32, #tpu.memory_space<vmem>>, vector<1x32x32xf32>
    %124 = vector.shape_cast %123 : vector<1x32x32xf32> to vector<32x32xf32>
    %c1_67 = arith.constant 1 : index
    %c0_68 = arith.constant 0 : index
    %c0_69 = arith.constant 0 : index
    %125 = vector.load %arg6[%c1_67, %c0_68, %c0_69] : memref<2x32x64xf32, #tpu.memory_space<vmem>>, vector<1x32x64xf32>
    %126 = vector.shape_cast %125 : vector<1x32x64xf32> to vector<32x64xf32>
    %c1_70 = arith.constant 1 : index
    %c0_71 = arith.constant 0 : index
    %c0_72 = arith.constant 0 : index
    %127 = vector.load %arg7[%c1_70, %c0_71, %c0_72] : memref<2x64x32xf32, #tpu.memory_space<vmem>>, vector<1x64x32xf32>
    %128 = vector.shape_cast %127 : vector<1x64x32xf32> to vector<64x32xf32>
    %c1_73 = arith.constant 1 : index
    %c0_74 = arith.constant 0 : index
    %c0_75 = arith.constant 0 : index
    %129 = vector.load %arg8[%c1_73, %c0_74, %c0_75] : memref<2x8x128xf32, #tpu.memory_space<vmem>>, vector<1x8x128xf32>
    %130 = vector.shape_cast %129 : vector<1x8x128xf32> to vector<8x128xf32>
    %cst_76 = arith.constant dense<0.000000e+00> : vector<16x96xf32>
    %131 = tpu.matmul %120, %122, %cst_76 {dimension_numbers = #tpu.dot_dimension_numbers<[1], [0], [0], [1], [0, 0, 1, 1], [], []>} : vector<16x32xf32>, vector<32x96xf32>, vector<16x96xf32> -> vector<16x96xf32>
    %132 = vector.extract_strided_slice %130 {offsets = [0, 0], sizes = [1, 96], strides = [1, 1]} : vector<8x128xf32> to vector<1x96xf32>
    %133 = vector.broadcast %132 : vector<1x96xf32> to vector<16x96xf32>
    %134 = arith.addf %131, %133 : vector<16x96xf32>
    %135 = vector.shape_cast %134 : vector<16x96xf32> to vector<8x2x96xf32>
    %136 = vector.extract_strided_slice %135 {offsets = [0, 0, 0], sizes = [8, 2, 24], strides = [1, 1, 1]} : vector<8x2x96xf32> to vector<8x2x24xf32>
    %c0_77 = arith.constant 0 : index
    %c0_78 = arith.constant 0 : index
    %c0_79 = arith.constant 0 : index
    %137 = vector.load %arg11[%c0_77, %c0_78, %c0_79] : memref<32x2x24xf32, #tpu.memory_space<vmem>>, vector<8x2x24xf32>
    tpu.vector_store %arg11[%c0_77, %c0_78, %c0_79], %136 {strides = array<i32>} : memref<32x2x24xf32, #tpu.memory_space<vmem>>, vector<8x2x24xf32>,
    %138 = vector.extract_strided_slice %135 {offsets = [0, 0, 24], sizes = [8, 2, 24], strides = [1, 1, 1]} : vector<8x2x96xf32> to vector<8x2x24xf32>
    %c8_80 = arith.constant 8 : index
    %c0_81 = arith.constant 0 : index
    %c0_82 = arith.constant 0 : index
    %139 = vector.load %arg11[%c8_80, %c0_81, %c0_82] : memref<32x2x24xf32, #tpu.memory_space<vmem>>, vector<8x2x24xf32>
    tpu.vector_store %arg11[%c8_80, %c0_81, %c0_82], %138 {strides = array<i32>} : memref<32x2x24xf32, #tpu.memory_space<vmem>>, vector<8x2x24xf32>,
    %140 = vector.extract_strided_slice %135 {offsets = [0, 0, 48], sizes = [8, 2, 24], strides = [1, 1, 1]} : vector<8x2x96xf32> to vector<8x2x24xf32>
    %c16_83 = arith.constant 16 : index
    %c0_84 = arith.constant 0 : index
    %c0_85 = arith.constant 0 : index
    %141 = vector.load %arg11[%c16_83, %c0_84, %c0_85] : memref<32x2x24xf32, #tpu.memory_space<vmem>>, vector<8x2x24xf32>
    tpu.vector_store %arg11[%c16_83, %c0_84, %c0_85], %140 {strides = array<i32>} : memref<32x2x24xf32, #tpu.memory_space<vmem>>, vector<8x2x24xf32>,
    %142 = vector.extract_strided_slice %135 {offsets = [0, 0, 72], sizes = [8, 2, 24], strides = [1, 1, 1]} : vector<8x2x96xf32> to vector<8x2x24xf32>
    %c24_86 = arith.constant 24 : index
    %c0_87 = arith.constant 0 : index
    %c0_88 = arith.constant 0 : index
    %143 = vector.load %arg11[%c24_86, %c0_87, %c0_88] : memref<32x2x24xf32, #tpu.memory_space<vmem>>, vector<8x2x24xf32>
    tpu.vector_store %arg11[%c24_86, %c0_87, %c0_88], %142 {strides = array<i32>} : memref<32x2x24xf32, #tpu.memory_space<vmem>>, vector<8x2x24xf32>,
    %c0_89 = arith.constant 0 : index
    %c0_90 = arith.constant 0 : index
    %c0_91 = arith.constant 0 : index
    %144 = vector.load %arg11[%c0_89, %c0_90, %c0_91] : memref<32x2x24xf32, #tpu.memory_space<vmem>>, vector<32x2x24xf32>
    %145 = vector.extract_strided_slice %144 {offsets = [0, 0, 0], sizes = [32, 2, 8], strides = [1, 1, 1]} : vector<32x2x24xf32> to vector<32x2x8xf32>
    %146 = vector.extract_strided_slice %144 {offsets = [0, 0, 8], sizes = [32, 2, 8], strides = [1, 1, 1]} : vector<32x2x24xf32> to vector<32x2x8xf32>
    %147 = vector.extract_strided_slice %144 {offsets = [0, 0, 16], sizes = [32, 2, 8], strides = [1, 1, 1]} : vector<32x2x24xf32> to vector<32x2x8xf32>
    "tpu.trace_start"() <{level = 10 : i32, message = "bnd,bmd->bnm"}> : () -> ()
    %cst_92 = arith.constant dense<0.000000e+00> : vector<32x2x2xf32>
    %148 = tpu.matmul %145, %146, %cst_92 {dimension_numbers = #tpu.dot_dimension_numbers<[2], [2], [1], [1], [0, 0, 0, 1, 1, 1], [0], [0]>} : vector<32x2x8xf32>, vector<32x2x8xf32>, vector<32x2x2xf32> -> vector<32x2x2xf32>
    "tpu.trace_stop"() : () -> ()
    %cst_93 = arith.constant dense<0xFF800000> : vector<32x2xf32>
    %149 = vector.multi_reduction <maximumf>, %148, %cst_93 [2] : vector<32x2x2xf32> to vector<32x2xf32>
    %150 = vector.shape_cast %149 : vector<32x2xf32> to vector<32x2x1xf32>
    %151 = vector.broadcast %150 : vector<32x2x1xf32> to vector<32x2x2xf32>
    %152 = arith.subf %148, %151 : vector<32x2x2xf32>
    %153 = math.exp %152 : vector<32x2x2xf32>
    %cst_94 = arith.constant dense<0.000000e+00> : vector<32x2xf32>
    %154 = vector.multi_reduction <add>, %153, %cst_94 [2] : vector<32x2x2xf32> to vector<32x2xf32>
    %155 = vector.shape_cast %154 : vector<32x2xf32> to vector<32x2x1xf32>
    %156 = vector.broadcast %155 : vector<32x2x1xf32> to vector<32x2x2xf32>
    %157 = arith.divf %153, %156 : vector<32x2x2xf32>
    "tpu.trace_start"() <{level = 10 : i32, message = "bnm,bmd->bnd"}> : () -> ()
    %cst_95 = arith.constant dense<0.000000e+00> : vector<32x2x8xf32>
    %158 = tpu.matmul %157, %147, %cst_95 {dimension_numbers = #tpu.dot_dimension_numbers<[2], [1], [1], [2], [0, 0, 0, 1, 1, 2], [0], [0]>} : vector<32x2x2xf32>, vector<32x2x8xf32>, vector<32x2x8xf32> -> vector<32x2x8xf32>
    "tpu.trace_stop"() : () -> ()
    %159 = vector.extract_strided_slice %158 {offsets = [0, 0, 0], sizes = [8, 2, 8], strides = [1, 1, 1]} : vector<32x2x8xf32> to vector<8x2x8xf32>
    %160 = vector.shape_cast %159 : vector<8x2x8xf32> to vector<16x8xf32>
    %c0_96 = arith.constant 0 : index
    %c0_97 = arith.constant 0 : index
    %161 = vector.load %arg12[%c0_96, %c0_97] : memref<16x32xf32, #tpu.memory_space<vmem>>, vector<16x8xf32>
    tpu.vector_store %arg12[%c0_96, %c0_97], %160 {strides = array<i32>} : memref<16x32xf32, #tpu.memory_space<vmem>>, vector<16x8xf32>,
    %162 = vector.extract_strided_slice %158 {offsets = [8, 0, 0], sizes = [8, 2, 8], strides = [1, 1, 1]} : vector<32x2x8xf32> to vector<8x2x8xf32>
    %163 = vector.shape_cast %162 : vector<8x2x8xf32> to vector<16x8xf32>
    %c0_98 = arith.constant 0 : index
    %c8_99 = arith.constant 8 : index
    %164 = vector.load %arg12[%c0_98, %c8_99] : memref<16x32xf32, #tpu.memory_space<vmem>>, vector<16x8xf32>
    tpu.vector_store %arg12[%c0_98, %c8_99], %163 {strides = array<i32>} : memref<16x32xf32, #tpu.memory_space<vmem>>, vector<16x8xf32>,
    %165 = vector.extract_strided_slice %158 {offsets = [16, 0, 0], sizes = [8, 2, 8], strides = [1, 1, 1]} : vector<32x2x8xf32> to vector<8x2x8xf32>
    %166 = vector.shape_cast %165 : vector<8x2x8xf32> to vector<16x8xf32>
    %c0_100 = arith.constant 0 : index
    %c16_101 = arith.constant 16 : index
    %167 = vector.load %arg12[%c0_100, %c16_101] : memref<16x32xf32, #tpu.memory_space<vmem>>, vector<16x8xf32>
    tpu.vector_store %arg12[%c0_100, %c16_101], %166 {strides = array<i32>} : memref<16x32xf32, #tpu.memory_space<vmem>>, vector<16x8xf32>,
    %168 = vector.extract_strided_slice %158 {offsets = [24, 0, 0], sizes = [8, 2, 8], strides = [1, 1, 1]} : vector<32x2x8xf32> to vector<8x2x8xf32>
    %169 = vector.shape_cast %168 : vector<8x2x8xf32> to vector<16x8xf32>
    %c0_102 = arith.constant 0 : index
    %c24_103 = arith.constant 24 : index
    %170 = vector.load %arg12[%c0_102, %c24_103] : memref<16x32xf32, #tpu.memory_space<vmem>>, vector<16x8xf32>
    tpu.vector_store %arg12[%c0_102, %c24_103], %169 {strides = array<i32>} : memref<16x32xf32, #tpu.memory_space<vmem>>, vector<16x8xf32>,
    %c0_104 = arith.constant 0 : index
    %c0_105 = arith.constant 0 : index
    %171 = vector.load %arg12[%c0_104, %c0_105] : memref<16x32xf32, #tpu.memory_space<vmem>>, vector<16x32xf32>
    %cst_106 = arith.constant dense<0.000000e+00> : vector<16x32xf32>
    %172 = tpu.matmul %171, %124, %cst_106 {dimension_numbers = #tpu.dot_dimension_numbers<[1], [0], [0], [1], [0, 0, 1, 1], [], []>} : vector<16x32xf32>, vector<32x32xf32>, vector<16x32xf32> -> vector<16x32xf32>
    %173 = vector.extract_strided_slice %130 {offsets = [1, 0], sizes = [1, 32], strides = [1, 1]} : vector<8x128xf32> to vector<1x32xf32>
    %174 = vector.broadcast %173 : vector<1x32xf32> to vector<16x32xf32>
    %175 = arith.addf %172, %174 : vector<16x32xf32>
    %176 = arith.addf %175, %120 : vector<16x32xf32>
    %177 = vector.extract_strided_slice %130 {offsets = [2, 0], sizes = [1, 32], strides = [1, 1]} : vector<8x128xf32> to vector<1x32xf32>
    %178 = vector.extract_strided_slice %130 {offsets = [3, 0], sizes = [1, 32], strides = [1, 1]} : vector<8x128xf32> to vector<1x32xf32>
    %cst_107 = arith.constant dense<0.000000e+00> : vector<16xf32>
    %179 = vector.multi_reduction <add>, %176, %cst_107 [1] : vector<16x32xf32> to vector<16xf32>
    %180 = vector.shape_cast %179 : vector<16xf32> to vector<16x1xf32>
    %cst_108 = arith.constant 3.200000e+01 : f32
    %181 = vector.broadcast %cst_108 : f32 to vector<16x1xf32>
    %182 = arith.divf %180, %181 : vector<16x1xf32>
    %183 = vector.broadcast %182 : vector<16x1xf32> to vector<16x32xf32>
    %184 = arith.subf %176, %183 : vector<16x32xf32>
    %185 = arith.mulf %184, %184 : vector<16x32xf32>
    %cst_109 = arith.constant dense<0.000000e+00> : vector<16xf32>
    %186 = vector.multi_reduction <add>, %185, %cst_109 [1] : vector<16x32xf32> to vector<16xf32>
    %187 = vector.shape_cast %186 : vector<16xf32> to vector<16x1xf32>
    %cst_110 = arith.constant 3.200000e+01 : f32
    %188 = vector.broadcast %cst_110 : f32 to vector<16x1xf32>
    %189 = arith.divf %187, %188 : vector<16x1xf32>
    %190 = vector.broadcast %182 : vector<16x1xf32> to vector<16x32xf32>
    %191 = arith.subf %176, %190 : vector<16x32xf32>
    %cst_111 = arith.constant 9.99999974E-6 : f32
    %192 = vector.broadcast %cst_111 : f32 to vector<16x1xf32>
    %193 = arith.addf %189, %192 : vector<16x1xf32>
    %194 = math.rsqrt %193 : vector<16x1xf32>
    %195 = vector.broadcast %194 : vector<16x1xf32> to vector<16x32xf32>
    %196 = arith.mulf %191, %195 : vector<16x32xf32>
    %197 = vector.broadcast %177 : vector<1x32xf32> to vector<16x32xf32>
    %198 = arith.mulf %196, %197 : vector<16x32xf32>
    %199 = vector.broadcast %178 : vector<1x32xf32> to vector<16x32xf32>
    %200 = arith.addf %198, %199 : vector<16x32xf32>
    %cst_112 = arith.constant dense<0.000000e+00> : vector<16x64xf32>
    %201 = tpu.matmul %200, %126, %cst_112 {dimension_numbers = #tpu.dot_dimension_numbers<[1], [0], [0], [1], [0, 0, 1, 1], [], []>} : vector<16x32xf32>, vector<32x64xf32>, vector<16x64xf32> -> vector<16x64xf32>
    %202 = vector.extract_strided_slice %130 {offsets = [6, 0], sizes = [1, 64], strides = [1, 1]} : vector<8x128xf32> to vector<1x64xf32>
    %203 = vector.broadcast %202 : vector<1x64xf32> to vector<16x64xf32>
    %204 = arith.addf %201, %203 : vector<16x64xf32>
    %cst_113 = arith.constant 0.000000e+00 : f32
    %205 = vector.broadcast %cst_113 : f32 to vector<16x64xf32>
    %206 = arith.maximumf %204, %205 : vector<16x64xf32>
    %cst_114 = arith.constant dense<0.000000e+00> : vector<16x32xf32>
    %207 = tpu.matmul %206, %128, %cst_114 {dimension_numbers = #tpu.dot_dimension_numbers<[1], [0], [0], [1], [0, 0, 1, 1], [], []>} : vector<16x64xf32>, vector<64x32xf32>, vector<16x32xf32> -> vector<16x32xf32>
    %208 = vector.extract_strided_slice %130 {offsets = [7, 0], sizes = [1, 32], strides = [1, 1]} : vector<8x128xf32> to vector<1x32xf32>
    %209 = vector.broadcast %208 : vector<1x32xf32> to vector<16x32xf32>
    %210 = arith.addf %207, %209 : vector<16x32xf32>
    %211 = arith.addf %210, %200 : vector<16x32xf32>
    %212 = vector.extract_strided_slice %130 {offsets = [4, 0], sizes = [1, 32], strides = [1, 1]} : vector<8x128xf32> to vector<1x32xf32>
    %213 = vector.extract_strided_slice %130 {offsets = [5, 0], sizes = [1, 32], strides = [1, 1]} : vector<8x128xf32> to vector<1x32xf32>
    %cst_115 = arith.constant dense<0.000000e+00> : vector<16xf32>
    %214 = vector.multi_reduction <add>, %211, %cst_115 [1] : vector<16x32xf32> to vector<16xf32>
    %215 = vector.shape_cast %214 : vector<16xf32> to vector<16x1xf32>
    %cst_116 = arith.constant 3.200000e+01 : f32
    %216 = vector.broadcast %cst_116 : f32 to vector<16x1xf32>
    %217 = arith.divf %215, %216 : vector<16x1xf32>
    %218 = vector.broadcast %217 : vector<16x1xf32> to vector<16x32xf32>
    %219 = arith.subf %211, %218 : vector<16x32xf32>
    %220 = arith.mulf %219, %219 : vector<16x32xf32>
    %cst_117 = arith.constant dense<0.000000e+00> : vector<16xf32>
    %221 = vector.multi_reduction <add>, %220, %cst_117 [1] : vector<16x32xf32> to vector<16xf32>
    %222 = vector.shape_cast %221 : vector<16xf32> to vector<16x1xf32>
    %cst_118 = arith.constant 3.200000e+01 : f32
    %223 = vector.broadcast %cst_118 : f32 to vector<16x1xf32>
    %224 = arith.divf %222, %223 : vector<16x1xf32>
    %225 = vector.broadcast %217 : vector<16x1xf32> to vector<16x32xf32>
    %226 = arith.subf %211, %225 : vector<16x32xf32>
    %cst_119 = arith.constant 9.99999974E-6 : f32
    %227 = vector.broadcast %cst_119 : f32 to vector<16x1xf32>
    %228 = arith.addf %224, %227 : vector<16x1xf32>
    %229 = math.rsqrt %228 : vector<16x1xf32>
    %230 = vector.broadcast %229 : vector<16x1xf32> to vector<16x32xf32>
    %231 = arith.mulf %226, %230 : vector<16x32xf32>
    %232 = vector.broadcast %212 : vector<1x32xf32> to vector<16x32xf32>
    %233 = arith.mulf %231, %232 : vector<16x32xf32>
    %234 = vector.broadcast %213 : vector<1x32xf32> to vector<16x32xf32>
    %235 = arith.addf %233, %234 : vector<16x32xf32>
    %c0_120 = arith.constant 0 : index
    %c0_121 = arith.constant 0 : index
    %236 = vector.load %arg9[%c0_120, %c0_121] : memref<2x128xf32, #tpu.memory_space<vmem>>, vector<1x32xf32>
    %c1_122 = arith.constant 1 : index
    %c0_123 = arith.constant 0 : index
    %237 = vector.load %arg9[%c1_122, %c0_123] : memref<2x128xf32, #tpu.memory_space<vmem>>, vector<1x1xf32>
    %cst_124 = arith.constant dense<0.000000e+00> : vector<1x16xf32>
    %238 = tpu.matmul %236, %235, %cst_124 {dimension_numbers = #tpu.dot_dimension_numbers<[1], [1], [0], [0], [0, 0, 1, 0], [], []>} : vector<1x32xf32>, vector<16x32xf32>, vector<1x16xf32> -> vector<1x16xf32>
    %239 = vector.broadcast %237 : vector<1x1xf32> to vector<1x16xf32>
    %240 = arith.addf %238, %239 : vector<1x16xf32>
    %c0_125 = arith.constant 0 : index
    %c0_126 = arith.constant 0 : index
    %241 = vector.load %arg10[%c0_125, %c0_126] : memref<1x16xf32, #tpu.memory_space<vmem>>, vector<1x16xf32>
    tpu.vector_store %arg10[%c0_125, %c0_126], %240 {strides = array<i32>} : memref<1x16xf32, #tpu.memory_space<vmem>>, vector<1x16xf32>,
    return
  }
  func.func @transform_0(%arg0: i32) -> (i32, i32, i32) {
    %c0_i32 = arith.constant 0 : i32
    %c0_i32_0 = arith.constant 0 : i32
    %c0_i32_1 = arith.constant 0 : i32
    return %arg0, %c0_i32, %c0_i32_0 : i32, i32, i32
  }
  func.func @transform_1(%arg0: i32) -> (i32, i32) {
    %c0_i32 = arith.constant 0 : i32
    %c0_i32_0 = arith.constant 0 : i32
    %c0_i32_1 = arith.constant 0 : i32
    return %c0_i32, %c0_i32_0 : i32, i32
  }
  func.func @transform_2(%arg0: i32) -> (i32, i32) {
    %c0_i32 = arith.constant 0 : i32
    %c0_i32_0 = arith.constant 0 : i32
    return %arg0, %c0_i32 : i32, i32
  }
  func.func @transform_3(%arg0: i32) -> (i32, i32, i32) {
    %c0_i32 = arith.constant 0 : i32
    %c0_i32_0 = arith.constant 0 : i32
    %c0_i32_1 = arith.constant 0 : i32
    %c0_i32_2 = arith.constant 0 : i32
    return %c0_i32, %c0_i32_0, %c0_i32_1 : i32, i32, i32
  }
  func.func @transform_4(%arg0: i32) -> (i32, i32, i32) {
    %c0_i32 = arith.constant 0 : i32
    %c0_i32_0 = arith.constant 0 : i32
    %c0_i32_1 = arith.constant 0 : i32
    %c0_i32_2 = arith.constant 0 : i32
    return %c0_i32, %c0_i32_0, %c0_i32_1 : i32, i32, i32
  }
  func.func @transform_5(%arg0: i32) -> (i32, i32, i32) {
    %c0_i32 = arith.constant 0 : i32
    %c0_i32_0 = arith.constant 0 : i32
    %c0_i32_1 = arith.constant 0 : i32
    %c0_i32_2 = arith.constant 0 : i32
    return %c0_i32, %c0_i32_0, %c0_i32_1 : i32, i32, i32
  }
  func.func @transform_6(%arg0: i32) -> (i32, i32, i32) {
    %c0_i32 = arith.constant 0 : i32
    %c0_i32_0 = arith.constant 0 : i32
    %c0_i32_1 = arith.constant 0 : i32
    %c0_i32_2 = arith.constant 0 : i32
    return %c0_i32, %c0_i32_0, %c0_i32_1 : i32, i32, i32
  }
  func.func @transform_7(%arg0: i32) -> (i32, i32, i32) {
    %c0_i32 = arith.constant 0 : i32
    %c0_i32_0 = arith.constant 0 : i32
    %c0_i32_1 = arith.constant 0 : i32
    %c0_i32_2 = arith.constant 0 : i32
    return %c0_i32, %c0_i32_0, %c0_i32_1 : i32, i32, i32
  }
  func.func @transform_8(%arg0: i32) -> (i32, i32) {
    %c0_i32 = arith.constant 0 : i32
    %c0_i32_0 = arith.constant 0 : i32
    %c0_i32_1 = arith.constant 0 : i32
    return %c0_i32, %c0_i32_0 : i32, i32
  }
  func.func @transform_9(%arg0: i32) -> (i32, i32) {
    %c0_i32 = arith.constant 0 : i32
    %c0_i32_0 = arith.constant 0 : i32
    return %c0_i32, %arg0 : i32, i32
  }
}

</mosaic_0001>

<bundles_post_ra>
// kernel: transformer_discriminator.1
= control target key start
LH: loop header
LB: loop body
LE: loop exit
PB: predicated region body
PF: predicated region fallthrough
CT: control target
= control target key end

     0   :  { %v57_v0 = vlaneseq  ;;  %v14258_v4 = vmov 1983009808   ;;  %vm86_vm0 = vcmask 130048   ;;  %vm191_vm1 = vcmask 261120   ;;  %s14260_s20 = smov 80   ;;  %s14264_s21 = smov 120   ;;  %s16707_s1 = inlined_call_operand.vmem [shape: f32[16,32], index: 1, kind: input, shape index: {}]   ;;  %s16708_s0 = inlined_call_operand.vmem [shape: f32[8,2,16], index: 0, kind: input, shape index: {}]   ;;  %s16709_s3 = inlined_call_operand.vmem [shape: f32[2,32,96], index: 3, kind: input, shape index: {}]   ;;  %s16710_s2 = inlined_call_operand.vmem [shape: f32[16,32], index: 2, kind: input, shape index: {}]   ;;  %s16711_s7 = inlined_call_operand.vmem [shape: f32[2,8,128], index: 7, kind: input, shape index: {}]   ;;  %s16712_s4 = inlined_call_operand.vmem [shape: f32[2,32,32], index: 4, kind: input, shape index: {}]   ;;  %s16713_s5 = inlined_call_operand.vmem [shape: f32[2,32,64], index: 5, kind: input, shape index: {}]   ;;  %s16714_s6 = inlined_call_operand.vmem [shape: f32[2,64,32], index: 6, kind: input, shape index: {}]   ;;  %s16715_s8 = inlined_call_operand.vmem [shape: f32[2,128], index: 8, kind: input, shape index: {}]   ;;  %s16716_s9 = inlined_call_operand.vmem [shape: f32[1,16], index: 9, kind: output, shape index: {}]  }
   0x1   :  { %v41_v1 = vld [vmem:[%s16707_s1 + $0x8] sm:$0xff]  ;;  %v40_v2 = vld [vmem:[%s16707_s1] sm:$0xff]  ;;  %v55_v5 = vunpack.c.l.s4 %v14258_v4  ;;  %v169_v15 = vld [vmem:[%s16709_s3 + $0x18] sm:$0xff]  ;;  %vm317_vm2 = vcmask 189440   ;;  %s14261_s1 = smov 56   ;;  %v16718_v61 = vmov 0.0  }
   0x2   :  { %v32_v3 = vld [vmem:[%s16708_s0] sm:$0x3]  ;;  %13208 = vmatprep.subr.mxu0 %v41_v1  ;;  %v33_v6 = vld [vmem:[%s16708_s0 + $0x2] sm:$0x3]  ;;  %v34_v7 = vld [vmem:[%s16708_s0 + $0x4] sm:$0x3]  ;;  %13215 = vmatprep.subr.mxu1 %v169_v15 }
   0x3   :  { %v35_v8 = vld [vmem:[%s16708_s0 + $0x6] sm:$0x3]  ;;  %13209 = vmatpush3.msra.mxu0 %v41_v1  ;;  %v52_v9 = vcombine.low %v32_v3, %v33_v6  ;;  %v56_v11 = vunpack.c.0.s8 %v55_v5  ;;  %v14338_v12 = vshrl.u32 %v57_v0, 7  ;;  %v36_v13 = vld [vmem:[%s16708_s0 + $0x8] sm:$0x3]  ;;  %13216 = vmatpush3.msra.mxu1 %v169_v15  ;;  %v168_v27 = vld [vmem:[%s16709_s3 + $0x10] sm:$0xff] }
   0x4   :  { %v53_v10 = vcombine.low %v34_v7, %v35_v8  ;;  %v37_v14 = vld [vmem:[%s16708_s0 + $0xa] sm:$0x3]  ;;  %13210 = vmatprep.subr.mxu0 %v40_v2  ;;  %v38_v16 = vld [vmem:[%s16708_s0 + $0xc] sm:$0x3]  ;;  %v39_v17 = vld [vmem:[%s16708_s0 + $0xe] sm:$0x3]  ;;  %13217 = vmatprep.subr.mxu1 %v168_v27 }
   0x5   :  { %16737 = vst [vmem:[#allocation4_spill] sm:$0xff] %v14338_v12  ;;  %v69_v18 = vcombine.low %v36_v13, %v37_v14  ;;  %13211 = vmatpush3.msra.mxu0 %v40_v2  ;;  %v14356_v19 = vsub.s32 %v56_v11, %v14338_v12  ;;  %v70_v20 = vcombine.low %v38_v16, %v39_v17  ;;  %v167_v28 = vld [vmem:[%s16709_s3 + $0x8] sm:$0xff]  ;;  %v166_v29 = vld [vmem:[%s16709_s3] sm:$0xff]  ;;  %v16717_v36 = vsub.s32 0, %v14338_v12  ;;  %s14265_s22 = smov 112   ;;  %s14266_s23 = smov 8  }
   0x6   :  { %13218 = vmatpush3.msra.mxu1 %v168_v27  ;;  %v42_v31 = vld [vmem:[%s16710_s2] sm:$0xff]  ;;  %v43_v32 = vld [vmem:[%s16710_s2 + $0x8] sm:$0xff]  ;;  %s14259_s2 = smov 104   ;;  %13226 = vmatprep.subr.mxu0 %v16718_v61  ;;  %vm14263_vm3 = vmmov 0   ;;  %vm516_vm4 = vcmask 64512   ;;  %vm3337_vm5 = vcmask 1041408  }
   0x7   :  { %16738 = vst [vmem:[#allocation5_spill] sm:$0xff] %v14356_v19  ;;  %v60_v21 = vrot.slane %v52_v9, %v14356_v19  ;;  %v67_v22 = vrot.slane %v53_v10, %v14356_v19  ;;  %v77_v23 = vrot.slane %v69_v18, %v14356_v19  ;;  %v84_v24 = vrot.slane %v70_v20, %v14356_v19  ;;  %v186_v37 = vld [vmem:[%s16711_s7] sm:$0xff]  ;;  %s14267_s24 = smov 16   ;;  %s14268_s25 = smov 24  }
   0x8   :  { %13219 = vmatprep.subr.mxu1 %v167_v28  ;;  %v190_v38 = vrot.slane %v186_v37, %v16717_v36  ;;  %vm2978_vm6 = vcmask 9216   ;;  %vm3333_vm7 = vcmask 15360   ;;  %vm5891_vm8 = vcmask 130112  }
   0x9   :  { %v68_v25 = vcombine.low %v60_v21, %v67_v22  ;;  %v85_v26 = vcombine.low %v77_v23, %v84_v24  ;;  %13220 = vmatpush3.msra.mxu1 %v167_v28  ;;  %vm5942_vm9 = vcmask 195712   ;;  %vm5993_vm10 = vcmask 261312  }
   0xa   :  { %13221 = vmatprep.subr.mxu1 %v166_v29  ;;  %vm6215_vm11 = vcmask 523264   ;;  %vm12585_vm12 = vcmask 122880  }
   0xb   :  { %13212 = vmatprep.mubr.msk.f32.mxu0 %vm86_vm0, %v68_v25  ;;  %13222 = vmatpush3.msra.mxu1 %v166_v29 }
   0xc   :  { %13213 = vmatmul.mubr.msk.f32.vlgmr.msra.gmra.mxu0 %vm86_vm0, %v85_v26  ;;  %13236 = vmatprep.subr.mxu1 %v16718_v61 }
   0xd   :  { %13228 = vmatprep.mubr.msk.f32.mxu0 %vm14263_vm3, %v16718_v61 }
  0xcc   :  { %v13214_v30 = vpop.f32.mrf.mxu0 }
  0xcd   :  { %v14379_v35 = vadd.f32 %v13214_v30, %v43_v32 }
  0xce   :  { %v157_v33 = vpop.f32.mrf.mxu0 }
  0xcf   :  { %v14377_v34 = vadd.f32 %v157_v33, %v42_v31  ;;  %16740 = vst [vmem:[#allocation7_spill] sm:$0xff] %v14379_v35 }
  0xd1   :  { %16739 = vst [vmem:[#allocation6_spill] sm:$0xff] %v14377_v34  ;;  %13223 = vmatprep.mubr.msk.f32.mxu1 %vm191_vm1, %v14377_v34 }
  0xd2   :  { %13224 = vmatmul.mubr.msk.f32.vlgmr.msra.gmra.mxu1 %vm191_vm1, %v14379_v35 }
  0xd3   :  { %13238 = vmatprep.mubr.msk.f32.mxu1 %vm14263_vm3, %v16718_v61 }
 0x192   :  { %v13225_v39 = vpop.f32.mrf.mxu1 }
 0x193   :  { %v270_v40 = vadd.f32 %v13225_v39, %v190_v38 }
 0x194   :  { %v264_v41 = vpop.f32.mrf.mxu1 }
 0x195   :  { %v292_v42 = vcombine.high %v270_v40, %v270_v40  ;;  %v299_v43 = vrot.slane %v270_v40, %v14356_v19  ;;  %v265_v44 = vadd.f32 %v264_v41, %v190_v38 }
 0x197   :  { %v306_v45 = vrot.slane %v292_v42, %v14356_v19  ;;  %322 = vst.msk [vmem:[#allocation2 + $0x8] sm:$0x3] %vm317_vm2, %v299_v43  ;;  %v275_v46 = vcombine.high %v265_v44, %v265_v44  ;;  %v282_v47 = vrot.slane %v265_v44, %v14356_v19  ;;  %v307_v48 = vcombine.high %v299_v43, %v299_v43 }
 0x198   :  { %v360_v57 = vrot.slane %v299_v43, %v14356_v19 }
 0x199   :  { %324 = vst.msk [vmem:[#allocation2 + $0xc] sm:$0x3] %vm317_vm2, %v306_v45  ;;  %v289_v49 = vrot.slane %v275_v46, %v14356_v19  ;;  %318 = vst.msk [vmem:[#allocation2] sm:$0x3] %vm317_vm2, %v282_v47  ;;  %v332_v50 = vrot.slane %v282_v47, %v14356_v19  ;;  %v290_v51 = vcombine.high %v282_v47, %v282_v47 }
 0x19a   :  { %323 = vst.msk [vmem:[#allocation2 + $0xa] sm:$0x3] %vm317_vm2, %v307_v48  ;;  %v308_v52 = vcombine.high %v306_v45, %v306_v45  ;;  %v367_v58 = vrot.slane %v307_v48, %v14356_v19  ;;  %v374_v59 = vrot.slane %v306_v45, %v14356_v19 }
 0x19b   :  { %320 = vst.msk [vmem:[#allocation2 + $0x4] sm:$0x3] %vm317_vm2, %v289_v49  ;;  %382 = vrot.lane.b32.xlu0 %v332_v50, %s14259_s2  ;;  %v346_v53 = vrot.slane %v289_v49, %v14356_v19  ;;  %319 = vst.msk [vmem:[#allocation2 + $0x2] sm:$0x3] %vm317_vm2, %v290_v51  ;;  %v291_v54 = vcombine.high %v289_v49, %v289_v49  ;;  %v339_v55 = vrot.slane %v290_v51, %v14356_v19 }
 0x19c   :  { %325 = vst.msk [vmem:[#allocation2 + $0xe] sm:$0x3] %vm317_vm2, %v308_v52  ;;  %v381_v60 = vrot.slane %v308_v52, %v14356_v19 }
 0x19d   :  { %386 = vrot.lane.b32.xlu1 %v346_v53, %s14259_s2  ;;  %321 = vst.msk [vmem:[#allocation2 + $0x6] sm:$0x3] %vm317_vm2, %v291_v54  ;;  %v353_v56 = vrot.slane %v291_v54, %v14356_v19 }
 0x19e   :  { %v14457_v2 = vld [vmem:[#allocation2 + $0x8] sm:$0x3] }
 0x19f   :  { %384 = vrot.lane.b32.xlu0 %v339_v55, %s14259_s2 }
 0x1a0   :  { %v14441_v62 = vld [vmem:[#allocation2] sm:$0x3]  ;;  %v14465_v4 = vld [vmem:[#allocation2 + $0xc] sm:$0x3] }
 0x1a1   :  { %388 = vrot.lane.b32.xlu1 %v353_v56, %s14259_s2  ;;  %v14461_v3 = vld [vmem:[#allocation2 + $0xa] sm:$0x3] }
 0x1a2   :  { %v14445_v63 = vld [vmem:[#allocation2 + $0x2] sm:$0x3]  ;;  %v14449_v0 = vld [vmem:[#allocation2 + $0x4] sm:$0x3] }
 0x1a3   :  { %390 = vrot.lane.b32.xlu0 %v360_v57, %s14259_s2  ;;  %v14469_v5 = vld [vmem:[#allocation2 + $0xe] sm:$0x3] }
 0x1a4   :  { %v14453_v1 = vld [vmem:[#allocation2 + $0x6] sm:$0x3] }
 0x1a5   :  { %392 = vrot.lane.b32.xlu1 %v367_v58, %s14259_s2 }
 0x1a7   :  { %394 = vrot.lane.b32.xlu0 %v374_v59, %s14259_s2 }
 0x1a9   :  { %396 = vrot.lane.b32.xlu1 %v381_v60, %s14259_s2 }
 0x1ab   :  { %415 = vrot.lane.b32.xlu0 %v332_v50, %s14260_s20 }
 0x1ad   :  { %417 = vrot.lane.b32.xlu1 %v339_v55, %s14260_s20 }
 0x1af   :  { %419 = vrot.lane.b32.xlu0 %v346_v53, %s14260_s20 }
 0x1b1   :  { %421 = vrot.lane.b32.xlu1 %v353_v56, %s14260_s20 }
 0x1b3   :  { %423 = vrot.lane.b32.xlu0 %v360_v57, %s14260_s20 }
 0x1b5   :  { %425 = vrot.lane.b32.xlu1 %v367_v58, %s14260_s20 }
 0x1b7   :  { %427 = vrot.lane.b32.xlu0 %v374_v59, %s14260_s20 }
 0x1b9   :  { %429 = vrot.lane.b32.xlu1 %v381_v60, %s14260_s20 }
 0x1bb   :  { %448 = vrot.lane.b32.xlu0 %v332_v50, %s14261_s1 }
 0x1bd   :  { %450 = vrot.lane.b32.xlu1 %v339_v55, %s14261_s1 }
 0x1bf   :  { %452 = vrot.lane.b32.xlu0 %v346_v53, %s14261_s1 }
 0x1c1   :  { %454 = vrot.lane.b32.xlu1 %v353_v56, %s14261_s1 }
 0x1c3   :  { %456 = vrot.lane.b32.xlu0 %v360_v57, %s14261_s1 }
 0x1c5   :  { %458 = vrot.lane.b32.xlu1 %v367_v58, %s14261_s1 }
 0x1c7   :  { %460 = vrot.lane.b32.xlu0 %v374_v59, %s14261_s1 }
 0x1c9   :  { %462 = vrot.lane.b32.xlu1 %v381_v60, %s14261_s1 }
 0x1cb   :  { %514 = vrot.lane.b32.xlu0 %v14441_v62, %s14264_s21 }
 0x1cd   :  { %592 = vrot.lane.b32.xlu1 %v14445_v63, %s14264_s21 }
 0x1cf   :  { %669 = vrot.lane.b32.xlu0 %v14449_v0, %s14264_s21 }
 0x1d1   :  { %746 = vrot.lane.b32.xlu1 %v14453_v1, %s14264_s21 }
 0x1d3   :  { %823 = vrot.lane.b32.xlu0 %v14457_v2, %s14264_s21 }
 0x1d5   :  { %900 = vrot.lane.b32.xlu1 %v14461_v3, %s14264_s21 }
 0x1d7   :  { %977 = vrot.lane.b32.xlu0 %v14465_v4, %s14264_s21 }
 0x1d9   :  { %1054 = vrot.lane.b32.xlu1 %v14469_v5, %s14264_s21 }
 0x20d   :  { %v383_v6 = vpop.permute.xlu0 %382 }
 0x20e   :  { %407 = vst.msk [vmem:[#allocation2 + $0x10] sm:$0x3] %vm317_vm2, %v383_v6 }
 0x20f   :  { %v387_v7 = vpop.permute.xlu1 %386 }
 0x210   :  { %409 = vst.msk [vmem:[#allocation2 + $0x14] sm:$0x3] %vm317_vm2, %v387_v7 }
 0x211   :  { %v385_v8 = vpop.permute.xlu0 %384 }
 0x212   :  { %408 = vst.msk [vmem:[#allocation2 + $0x12] sm:$0x3] %vm317_vm2, %v385_v8 }
 0x213   :  { %v389_v9 = vpop.permute.xlu1 %388 }
 0x214   :  { %410 = vst.msk [vmem:[#allocation2 + $0x16] sm:$0x3] %vm317_vm2, %v389_v9 }
 0x215   :  { %v391_v10 = vpop.permute.xlu0 %390  ;;  %v14477_v11 = vld [vmem:[#allocation2 + $0x10] sm:$0x3] }
 0x216   :  { %411 = vst.msk [vmem:[#allocation2 + $0x18] sm:$0x3] %vm317_vm2, %v391_v10  ;;  %1131 = vrot.lane.b32.xlu0 %v14477_v11, %s14264_s21 }
 0x217   :  { %v393_v13 = vpop.permute.xlu1 %392  ;;  %v14483_v15 = vld [vmem:[#allocation2 + $0x14] sm:$0x3] }
 0x218   :  { %412 = vst.msk [vmem:[#allocation2 + $0x1a] sm:$0x3] %vm317_vm2, %v393_v13 }
 0x219   :  { %v395_v14 = vpop.permute.xlu0 %394  ;;  %v14485_v16 = vld [vmem:[#allocation2 + $0x12] sm:$0x3] }
 0x21a   :  { %413 = vst.msk [vmem:[#allocation2 + $0x1c] sm:$0x3] %vm317_vm2, %v395_v14  ;;  %1285 = vrot.lane.b32.xlu0 %v14483_v15, %s14264_s21  ;;  %1208 = vrot.lane.b32.xlu1 %v14485_v16, %s14264_s21 }
 0x21b   :  { %v397_v17 = vpop.permute.xlu1 %396  ;;  %v14495_v21 = vld [vmem:[#allocation2 + $0x16] sm:$0x3] }
 0x21c   :  { %414 = vst.msk [vmem:[#allocation2 + $0x1e] sm:$0x3] %vm317_vm2, %v397_v17 }
 0x21d   :  { %v416_v18 = vpop.permute.xlu0 %415  ;;  %v14493_v20 = vld [vmem:[#allocation2 + $0x18] sm:$0x3] }
 0x21e   :  { %440 = vst.msk [vmem:[#allocation2 + $0x20] sm:$0x3] %vm317_vm2, %v416_v18  ;;  %1439 = vrot.lane.b32.xlu0 %v14493_v20, %s14264_s21  ;;  %1362 = vrot.lane.b32.xlu1 %v14495_v21, %s14264_s21 }
 0x21f   :  { %v418_v22 = vpop.permute.xlu1 %417  ;;  %v14505_v25 = vld [vmem:[#allocation2 + $0x1a] sm:$0x3] }
 0x220   :  { %441 = vst.msk [vmem:[#allocation2 + $0x22] sm:$0x3] %vm317_vm2, %v418_v22 }
 0x221   :  { %v420_v23 = vpop.permute.xlu0 %419  ;;  %v14503_v24 = vld [vmem:[#allocation2 + $0x1c] sm:$0x3] }
 0x222   :  { %442 = vst.msk [vmem:[#allocation2 + $0x24] sm:$0x3] %vm317_vm2, %v420_v23  ;;  %1593 = vrot.lane.b32.xlu0 %v14503_v24, %s14264_s21  ;;  %1516 = vrot.lane.b32.xlu1 %v14505_v25, %s14264_s21 }
 0x223   :  { %v422_v26 = vpop.permute.xlu1 %421  ;;  %v14515_v29 = vld [vmem:[#allocation2 + $0x1e] sm:$0x3] }
 0x224   :  { %443 = vst.msk [vmem:[#allocation2 + $0x26] sm:$0x3] %vm317_vm2, %v422_v26 }
 0x225   :  { %v424_v27 = vpop.permute.xlu0 %423  ;;  %v14513_v28 = vld [vmem:[#allocation2 + $0x20] sm:$0x3] }
 0x226   :  { %444 = vst.msk [vmem:[#allocation2 + $0x28] sm:$0x3] %vm317_vm2, %v424_v27  ;;  %1747 = vrot.lane.b32.xlu0 %v14513_v28, %s14264_s21  ;;  %1670 = vrot.lane.b32.xlu1 %v14515_v29, %s14264_s21 }
 0x227   :  { %v426_v30 = vpop.permute.xlu1 %425  ;;  %v14525_v33 = vld [vmem:[#allocation2 + $0x22] sm:$0x3] }
 0x228   :  { %445 = vst.msk [vmem:[#allocation2 + $0x2a] sm:$0x3] %vm317_vm2, %v426_v30 }
 0x229   :  { %v428_v31 = vpop.permute.xlu0 %427  ;;  %v14523_v32 = vld [vmem:[#allocation2 + $0x24] sm:$0x3] }
 0x22a   :  { %446 = vst.msk [vmem:[#allocation2 + $0x2c] sm:$0x3] %vm317_vm2, %v428_v31  ;;  %1901 = vrot.lane.b32.xlu0 %v14523_v32, %s14264_s21  ;;  %1824 = vrot.lane.b32.xlu1 %v14525_v33, %s14264_s21 }
 0x22b   :  { %v430_v37 = vpop.permute.xlu1 %429  ;;  %v14535_v40 = vld [vmem:[#allocation2 + $0x26] sm:$0x3] }
 0x22c   :  { %447 = vst.msk [vmem:[#allocation2 + $0x2e] sm:$0x3] %vm317_vm2, %v430_v37 }
 0x22d   :  { %v449_v38 = vpop.permute.xlu0 %448  ;;  %v14533_v39 = vld [vmem:[#allocation2 + $0x28] sm:$0x3] }
 0x22e   :  { %473 = vst.msk [vmem:[#allocation2 + $0x30] sm:$0x3] %vm317_vm2, %v449_v38  ;;  %2055 = vrot.lane.b32.xlu0 %v14533_v39, %s14264_s21  ;;  %1978 = vrot.lane.b32.xlu1 %v14535_v40, %s14264_s21 }
 0x22f   :  { %v451_v41 = vpop.permute.xlu1 %450  ;;  %v14545_v44 = vld [vmem:[#allocation2 + $0x2a] sm:$0x3] }
 0x230   :  { %474 = vst.msk [vmem:[#allocation2 + $0x32] sm:$0x3] %vm317_vm2, %v451_v41 }
 0x231   :  { %v453_v42 = vpop.permute.xlu0 %452  ;;  %v14543_v43 = vld [vmem:[#allocation2 + $0x2c] sm:$0x3] }
 0x232   :  { %475 = vst.msk [vmem:[#allocation2 + $0x34] sm:$0x3] %vm317_vm2, %v453_v42  ;;  %2209 = vrot.lane.b32.xlu0 %v14543_v43, %s14264_s21  ;;  %2132 = vrot.lane.b32.xlu1 %v14545_v44, %s14264_s21 }
 0x233   :  { %v455_v45 = vpop.permute.xlu1 %454  ;;  %v14555_v48 = vld [vmem:[#allocation2 + $0x2e] sm:$0x3] }
 0x234   :  { %476 = vst.msk [vmem:[#allocation2 + $0x36] sm:$0x3] %vm317_vm2, %v455_v45 }
 0x235   :  { %v457_v46 = vpop.permute.xlu0 %456  ;;  %v14553_v47 = vld [vmem:[#allocation2 + $0x30] sm:$0x3] }
 0x236   :  { %477 = vst.msk [vmem:[#allocation2 + $0x38] sm:$0x3] %vm317_vm2, %v457_v46  ;;  %2363 = vrot.lane.b32.xlu0 %v14553_v47, %s14264_s21  ;;  %2286 = vrot.lane.b32.xlu1 %v14555_v48, %s14264_s21 }
 0x237   :  { %v459_v49 = vpop.permute.xlu1 %458  ;;  %v14565_v52 = vld [vmem:[#allocation2 + $0x32] sm:$0x3] }
 0x238   :  { %478 = vst.msk [vmem:[#allocation2 + $0x3a] sm:$0x3] %vm317_vm2, %v459_v49 }
 0x239   :  { %v461_v50 = vpop.permute.xlu0 %460  ;;  %v14563_v51 = vld [vmem:[#allocation2 + $0x34] sm:$0x3] }
 0x23a   :  { %479 = vst.msk [vmem:[#allocation2 + $0x3c] sm:$0x3] %vm317_vm2, %v461_v50  ;;  %2517 = vrot.lane.b32.xlu0 %v14563_v51, %s14264_s21  ;;  %2440 = vrot.lane.b32.xlu1 %v14565_v52, %s14264_s21 }
 0x23b   :  { %v463_v53 = vpop.permute.xlu1 %462  ;;  %v14578_v56 = vld [vmem:[#allocation2 + $0x36] sm:$0x3] }
 0x23c   :  { %480 = vst.msk [vmem:[#allocation2 + $0x3e] sm:$0x3] %vm317_vm2, %v463_v53 }
 0x23d   :  { %v515_v54 = vpop.permute.xlu0 %514  ;;  %v14573_v55 = vld [vmem:[#allocation2 + $0x38] sm:$0x3] }
 0x23e   :  { %13227 = vmatpush3.xpose.msk.msra.mxu0 %vm516_vm4, %v515_v54  ;;  %2671 = vrot.lane.b32.xlu0 %v14573_v55, %s14264_s21 }
 0x23f   :  { %2594 = vrot.lane.b32.xlu1 %v14578_v56, %s14264_s21  ;;  %v593_v57 = vpop.permute.xlu1 %592  ;;  %13231 = vmatprep.subr.mxu0 %v16718_v61  ;;  %v14590_v60 = vld [vmem:[#allocation2 + $0x3a] sm:$0x3] }
 0x241   :  { %13229 = vmatmul.mubr.msk.f32.vlgmr.msra.gmra.mxu0 %vm516_vm4, %v14441_v62  ;;  %v670_v58 = vpop.permute.xlu0 %669  ;;  %v14585_v59 = vld [vmem:[#allocation2 + $0x3c] sm:$0x3] }
 0x242   :  { %2825 = vrot.lane.b32.xlu0 %v14585_v59, %s14264_s21  ;;  %13232 = vmatpush3.xpose.msk.msra.mxu0 %vm516_vm4, %v593_v57 }
 0x243   :  { %13237 = vmatpush3.xpose.msk.msra.mxu1 %vm516_vm4, %v670_v58  ;;  %2748 = vrot.lane.b32.xlu1 %v14590_v60, %s14264_s21  ;;  %v747_v6 = vpop.permute.xlu1 %746  ;;  %v14605_v8 = vld [vmem:[#allocation2 + $0x3e] sm:$0x3] }
 0x244   :  { %13233 = vmatprep.mubr.msk.f32.mxu0 %vm14263_vm3, %v16718_v61  ;;  %13246 = vmatprep.subr.mxu1 %v16718_v61 }
 0x245   :  { %v824_v7 = vpop.permute.xlu0 %823  ;;  %13234 = vmatmul.mubr.msk.f32.vlgmr.msra.gmra.mxu0 %vm516_vm4, %v14445_v63  ;;  %13241 = vmatprep.subr.mxu0 %v16718_v61 }
 0x246   :  { %13239 = vmatmul.mubr.msk.f32.vlgmr.msra.gmra.mxu1 %vm516_vm4, %v14449_v0  ;;  %3410 = vrot.lane.b32.xlu0 %v14445_v63, %s14265_s22 }
 0x247   :  { %13247 = vmatpush3.xpose.msk.msra.mxu1 %vm516_vm4, %v824_v7  ;;  %2902 = vrot.lane.b32.xlu1 %v14605_v8, %s14264_s21  ;;  %v901_v10 = vpop.permute.xlu1 %900 }
 0x248   :  { %13242 = vmatpush3.xpose.msk.msra.mxu0 %vm516_vm4, %v747_v6  ;;  %13243 = vmatprep.mubr.msk.f32.mxu0 %vm14263_vm3, %v16718_v61 }
 0x249   :  { %13248 = vmatprep.mubr.msk.f32.mxu1 %vm14263_vm3, %v16718_v61  ;;  %13256 = vmatprep.subr.mxu1 %v16718_v61  ;;  %v978_v9 = vpop.permute.xlu0 %977 }
 0x24a   :  { %13249 = vmatmul.mubr.msk.f32.vlgmr.msra.gmra.mxu1 %vm516_vm4, %v14457_v2  ;;  %13251 = vmatprep.subr.mxu0 %v16718_v61 }
 0x24b   :  { %13244 = vmatmul.mubr.msk.f32.vlgmr.msra.gmra.mxu0 %vm516_vm4, %v14453_v1  ;;  %13257 = vmatpush3.xpose.msk.msra.mxu1 %vm516_vm4, %v978_v9  ;;  %v1055_v63 = vpop.permute.xlu1 %1054 }
 0x24c   :  { %3564 = vrot.lane.b32.xlu0 %v14453_v1, %s14265_s22  ;;  %3331 = vrot.lane.b32.xlu1 %v14441_v62, %s14265_s22 }
 0x24d   :  { %13252 = vmatpush3.xpose.msk.msra.mxu0 %vm516_vm4, %v901_v10  ;;  %13253 = vmatprep.mubr.msk.f32.mxu0 %vm14263_vm3, %v16718_v61 }
 0x24e   :  { %13258 = vmatprep.mubr.msk.f32.mxu1 %vm14263_vm3, %v16718_v61  ;;  %13261 = vmatprep.subr.mxu0 %v16718_v61 }
 0x24f   :  { %13259 = vmatmul.mubr.msk.f32.vlgmr.msra.gmra.mxu1 %vm516_vm4, %v14465_v4  ;;  %13266 = vmatprep.subr.mxu1 %v16718_v61 }
 0x250   :  { %13254 = vmatmul.mubr.msk.f32.vlgmr.msra.gmra.mxu0 %vm516_vm4, %v14461_v3  ;;  %3718 = vrot.lane.b32.xlu0 %v14461_v3, %s14265_s22 }
 0x251   :  { %3487 = vrot.lane.b32.xlu1 %v14449_v0, %s14265_s22  ;;  %13262 = vmatpush3.xpose.msk.msra.mxu0 %vm516_vm4, %v1055_v63 }
 0x252   :  { %13263 = vmatprep.mubr.msk.f32.mxu0 %vm14263_vm3, %v16718_v61  ;;  %13268 = vmatprep.mubr.msk.f32.mxu1 %vm14263_vm3, %v16718_v61 }
 0x253   :  { %13271 = vmatprep.subr.mxu0 %v16718_v61 }
 0x254   :  { %13264 = vmatmul.mubr.msk.f32.vlgmr.msra.gmra.mxu0 %vm516_vm4, %v14469_v5  ;;  %3872 = vrot.lane.b32.xlu0 %v14469_v5, %s14265_s22 }
 0x255   :  { %3641 = vrot.lane.b32.xlu1 %v14457_v2, %s14265_s22  ;;  %13273 = vmatprep.mubr.msk.f32.mxu0 %vm14263_vm3, %v16718_v61 }
 0x258   :  { %4026 = vrot.lane.b32.xlu0 %v14485_v16, %s14265_s22 }
 0x259   :  { %3795 = vrot.lane.b32.xlu1 %v14465_v4, %s14265_s22 }
 0x25c   :  { %4334 = vrot.lane.b32.xlu0 %v14505_v25, %s14265_s22 }
 0x25d   :  { %3949 = vrot.lane.b32.xlu1 %v14477_v11, %s14265_s22 }
 0x260   :  { %4488 = vrot.lane.b32.xlu0 %v14515_v29, %s14265_s22 }
 0x261   :  { %4103 = vrot.lane.b32.xlu1 %v14483_v15, %s14265_s22 }
 0x264   :  { %4642 = vrot.lane.b32.xlu0 %v14525_v33, %s14265_s22 }
 0x265   :  { %4257 = vrot.lane.b32.xlu1 %v14493_v20, %s14265_s22 }
 0x268   :  { %5027 = vrot.lane.b32.xlu0 %v14543_v43, %s14265_s22 }
 0x269   :  { %4411 = vrot.lane.b32.xlu1 %v14503_v24, %s14265_s22 }
 0x26c   :  { %5181 = vrot.lane.b32.xlu0 %v14553_v47, %s14265_s22 }
 0x26d   :  { %4565 = vrot.lane.b32.xlu1 %v14513_v28, %s14265_s22 }
 0x270   :  { %5335 = vrot.lane.b32.xlu0 %v14563_v51, %s14265_s22 }
 0x271   :  { %4719 = vrot.lane.b32.xlu1 %v14523_v32, %s14265_s22 }
 0x274   :  { %4180 = vrot.lane.b32.xlu0 %v14495_v21, %s14265_s22 }
 0x275   :  { %4873 = vrot.lane.b32.xlu1 %v14533_v39, %s14265_s22 }
 0x278   :  { %4796 = vrot.lane.b32.xlu0 %v14535_v40, %s14265_s22 }
 0x279   :  { %4950 = vrot.lane.b32.xlu1 %v14545_v44, %s14265_s22 }
 0x27d   :  { %5104 = vrot.lane.b32.xlu1 %v14555_v48, %s14265_s22 }
 0x281   :  { %5258 = vrot.lane.b32.xlu1 %v14565_v52, %s14265_s22 }
 0x285   :  { %5412 = vrot.lane.b32.xlu1 %v14578_v56, %s14265_s22 }
 0x288   :  { %v1132_v62 = vpop.permute.xlu0 %1131 }
 0x289   :  { %13267 = vmatpush3.xpose.msk.msra.mxu1 %vm516_vm4, %v1132_v62 }
 0x28a   :  { %13276 = vmatprep.subr.mxu1 %v16718_v61 }
 0x28c   :  { %13269 = vmatmul.mubr.msk.f32.vlgmr.msra.gmra.mxu1 %vm516_vm4, %v14477_v11  ;;  %v1286_v0 = vpop.permute.xlu0 %1285  ;;  %v1209_v1 = vpop.permute.xlu1 %1208 }
 0x28d   :  { %13272 = vmatpush3.xpose.msk.msra.mxu0 %vm516_vm4, %v1209_v1  ;;  %13277 = vmatpush3.xpose.msk.msra.mxu1 %vm516_vm4, %v1286_v0 }
 0x28e   :  { %13278 = vmatprep.mubr.msk.f32.mxu1 %vm14263_vm3, %v16718_v61  ;;  %13286 = vmatprep.subr.mxu1 %v16718_v61 }
 0x28f   :  { %13281 = vmatprep.subr.mxu0 %v16718_v61 }
 0x290   :  { %13279 = vmatmul.mubr.msk.f32.vlgmr.msra.gmra.mxu1 %vm516_vm4, %v14483_v15  ;;  %v1440_v2 = vpop.permute.xlu0 %1439  ;;  %13274 = vmatmul.mubr.msk.f32.vlgmr.msra.gmra.mxu0 %vm516_vm4, %v14485_v16  ;;  %v1363_v3 = vpop.permute.xlu1 %1362 }
 0x291   :  { %13282 = vmatpush3.xpose.msk.msra.mxu0 %vm516_vm4, %v1363_v3  ;;  %13287 = vmatpush3.xpose.msk.msra.mxu1 %vm516_vm4, %v1440_v2 }
 0x292   :  { %13283 = vmatprep.mubr.msk.f32.mxu0 %vm14263_vm3, %v16718_v61  ;;  %13288 = vmatprep.mubr.msk.f32.mxu1 %vm14263_vm3, %v16718_v61 }
 0x293   :  { %13296 = vmatprep.subr.mxu1 %v16718_v61  ;;  %13291 = vmatprep.subr.mxu0 %v16718_v61 }
 0x294   :  { %13289 = vmatmul.mubr.msk.f32.vlgmr.msra.gmra.mxu1 %vm516_vm4, %v14493_v20  ;;  %v1594_v4 = vpop.permute.xlu0 %1593  ;;  %13284 = vmatmul.mubr.msk.f32.vlgmr.msra.gmra.mxu0 %vm516_vm4, %v14495_v21  ;;  %v1517_v5 = vpop.permute.xlu1 %1516 }
 0x295   :  { %13292 = vmatpush3.xpose.msk.msra.mxu0 %vm516_vm4, %v1517_v5  ;;  %13297 = vmatpush3.xpose.msk.msra.mxu1 %vm516_vm4, %v1594_v4 }
 0x296   :  { %13293 = vmatprep.mubr.msk.f32.mxu0 %vm14263_vm3, %v16718_v61  ;;  %13298 = vmatprep.mubr.msk.f32.mxu1 %vm14263_vm3, %v16718_v61 }
 0x297   :  { %13306 = vmatprep.subr.mxu1 %v16718_v61  ;;  %13301 = vmatprep.subr.mxu0 %v16718_v61 }
 0x298   :  { %13299 = vmatmul.mubr.msk.f32.vlgmr.msra.gmra.mxu1 %vm516_vm4, %v14503_v24  ;;  %v1748_v11 = vpop.permute.xlu0 %1747  ;;  %13294 = vmatmul.mubr.msk.f32.vlgmr.msra.gmra.mxu0 %vm516_vm4, %v14505_v25  ;;  %v1671_v13 = vpop.permute.xlu1 %1670 }
 0x299   :  { %13302 = vmatpush3.xpose.msk.msra.mxu0 %vm516_vm4, %v1671_v13  ;;  %13307 = vmatpush3.xpose.msk.msra.mxu1 %vm516_vm4, %v1748_v11 }
 0x29a   :  { %13303 = vmatprep.mubr.msk.f32.mxu0 %vm14263_vm3, %v16718_v61  ;;  %13308 = vmatprep.mubr.msk.f32.mxu1 %vm14263_vm3, %v16718_v61 }
 0x29b   :  { %13316 = vmatprep.subr.mxu1 %v16718_v61  ;;  %13311 = vmatprep.subr.mxu0 %v16718_v61 }
 0x29c   :  { %13309 = vmatmul.mubr.msk.f32.vlgmr.msra.gmra.mxu1 %vm516_vm4, %v14513_v28  ;;  %v1902_v14 = vpop.permute.xlu0 %1901  ;;  %13304 = vmatmul.mubr.msk.f32.vlgmr.msra.gmra.mxu0 %vm516_vm4, %v14515_v29  ;;  %v1825_v15 = vpop.permute.xlu1 %1824 }
 0x29d   :  { %13312 = vmatpush3.xpose.msk.msra.mxu0 %vm516_vm4, %v1825_v15  ;;  %13317 = vmatpush3.xpose.msk.msra.mxu1 %vm516_vm4, %v1902_v14 }
 0x29e   :  { %13313 = vmatprep.mubr.msk.f32.mxu0 %vm14263_vm3, %v16718_v61  ;;  %13318 = vmatprep.mubr.msk.f32.mxu1 %vm14263_vm3, %v16718_v61 }
 0x29f   :  { %13326 = vmatprep.subr.mxu1 %v16718_v61  ;;  %13321 = vmatprep.subr.mxu0 %v16718_v61 }
 0x2a0   :  { %13319 = vmatmul.mubr.msk.f32.vlgmr.msra.gmra.mxu1 %vm516_vm4, %v14523_v32  ;;  %v2056_v16 = vpop.permute.xlu0 %2055  ;;  %13314 = vmatmul.mubr.msk.f32.vlgmr.msra.gmra.mxu0 %vm516_vm4, %v14525_v33  ;;  %v1979_v17 = vpop.permute.xlu1 %1978 }
 0x2a1   :  { %13322 = vmatpush3.xpose.msk.msra.mxu0 %vm516_vm4, %v1979_v17  ;;  %13327 = vmatpush3.xpose.msk.msra.mxu1 %vm516_vm4, %v2056_v16 }
 0x2a2   :  { %13323 = vmatprep.mubr.msk.f32.mxu0 %vm14263_vm3, %v16718_v61  ;;  %13328 = vmatprep.mubr.msk.f32.mxu1 %vm14263_vm3, %v16718_v61 }
 0x2a3   :  { %13336 = vmatprep.subr.mxu1 %v16718_v61  ;;  %13331 = vmatprep.subr.mxu0 %v16718_v61 }
 0x2a4   :  { %13329 = vmatmul.mubr.msk.f32.vlgmr.msra.gmra.mxu1 %vm516_vm4, %v14533_v39  ;;  %v2210_v18 = vpop.permute.xlu0 %2209  ;;  %13324 = vmatmul.mubr.msk.f32.vlgmr.msra.gmra.mxu0 %vm516_vm4, %v14535_v40  ;;  %v2133_v20 = vpop.permute.xlu1 %2132 }
 0x2a5   :  { %13332 = vmatpush3.xpose.msk.msra.mxu0 %vm516_vm4, %v2133_v20  ;;  %13337 = vmatpush3.xpose.msk.msra.mxu1 %vm516_vm4, %v2210_v18 }
 0x2a6   :  { %13333 = vmatprep.mubr.msk.f32.mxu0 %vm14263_vm3, %v16718_v61  ;;  %13338 = vmatprep.mubr.msk.f32.mxu1 %vm14263_vm3, %v16718_v61 }
 0x2a7   :  { %13346 = vmatprep.subr.mxu1 %v16718_v61  ;;  %13341 = vmatprep.subr.mxu0 %v16718_v61 }
 0x2a8   :  { %13339 = vmatmul.mubr.msk.f32.vlgmr.msra.gmra.mxu1 %vm516_vm4, %v14543_v43  ;;  %v2364_v21 = vpop.permute.xlu0 %2363  ;;  %13334 = vmatmul.mubr.msk.f32.vlgmr.msra.gmra.mxu0 %vm516_vm4, %v14545_v44  ;;  %v2287_v22 = vpop.permute.xlu1 %2286 }
 0x2a9   :  { %13342 = vmatpush3.xpose.msk.msra.mxu0 %vm516_vm4, %v2287_v22  ;;  %13347 = vmatpush3.xpose.msk.msra.mxu1 %vm516_vm4, %v2364_v21 }
 0x2aa   :  { %13343 = vmatprep.mubr.msk.f32.mxu0 %vm14263_vm3, %v16718_v61  ;;  %13348 = vmatprep.mubr.msk.f32.mxu1 %vm14263_vm3, %v16718_v61 }
 0x2ab   :  { %13356 = vmatprep.subr.mxu1 %v16718_v61  ;;  %13351 = vmatprep.subr.mxu0 %v16718_v61 }
 0x2ac   :  { %13349 = vmatmul.mubr.msk.f32.vlgmr.msra.gmra.mxu1 %vm516_vm4, %v14553_v47  ;;  %v2518_v23 = vpop.permute.xlu0 %2517  ;;  %13344 = vmatmul.mubr.msk.f32.vlgmr.msra.gmra.mxu0 %vm516_vm4, %v14555_v48  ;;  %v2441_v24 = vpop.permute.xlu1 %2440 }
 0x2ad   :  { %13352 = vmatpush3.xpose.msk.msra.mxu0 %vm516_vm4, %v2441_v24  ;;  %13357 = vmatpush3.xpose.msk.msra.mxu1 %vm516_vm4, %v2518_v23 }
 0x2ae   :  { %13353 = vmatprep.mubr.msk.f32.mxu0 %vm14263_vm3, %v16718_v61  ;;  %13358 = vmatprep.mubr.msk.f32.mxu1 %vm14263_vm3, %v16718_v61 }
 0x2af   :  { %13366 = vmatprep.subr.mxu1 %v16718_v61  ;;  %13361 = vmatprep.subr.mxu0 %v16718_v61 }
 0x2b0   :  { %13359 = vmatmul.mubr.msk.f32.vlgmr.msra.gmra.mxu1 %vm516_vm4, %v14563_v51  ;;  %v2672_v25 = vpop.permute.xlu0 %2671  ;;  %13354 = vmatmul.mubr.msk.f32.vlgmr.msra.gmra.mxu0 %vm516_vm4, %v14565_v52 }
 0x2b1   :  { %v2595_v26 = vpop.permute.xlu1 %2594  ;;  %13367 = vmatpush3.xpose.msk.msra.mxu1 %vm516_vm4, %v2672_v25  ;;  %13363 = vmatprep.mubr.msk.f32.mxu0 %vm14263_vm3, %v16718_v61 }
 0x2b2   :  { %13362 = vmatpush3.xpose.msk.msra.mxu0 %vm516_vm4, %v2595_v26  ;;  %13368 = vmatprep.mubr.msk.f32.mxu1 %vm14263_vm3, %v16718_v61 }
 0x2b3   :  { %13376 = vmatprep.subr.mxu1 %v16718_v61  ;;  %13371 = vmatprep.subr.mxu0 %v16718_v61 }
 0x2b4   :  { %13369 = vmatmul.mubr.msk.f32.vlgmr.msra.gmra.mxu1 %vm516_vm4, %v14573_v55  ;;  %v2826_v27 = vpop.permute.xlu0 %2825 }
 0x2b5   :  { %13364 = vmatmul.mubr.msk.f32.vlgmr.msra.gmra.mxu0 %vm516_vm4, %v14578_v56  ;;  %v2749_v28 = vpop.permute.xlu1 %2748  ;;  %13377 = vmatpush3.xpose.msk.msra.mxu1 %vm516_vm4, %v2826_v27 }
 0x2b6   :  { %13372 = vmatpush3.xpose.msk.msra.mxu0 %vm516_vm4, %v2749_v28  ;;  %13373 = vmatprep.mubr.msk.f32.mxu0 %vm14263_vm3, %v16718_v61 }
 0x2b7   :  { %13378 = vmatprep.mubr.msk.f32.mxu1 %vm14263_vm3, %v16718_v61  ;;  %13381 = vmatprep.subr.mxu0 %v16718_v61 }
 0x2b8   :  { %13379 = vmatmul.mubr.msk.f32.vlgmr.msra.gmra.mxu1 %vm516_vm4, %v14585_v59  ;;  %13386 = vmatprep.subr.mxu1 %v16718_v61  ;;  %v3411_v30 = vpop.permute.xlu0 %3410 }
 0x2b9   :  { %13374 = vmatmul.mubr.msk.f32.vlgmr.msra.gmra.mxu0 %vm516_vm4, %v14590_v60  ;;  %v2903_v29 = vpop.permute.xlu1 %2902  ;;  %13388 = vmatprep.mubr.msk.f32.mxu1 %vm14263_vm3, %v16718_v61 }
 0x2ba   :  { %13382 = vmatpush3.xpose.msk.msra.mxu0 %vm516_vm4, %v2903_v29  ;;  %13383 = vmatprep.mubr.msk.f32.mxu0 %vm14263_vm3, %v16718_v61 }
 0x2bb   :  { %13391 = vmatprep.subr.mxu0 %v16718_v61 }
 0x2bd   :  { %13384 = vmatmul.mubr.msk.f32.vlgmr.msra.gmra.mxu0 %vm516_vm4, %v14605_v8 }
 0x2be   :  { %v3332_v31 = vpop.permute.xlu1 %3331  ;;  %13392 = vmatpush3.msk.msra.mxu0 %vm3337_vm5, %v3411_v30  ;;  %13393 = vmatprep.mubr.msk.f32.mxu0 %vm14263_vm3, %v16718_v61  ;;  %v14881_v8 = vpop.permute.xlu0 %3564 }
 0x2bf   :  { %13387 = vmatpush3.msk.msra.mxu1 %vm3337_vm5, %v3332_v31  ;;  %13401 = vmatprep.subr.mxu0 %v16718_v61 }
 0x2c0   :  { %13396 = vmatprep.subr.mxu1 %v16718_v61 }
 0x2c2   :  { %v14885_v10 = vpop.permute.xlu0 %3718 }
 0x2c3   :  { %v14877_v6 = vpop.permute.xlu1 %3487 }
 0x2c6   :  { %v14897_v4 = vpop.permute.xlu0 %3872 }
 0x2c7   :  { %v14879_v7 = vpop.permute.xlu1 %3641 }
 0x2ca   :  { %v14913_v23 = vpop.permute.xlu0 %4026 }
 0x2cb   :  { %v14883_v9 = vpop.permute.xlu1 %3795 }
 0x2cf   :  { %v14891_v1 = vpop.permute.xlu1 %3949 }
 0x2d3   :  { %v14907_v17 = vpop.permute.xlu1 %4103 }
 0x2d7   :  { %v14923_v30 = vpop.permute.xlu1 %4257 }
 0x301   :  { %v14845_v32 = vpop.f32.mrf.mxu0 }
 0x302   :  { %v2979_v33 = vsel %vm2978_vm6, %v14845_v32, -inf }
 0x303   :  { %v13230_v37 = vpop.f32.mrf.mxu0  ;;  %2980 = vmax.xlane.f32.xlu0 %v2979_v33 }
 0x304   :  { %v14929_v37 = vpop.permute.xlu0 %4334 }
 0x305   :  { %v14849_v38 = vpop.f32.mrf.mxu0 }
 0x306   :  { %v14851_v39 = vpop.f32.mrf.mxu1  ;;  %v2982_v40 = vsel %vm2978_vm6, %v14849_v38, -inf }
 0x307   :  { %v13235_v41 = vpop.f32.mrf.mxu0  ;;  %v2985_v42 = vsel %vm2978_vm6, %v14851_v39, -inf  ;;  %2983 = vmax.xlane.f32.xlu1 %v2982_v40 }
 0x308   :  { %v13240_v43 = vpop.f32.mrf.mxu1  ;;  %2986 = vmax.xlane.f32.xlu0 %v2985_v42 }
 0x30a   :  { %v14857_v44 = vpop.f32.mrf.mxu1 }
 0x30b   :  { %v14859_v45 = vpop.f32.mrf.mxu0  ;;  %v2991_v46 = vsel %vm2978_vm6, %v14857_v44, -inf }
 0x30c   :  { %v13250_v47 = vpop.f32.mrf.mxu1  ;;  %2992 = vmax.xlane.f32.xlu1 %v2991_v46  ;;  %v2988_v48 = vsel %vm2978_vm6, %v14859_v45, -inf }
 0x30d   :  { %2989 = vmax.xlane.f32.xlu0 %v2988_v48  ;;  %v13245_v49 = vpop.f32.mrf.mxu0  ;;  %v14939_v48 = vpop.permute.xlu1 %4411 }
 0x30f   :  { %v14865_v50 = vpop.f32.mrf.mxu1 }
 0x310   :  { %v14867_v51 = vpop.f32.mrf.mxu0  ;;  %v2997_v52 = vsel %vm2978_vm6, %v14865_v50, -inf }
 0x311   :  { %v13260_v53 = vpop.f32.mrf.mxu1  ;;  %2998 = vmax.xlane.f32.xlu1 %v2997_v52  ;;  %v2994_v54 = vsel %vm2978_vm6, %v14867_v51, -inf }
 0x312   :  { %2995 = vmax.xlane.f32.xlu0 %v2994_v54  ;;  %v13255_v56 = vpop.f32.mrf.mxu0 }
 0x313   :  { %v14945_v56 = vpop.permute.xlu0 %4488 }
 0x314   :  { %v14873_v57 = vpop.f32.mrf.mxu0 }
 0x315   :  { %v3000_v58 = vsel %vm2978_vm6, %v14873_v57, -inf }
 0x316   :  { %3001 = vmax.xlane.f32.xlu0 %v3000_v58  ;;  %v13265_v59 = vpop.f32.mrf.mxu0 }
 0x34c   :  { %v14887_v63 = vpop.f32.mrf.mxu1 }
 0x34d   :  { %v3003_v62 = vsel %vm2978_vm6, %v14887_v63, -inf }
 0x34e   :  { %v13270_v0 = vpop.f32.mrf.mxu1  ;;  %3004 = vmax.xlane.f32.xlu1 %v3003_v62 }
 0x350   :  { %v14893_v2 = vpop.f32.mrf.mxu0  ;;  %v14895_v3 = vpop.f32.mrf.mxu1 }
 0x351   :  { %v3009_v5 = vsel %vm2978_vm6, %v14895_v3, -inf  ;;  %v3006_v11 = vsel %vm2978_vm6, %v14893_v2, -inf }
 0x352   :  { %v13280_v13 = vpop.f32.mrf.mxu1  ;;  %3010 = vmax.xlane.f32.xlu1 %v3009_v5  ;;  %3007 = vmax.xlane.f32.xlu0 %v3006_v11  ;;  %v13275_v14 = vpop.f32.mrf.mxu0 }
 0x353   :  { %v14955_v13 = vpop.permute.xlu1 %4565 }
 0x354   :  { %v14903_v15 = vpop.f32.mrf.mxu0  ;;  %v14905_v16 = vpop.f32.mrf.mxu1 }
 0x355   :  { %v3015_v18 = vsel %vm2978_vm6, %v14905_v16, -inf  ;;  %v3012_v20 = vsel %vm2978_vm6, %v14903_v15, -inf }
 0x356   :  { %v13290_v21 = vpop.f32.mrf.mxu1  ;;  %3016 = vmax.xlane.f32.xlu1 %v3015_v18  ;;  %3013 = vmax.xlane.f32.xlu0 %v3012_v20  ;;  %v13285_v22 = vpop.f32.mrf.mxu0 }
 0x357   :  { %v14961_v20 = vpop.permute.xlu0 %4642 }
 0x358   :  { %v14915_v24 = vpop.f32.mrf.mxu0  ;;  %v14917_v25 = vpop.f32.mrf.mxu1 }
 0x359   :  { %v3021_v26 = vsel %vm2978_vm6, %v14917_v25, -inf  ;;  %v3018_v27 = vsel %vm2978_vm6, %v14915_v24, -inf }
 0x35a   :  { %v13300_v28 = vpop.f32.mrf.mxu1  ;;  %3022 = vmax.xlane.f32.xlu1 %v3021_v26  ;;  %3019 = vmax.xlane.f32.xlu0 %v3018_v27  ;;  %v13295_v29 = vpop.f32.mrf.mxu0 }
 0x35c   :  { %v14925_v31 = vpop.f32.mrf.mxu0  ;;  %v14927_v33 = vpop.f32.mrf.mxu1 }
 0x35d   :  { %v3027_v40 = vsel %vm2978_vm6, %v14927_v33, -inf  ;;  %v3024_v41 = vsel %vm2978_vm6, %v14925_v31, -inf }
 0x35e   :  { %v13310_v42 = vpop.f32.mrf.mxu1  ;;  %3028 = vmax.xlane.f32.xlu1 %v3027_v40  ;;  %3025 = vmax.xlane.f32.xlu0 %v3024_v41  ;;  %v13305_v43 = vpop.f32.mrf.mxu0 }
 0x35f   :  { %v14971_v40 = vpop.permute.xlu1 %4719 }
 0x360   :  { %v14935_v46 = vpop.f32.mrf.mxu0  ;;  %v14937_v47 = vpop.f32.mrf.mxu1 }
 0x361   :  { %v3033_v49 = vsel %vm2978_vm6, %v14937_v47, -inf  ;;  %v3030_v52 = vsel %vm2978_vm6, %v14935_v46, -inf }
 0x362   :  { %v13320_v53 = vpop.f32.mrf.mxu1  ;;  %3034 = vmax.xlane.f32.xlu1 %v3033_v49  ;;  %3031 = vmax.xlane.f32.xlu0 %v3030_v52  ;;  %v13315_v54 = vpop.f32.mrf.mxu0 }
 0x363   :  { %v14977_v52 = vpop.permute.xlu0 %5027 }
 0x364   :  { %v14947_v58 = vpop.f32.mrf.mxu0  ;;  %v14949_v59 = vpop.f32.mrf.mxu1  ;;  %16741 = vst [vmem:[#allocation8_spill] sm:$0xff] %v14977_v52 }
 0x365   :  { %v3039_v62 = vsel %vm2978_vm6, %v14949_v59, -inf  ;;  %v3036_v0 = vsel %vm2978_vm6, %v14947_v58, -inf }
 0x366   :  { %v13330_v5 = vpop.f32.mrf.mxu1  ;;  %3040 = vmax.xlane.f32.xlu1 %v3039_v62  ;;  %3037 = vmax.xlane.f32.xlu0 %v3036_v0  ;;  %v13325_v11 = vpop.f32.mrf.mxu0 }
 0x368   :  { %v14957_v14 = vpop.f32.mrf.mxu0  ;;  %v14959_v18 = vpop.f32.mrf.mxu1 }
 0x369   :  { %v3045_v21 = vsel %vm2978_vm6, %v14959_v18, -inf  ;;  %v3042_v22 = vsel %vm2978_vm6, %v14957_v14, -inf }
 0x36a   :  { %v13340_v26 = vpop.f32.mrf.mxu1  ;;  %3046 = vmax.xlane.f32.xlu1 %v3045_v21  ;;  %3043 = vmax.xlane.f32.xlu0 %v3042_v22  ;;  %v13335_v27 = vpop.f32.mrf.mxu0 }
 0x36b   :  { %v14987_v21 = vpop.permute.xlu1 %4873 }
 0x36c   :  { %v14967_v28 = vpop.f32.mrf.mxu0  ;;  %v14969_v29 = vpop.f32.mrf.mxu1  ;;  %16742 = vst [vmem:[#allocation9_spill] sm:$0xff] %v14987_v21 }
 0x36d   :  { %v3051_v41 = vsel %vm2978_vm6, %v14969_v29, -inf  ;;  %v3048_v42 = vsel %vm2978_vm6, %v14967_v28, -inf }
 0x36e   :  { %v13350_v43 = vpop.f32.mrf.mxu1  ;;  %3052 = vmax.xlane.f32.xlu1 %v3051_v41  ;;  %3049 = vmax.xlane.f32.xlu0 %v3048_v42  ;;  %v13345_v49 = vpop.f32.mrf.mxu0 }
 0x36f   :  { %v14995_v41 = vpop.permute.xlu0 %5181 }
 0x370   :  { %v14979_v53 = vpop.f32.mrf.mxu0  ;;  %v14981_v54 = vpop.f32.mrf.mxu1  ;;  %16743 = vst [vmem:[#allocation10_spill] sm:$0xff] %v14995_v41 }
 0x371   :  { %v3057_v62 = vsel %vm2978_vm6, %v14981_v54, -inf  ;;  %v3054_v0 = vsel %vm2978_vm6, %v14979_v53, -inf }
 0x372   :  { %v13360_v5 = vpop.f32.mrf.mxu1  ;;  %3058 = vmax.xlane.f32.xlu1 %v3057_v62  ;;  %3055 = vmax.xlane.f32.xlu0 %v3054_v0  ;;  %v13355_v11 = vpop.f32.mrf.mxu0 }
 0x373   :  { %v15003_v5 = vpop.permute.xlu1 %4950  ;;  %v15007_v34 = vpop.permute.xlu0 %5335 }
 0x374   :  { %v14989_v22 = vpop.f32.mrf.mxu1  ;;  %16744 = vst [vmem:[#allocation11_spill] sm:$0xff] %v15003_v5  ;;  %16745 = vst [vmem:[#allocation12_spill] sm:$0xff] %v15007_v34 }
 0x375   :  { %v14991_v26 = vpop.f32.mrf.mxu0  ;;  %v3063_v27 = vsel %vm2978_vm6, %v14989_v22, -inf }
 0x376   :  { %v13370_v42 = vpop.f32.mrf.mxu1  ;;  %3064 = vmax.xlane.f32.xlu1 %v3063_v27  ;;  %v3060_v43 = vsel %vm2978_vm6, %v14991_v26, -inf }
 0x377   :  { %3061 = vmax.xlane.f32.xlu0 %v3060_v43  ;;  %v13365_v49 = vpop.f32.mrf.mxu0  ;;  %v15011_v35 = vpop.permute.xlu1 %5104 }
 0x378   :  { %v14999_v62 = vpop.f32.mrf.mxu1  ;;  %16746 = vst [vmem:[#allocation13_spill] sm:$0xff] %v15011_v35  ;;  %v15013_v43 = vpop.permute.xlu0 %4180 }
 0x379   :  { %v15001_v0 = vpop.f32.mrf.mxu0 }
 0x37a   :  { %v13380_v11 = vpop.f32.mrf.mxu1  ;;  %v3066_v36 = vsel %vm2978_vm6, %v15001_v0, -inf }
 0x37b   :  { %3067 = vmax.xlane.f32.xlu0 %v3066_v36  ;;  %v13375_v61 = vpop.f32.mrf.mxu0  ;;  %v15015_v49 = vpop.permute.xlu1 %5258 }
 0x37c   :  { %16747 = vst [vmem:[#allocation14_spill] sm:$0xff] %v15015_v49  ;;  %v15017_v12 = vpop.permute.xlu0 %4796 }
 0x37d   :  { %v15009_v27 = vpop.f32.mrf.mxu0  ;;  %16748 = vst [vmem:[#allocation15_spill] sm:$0xff] %v15017_v12 }
 0x37f   :  { %v13385_v42 = vpop.f32.mrf.mxu0  ;;  %v15019_v19 = vpop.permute.xlu1 %5412 }
 0x380   :  { %16749 = vst [vmem:[#allocation16_spill] sm:$0xff] %v15019_v19 }
 0x38c   :  { %v2981_v11 = vpop.xlane.xlu0 %2980 }
 0x38d   :  { %v3075_v41 = vsub.f32 %v14845_v32, %v2981_v11 }
 0x38f   :  { %v3107_v36 = vmul.f32 1.442695, %v3075_v41 }
 0x390   :  { %v2984_v61 = vpop.xlane.xlu1 %2983 }
 0x391   :  { %13980 = vpow2.f32 %v3107_v36  ;;  %v2987_v34 = vpop.xlane.xlu0 %2986  ;;  %v3076_v52 = vsub.f32 %v14849_v38, %v2984_v61  ;;  %v3069_v38 = vsel %vm2978_vm6, %v14999_v62, -inf }
 0x392   :  { %v3077_v42 = vsub.f32 %v14851_v39, %v2987_v34 }
 0x393   :  { %v3109_v35 = vmul.f32 1.442695, %v3076_v52 }
 0x394   :  { %v3111_v5 = vmul.f32 1.442695, %v3077_v42 }
 0x395   :  { %13982 = vpow2.f32 %v3109_v35  ;;  %v3072_v35 = vsel %vm2978_vm6, %v15009_v27, -inf  ;;  %v2993_v39 = vpop.xlane.xlu1 %2992 }
 0x396   :  { %13984 = vpow2.f32 %v3111_v5  ;;  %v3079_v11 = vsub.f32 %v14857_v44, %v2993_v39 }
 0x39a   :  { %v2999_v36 = vpop.xlane.xlu1 %2998 }
 0x39e   :  { %v15024_v49 = vpop.eup %13980 }
 0x39f   :  { %v3171_v19 = vsel %vm2978_vm6, %v15024_v49, 0.0 }
 0x3a0   :  { %3172 = vadd.xlane.f32.xlu1 %v3171_v19  ;;  %v2990_v19 = vpop.xlane.xlu0 %2989 }
 0x3a1   :  { %v3078_v5 = vsub.f32 %v14859_v45, %v2990_v19 }
 0x3a2   :  { %v15028_v21 = vpop.eup %13982 }
 0x3a3   :  { %v15030_v32 = vpop.eup %13984  ;;  %v3174_v41 = vsel %vm2978_vm6, %v15028_v21, 0.0  ;;  %v3113_v61 = vmul.f32 1.442695, %v3078_v5 }
 0x3a4   :  { %v3177_v34 = vsel %vm2978_vm6, %v15030_v32, 0.0  ;;  %3175 = vadd.xlane.f32.xlu0 %v3174_v41  ;;  %v2996_v52 = vpop.xlane.xlu0 %2995  ;;  %v3115_v41 = vmul.f32 1.442695, %v3079_v11 }
 0x3a5   :  { %3178 = vadd.xlane.f32.xlu1 %v3177_v34  ;;  %v3080_v42 = vsub.f32 %v14867_v51, %v2996_v52  ;;  %v3081_v34 = vsub.f32 %v14865_v50, %v2999_v36  ;;  %13986 = vpow2.f32 %v3113_v61 }
 0x3a6   :  { %13988 = vpow2.f32 %v3115_v41 }
 0x3a8   :  { %3073 = vmax.xlane.f32.xlu0 %v3072_v35  ;;  %v3002_v35 = vpop.xlane.xlu0 %3001 }
 0x3a9   :  { %3070 = vmax.xlane.f32.xlu1 %v3069_v38  ;;  %v3082_v38 = vsub.f32 %v14873_v57, %v3002_v35 }
 0x3ab   :  { %v3121_v12 = vmul.f32 1.442695, %v3082_v38 }
 0x3b2   :  { %v15050_v19 = vpop.eup %13986 }
 0x3b3   :  { %v15052_v51 = vpop.eup %13988  ;;  %v3180_v11 = vsel %vm2978_vm6, %v15050_v19, 0.0 }
 0x3ba   :  { %5566 = vrot.lane.b32.xlu1 %v14590_v60, %s14265_s22  ;;  %v3117_v60 = vmul.f32 1.442695, %v3080_v42 }
 0x3bc   :  { %13990 = vpow2.f32 %v3117_v60 }
 0x3be   :  { %5489 = vrot.lane.b32.xlu0 %v14573_v55, %s14265_s22  ;;  %v3119_v55 = vmul.f32 1.442695, %v3081_v34 }
 0x3c0   :  { %13992 = vpow2.f32 %v3119_v55 }
 0x3c1   :  { %13994 = vpow2.f32 %v3121_v12  ;;  %v3183_v12 = vsel %vm2978_vm6, %v15052_v51, 0.0 }
 0x3c9   :  { %v15058_v36 = vpop.eup %13990 }
 0x3ca   :  { %v3186_v35 = vsel %vm2978_vm6, %v15058_v36, 0.0 }
 0x3d7   :  { %v3005_v45 = vpop.xlane.xlu1 %3004 }
 0x3d8   :  { %v3083_v44 = vsub.f32 %v14887_v63, %v3005_v45  ;;  %v15062_v63 = vpop.eup %13992 }
 0x3d9   :  { %v15068_v60 = vpop.eup %13994  ;;  %v3189_v38 = vsel %vm2978_vm6, %v15062_v63, 0.0 }
 0x3da   :  { %v3123_v39 = vmul.f32 1.442695, %v3083_v44 }
 0x3db   :  { %v3008_v50 = vpop.xlane.xlu0 %3007  ;;  %v3011_v52 = vpop.xlane.xlu1 %3010 }
 0x3dc   :  { %13996 = vpow2.f32 %v3123_v39  ;;  %v3084_v5 = vsub.f32 %v14893_v2, %v3008_v50  ;;  %v3085_v57 = vsub.f32 %v14895_v3, %v3011_v52  ;;  %v3192_v50 = vsel %vm2978_vm6, %v15068_v60, 0.0 }
 0x3dd   :  { %3181 = vadd.xlane.f32.xlu0 %v3180_v11 }
 0x3de   :  { %v3125_v61 = vmul.f32 1.442695, %v3084_v5  ;;  %v3127_v42 = vmul.f32 1.442695, %v3085_v57  ;;  %3184 = vadd.xlane.f32.xlu1 %v3183_v12 }
 0x3df   :  { %v3014_v41 = vpop.xlane.xlu0 %3013  ;;  %v3017_v34 = vpop.xlane.xlu1 %3016 }
 0x3e0   :  { %13998 = vpow2.f32 %v3125_v61  ;;  %v3086_v2 = vsub.f32 %v14903_v15, %v3014_v41  ;;  %v3087_v3 = vsub.f32 %v14905_v16, %v3017_v34 }
 0x3e1   :  { %14000 = vpow2.f32 %v3127_v42  ;;  %3187 = vadd.xlane.f32.xlu0 %v3186_v35 }
 0x3e2   :  { %v3129_v55 = vmul.f32 1.442695, %v3086_v2  ;;  %v3131_v45 = vmul.f32 1.442695, %v3087_v3  ;;  %3190 = vadd.xlane.f32.xlu1 %v3189_v38 }
 0x3e3   :  { %v3020_v44 = vpop.xlane.xlu0 %3019  ;;  %v3023_v39 = vpop.xlane.xlu1 %3022 }
 0x3e4   :  { %14002 = vpow2.f32 %v3129_v55  ;;  %v3088_v15 = vsub.f32 %v14915_v24, %v3020_v44  ;;  %v3089_v16 = vsub.f32 %v14917_v25, %v3023_v39 }
 0x3e5   :  { %14004 = vpow2.f32 %v3131_v45  ;;  %3193 = vadd.xlane.f32.xlu0 %v3192_v50 }
 0x3e6   :  { %v3133_v52 = vmul.f32 1.442695, %v3088_v15  ;;  %v3135_v5 = vmul.f32 1.442695, %v3089_v16 }
 0x3e7   :  { %v3026_v57 = vpop.xlane.xlu0 %3025  ;;  %v3029_v11 = vpop.xlane.xlu1 %3028 }
 0x3e8   :  { %14006 = vpow2.f32 %v3133_v52  ;;  %v3090_v12 = vsub.f32 %v14925_v31, %v3026_v57  ;;  %v3091_v61 = vsub.f32 %v14927_v33, %v3029_v11 }
 0x3e9   :  { %v15078_v42 = vpop.eup %13996  ;;  %14008 = vpow2.f32 %v3135_v5 }
 0x3ea   :  { %v3137_v24 = vmul.f32 1.442695, %v3090_v12  ;;  %v3139_v41 = vmul.f32 1.442695, %v3091_v61  ;;  %v3195_v25 = vsel %vm2978_vm6, %v15078_v42, 0.0 }
 0x3eb   :  { %v3032_v34 = vpop.xlane.xlu0 %3031  ;;  %3196 = vadd.xlane.f32.xlu1 %v3195_v25  ;;  %v3035_v2 = vpop.xlane.xlu1 %3034 }
 0x3ec   :  { %14010 = vpow2.f32 %v3137_v24  ;;  %v3092_v3 = vsub.f32 %v14935_v46, %v3032_v34  ;;  %v3093_v35 = vsub.f32 %v14937_v47, %v3035_v2 }
 0x3ed   :  { %v15084_v38 = vpop.eup %13998  ;;  %14012 = vpow2.f32 %v3139_v41 }
 0x3ee   :  { %v15086_v31 = vpop.eup %14000  ;;  %v3141_v33 = vmul.f32 1.442695, %v3092_v3  ;;  %v3143_v55 = vmul.f32 1.442695, %v3093_v35  ;;  %v3198_v45 = vsel %vm2978_vm6, %v15084_v38, 0.0 }
 0x3ef   :  { %v3038_v44 = vpop.xlane.xlu0 %3037  ;;  %3199 = vadd.xlane.f32.xlu0 %v3198_v45  ;;  %v3201_v39 = vsel %vm2978_vm6, %v15086_v31, 0.0  ;;  %v3041_v15 = vpop.xlane.xlu1 %3040 }
 0x3f0   :  { %14014 = vpow2.f32 %v3141_v33  ;;  %v3094_v46 = vsub.f32 %v14947_v58, %v3038_v44  ;;  %3202 = vadd.xlane.f32.xlu1 %v3201_v39  ;;  %v3095_v47 = vsub.f32 %v14949_v59, %v3041_v15 }
 0x3f1   :  { %v15094_v16 = vpop.eup %14002  ;;  %14016 = vpow2.f32 %v3143_v55 }
 0x3f2   :  { %v15096_v50 = vpop.eup %14004  ;;  %v3145_v52 = vmul.f32 1.442695, %v3094_v46  ;;  %v3147_v5 = vmul.f32 1.442695, %v3095_v47  ;;  %v3204_v57 = vsel %vm2978_vm6, %v15094_v16, 0.0 }
 0x3f3   :  { %v3044_v11 = vpop.xlane.xlu0 %3043  ;;  %3205 = vadd.xlane.f32.xlu0 %v3204_v57  ;;  %v3207_v12 = vsel %vm2978_vm6, %v15096_v50, 0.0  ;;  %v3047_v61 = vpop.xlane.xlu1 %3046 }
 0x3f4   :  { %14018 = vpow2.f32 %v3145_v52  ;;  %v3096_v58 = vsub.f32 %v14957_v14, %v3044_v11  ;;  %3208 = vadd.xlane.f32.xlu1 %v3207_v12  ;;  %v3097_v59 = vsub.f32 %v14959_v18, %v3047_v61 }
 0x3f5   :  { %v15104_v24 = vpop.eup %14006  ;;  %14020 = vpow2.f32 %v3147_v5 }
 0x3f6   :  { %v15106_v41 = vpop.eup %14008  ;;  %v3149_v25 = vmul.f32 1.442695, %v3096_v58  ;;  %v3151_v34 = vmul.f32 1.442695, %v3097_v59  ;;  %v3210_v2 = vsel %vm2978_vm6, %v15104_v24, 0.0 }
 0x3f7   :  { %v3050_v3 = vpop.xlane.xlu0 %3049  ;;  %3211 = vadd.xlane.f32.xlu0 %v3210_v2  ;;  %v3213_v35 = vsel %vm2978_vm6, %v15106_v41, 0.0  ;;  %v3053_v33 = vpop.xlane.xlu1 %3052 }
 0x3f8   :  { %14022 = vpow2.f32 %v3149_v25  ;;  %v3098_v14 = vsub.f32 %v14967_v28, %v3050_v3  ;;  %3214 = vadd.xlane.f32.xlu1 %v3213_v35  ;;  %v3099_v18 = vsub.f32 %v14969_v29, %v3053_v33 }
 0x3f9   :  { %v15114_v55 = vpop.eup %14010  ;;  %14024 = vpow2.f32 %v3151_v34 }
 0x3fa   :  { %v15116_v45 = vpop.eup %14012  ;;  %v3153_v44 = vmul.f32 1.442695, %v3098_v14  ;;  %v3155_v39 = vmul.f32 1.442695, %v3099_v18  ;;  %v3216_v15 = vsel %vm2978_vm6, %v15114_v55, 0.0 }
 0x3fb   :  { %v3056_v46 = vpop.xlane.xlu0 %3055  ;;  %3217 = vadd.xlane.f32.xlu0 %v3216_v15  ;;  %v3219_v47 = vsel %vm2978_vm6, %v15116_v45, 0.0  ;;  %v3059_v52 = vpop.xlane.xlu1 %3058 }
 0x3fc   :  { %14026 = vpow2.f32 %v3153_v44  ;;  %v3100_v28 = vsub.f32 %v14979_v53, %v3056_v46  ;;  %3220 = vadd.xlane.f32.xlu1 %v3219_v47  ;;  %v3101_v29 = vsub.f32 %v14981_v54, %v3059_v52 }
 0x3fd   :  { %v15124_v5 = vpop.eup %14014  ;;  %14028 = vpow2.f32 %v3155_v39 }
 0x3fe   :  { %v15126_v57 = vpop.eup %14016  ;;  %v3157_v11 = vmul.f32 1.442695, %v3100_v28  ;;  %v3159_v12 = vmul.f32 1.442695, %v3101_v29  ;;  %v3222_v61 = vsel %vm2978_vm6, %v15124_v5, 0.0 }
 0x3ff   :  { %3223 = vadd.xlane.f32.xlu0 %v3222_v61  ;;  %v3225_v58 = vsel %vm2978_vm6, %v15126_v57, 0.0  ;;  %v3065_v59 = vpop.xlane.xlu1 %3064 }
 0x400   :  { %14030 = vpow2.f32 %v3157_v11  ;;  %v3062_v53 = vpop.xlane.xlu0 %3061  ;;  %3226 = vadd.xlane.f32.xlu1 %v3225_v58  ;;  %v3103_v54 = vsub.f32 %v14989_v22, %v3065_v59 }
 0x401   :  { %v15133_v25 = vpop.eup %14018  ;;  %14032 = vpow2.f32 %v3159_v12  ;;  %v3102_v34 = vsub.f32 %v14991_v26, %v3062_v53 }
 0x402   :  { %v15136_v2 = vpop.eup %14020  ;;  %v3163_v3 = vmul.f32 1.442695, %v3103_v54  ;;  %v3228_v35 = vsel %vm2978_vm6, %v15133_v25, 0.0 }
 0x403   :  { %v3161_v33 = vmul.f32 1.442695, %v3102_v34  ;;  %3229 = vadd.xlane.f32.xlu0 %v3228_v35  ;;  %v3231_v14 = vsel %vm2978_vm6, %v15136_v2, 0.0 }
 0x404   :  { %14034 = vpow2.f32 %v3163_v3  ;;  %v3068_v18 = vpop.xlane.xlu0 %3067  ;;  %3232 = vadd.xlane.f32.xlu1 %v3231_v14 }
 0x405   :  { %v15142_v22 = vpop.eup %14022  ;;  %14036 = vpow2.f32 %v3161_v33  ;;  %v3104_v44 = vsub.f32 %v15001_v0, %v3068_v18 }
 0x406   :  { %v15145_v26 = vpop.eup %14024  ;;  %v3234_v39 = vsel %vm2978_vm6, %v15142_v22, 0.0 }
 0x407   :  { %v3165_v15 = vmul.f32 1.442695, %v3104_v44  ;;  %3235 = vadd.xlane.f32.xlu0 %v3234_v39  ;;  %v3237_v46 = vsel %vm2978_vm6, %v15145_v26, 0.0 }
 0x408   :  { %3238 = vadd.xlane.f32.xlu1 %v3237_v46 }
 0x409   :  { %v15151_v47 = vpop.eup %14026  ;;  %14038 = vpow2.f32 %v3165_v15 }
 0x40a   :  { %v15153_v52 = vpop.eup %14028  ;;  %v3240_v28 = vsel %vm2978_vm6, %v15151_v47, 0.0 }
 0x40b   :  { %3241 = vadd.xlane.f32.xlu0 %v3240_v28  ;;  %v3243_v0 = vsel %vm2978_vm6, %v15153_v52, 0.0 }
 0x40c   :  { %3244 = vadd.xlane.f32.xlu1 %v3243_v0 }
 0x40d   :  { %v15159_v29 = vpop.eup %14030 }
 0x40e   :  { %v15161_v11 = vpop.eup %14032  ;;  %v3246_v12 = vsel %vm2978_vm6, %v15159_v29, 0.0 }
 0x40f   :  { %3247 = vadd.xlane.f32.xlu0 %v3246_v12  ;;  %v3249_v61 = vsel %vm2978_vm6, %v15161_v11, 0.0 }
 0x410   :  { %3250 = vadd.xlane.f32.xlu1 %v3249_v61 }
 0x411   :  { %v15167_v58 = vpop.eup %14034 }
 0x412   :  { %v15169_v59 = vpop.eup %14036  ;;  %v3255_v53 = vsel %vm2978_vm6, %v15167_v58, 0.0 }
 0x413   :  { %v3252_v54 = vsel %vm2978_vm6, %v15169_v59, 0.0 }
 0x414   :  { %3253 = vadd.xlane.f32.xlu0 %v3252_v54  ;;  %3256 = vadd.xlane.f32.xlu1 %v3255_v53  ;;  %v16750_v53 = vmov 0.0  }
 0x416   :  { %v15175_v34 = vpop.eup %14038 }
 0x417   :  { %v3258_v3 = vsel %vm2978_vm6, %v15175_v34, 0.0 }
 0x418   :  { %3259 = vadd.xlane.f32.xlu0 %v3258_v3 }
 0x429   :  { %v3173_v35 = vpop.xlane.xlu1 %3172 }
 0x42a   :  { %14040 = vrcp.f32 %v3173_v35 }
 0x42d   :  { %v3176_v33 = vpop.xlane.xlu0 %3175 }
 0x42e   :  { %14042 = vrcp.f32 %v3176_v33  ;;  %v3179_v14 = vpop.xlane.xlu1 %3178 }
 0x42f   :  { %14044 = vrcp.f32 %v3179_v14 }
 0x431   :  { %v3074_v18 = vpop.xlane.xlu0 %3073 }
 0x432   :  { %v3106_v44 = vsub.f32 %v15009_v27, %v3074_v18  ;;  %v3071_v39 = vpop.xlane.xlu1 %3070 }
 0x433   :  { %v3105_v15 = vsub.f32 %v14999_v62, %v3071_v39 }
 0x434   :  { %v3169_v46 = vmul.f32 1.442695, %v3106_v44 }
 0x435   :  { %v3167_v28 = vmul.f32 1.442695, %v3105_v15  ;;  %v15212_v3 = vpop.permute.xlu0 %5489 }
 0x436   :  { %14046 = vpow2.f32 %v3169_v46  ;;  %v15214_v35 = vpop.permute.xlu1 %5566 }
 0x437   :  { %v14041_v0 = vpop.eup %14040  ;;  %14048 = vpow2.f32 %v3167_v28 }
 0x438   :  { %v3268_v12 = vmul.f32 %v14041_v0, %v15024_v49  ;;  %v14252_v49 = vld [vmem:[#allocation2 + $0x3e] sm:$0x3] }
 0x43a   :  { %13389 = vmatmul.mubr.msk.f32.vlgmr.msra.gmra.mxu1 %vm3333_vm7, %v3268_v12 }
 0x43b   :  { %v14043_v61 = vpop.eup %14042  ;;  %13397 = vmatpush3.msk.msra.mxu1 %vm3337_vm5, %v14877_v6  ;;  %13398 = vmatprep.mubr.msk.f32.mxu1 %vm14263_vm3, %v16750_v53 }
 0x43c   :  { %v14045_v27 = vpop.eup %14044  ;;  %13406 = vmatprep.subr.mxu1 %v16750_v53  ;;  %v3270_v62 = vmul.f32 %v14043_v61, %v15028_v21 }
 0x43d   :  { %v3272_v54 = vmul.f32 %v14045_v27, %v15030_v32  ;;  %v14253_v32 = vld [vmem:[#allocation2 + $0x3c] sm:$0x3] }
 0x43e   :  { %13394 = vmatmul.mubr.msk.f32.vlgmr.msra.gmra.mxu0 %vm3333_vm7, %v3270_v62 }
 0x43f   :  { %13399 = vmatmul.mubr.msk.f32.vlgmr.msra.gmra.mxu1 %vm3333_vm7, %v3272_v54  ;;  %13402 = vmatpush3.msk.msra.mxu0 %vm3337_vm5, %v14881_v8 }
 0x440   :  { %13407 = vmatpush3.msk.msra.mxu1 %vm3337_vm5, %v14879_v7  ;;  %13403 = vmatprep.mubr.msk.f32.mxu0 %vm14263_vm3, %v16750_v53 }
 0x441   :  { %13408 = vmatprep.mubr.msk.f32.mxu1 %vm14263_vm3, %v16750_v53  ;;  %13411 = vmatprep.subr.mxu0 %v16750_v53 }
 0x442   :  { %13416 = vmatprep.subr.mxu1 %v16750_v53 }
 0x443   :  { %v15202_v6 = vpop.eup %14046 }
 0x444   :  { %v15204_v21 = vpop.eup %14048  ;;  %v3264_v8 = vsel %vm2978_vm6, %v15202_v6, 0.0 }
 0x445   :  { %3265 = vadd.xlane.f32.xlu0 %v3264_v8  ;;  %v3261_v7 = vsel %vm2978_vm6, %v15204_v21, 0.0 }
 0x446   :  { %3262 = vadd.xlane.f32.xlu1 %v3261_v7 }
 0x457   :  { %5720 = vrot.lane.b32.xlu1 %v14252_v49, %s14265_s22 }
 0x45b   :  { %5643 = vrot.lane.b32.xlu0 %v14253_v32, %s14265_s22 }
 0x466   :  { %v3182_v33 = vpop.xlane.xlu0 %3181 }
 0x467   :  { %14050 = vrcp.f32 %v3182_v33  ;;  %v3185_v14 = vpop.xlane.xlu1 %3184 }
 0x468   :  { %14052 = vrcp.f32 %v3185_v14 }
 0x46a   :  { %v3188_v18 = vpop.xlane.xlu0 %3187 }
 0x46b   :  { %14054 = vrcp.f32 %v3188_v18  ;;  %v3191_v44 = vpop.xlane.xlu1 %3190 }
 0x46c   :  { %14056 = vrcp.f32 %v3191_v44 }
 0x46e   :  { %v3194_v39 = vpop.xlane.xlu0 %3193 }
 0x46f   :  { %14058 = vrcp.f32 %v3194_v39 }
 0x474   :  { %v14051_v15 = vpop.eup %14050  ;;  %v3197_v46 = vpop.xlane.xlu1 %3196 }
 0x475   :  { %v14053_v28 = vpop.eup %14052  ;;  %14060 = vrcp.f32 %v3197_v46  ;;  %v3274_v0 = vmul.f32 %v14051_v15, %v15050_v19 }
 0x476   :  { %v3276_v12 = vmul.f32 %v14053_v28, %v15052_v51 }
 0x477   :  { %13404 = vmatmul.mubr.msk.f32.vlgmr.msra.gmra.mxu0 %vm3333_vm7, %v3274_v0 }
 0x478   :  { %v14055_v61 = vpop.eup %14054  ;;  %13409 = vmatmul.mubr.msk.f32.vlgmr.msra.gmra.mxu1 %vm3333_vm7, %v3276_v12  ;;  %13412 = vmatpush3.msk.msra.mxu0 %vm3337_vm5, %v14885_v10  ;;  %v3200_v27 = vpop.xlane.xlu0 %3199 }
 0x479   :  { %v14057_v62 = vpop.eup %14056  ;;  %13417 = vmatpush3.msk.msra.mxu1 %vm3337_vm5, %v14883_v9  ;;  %14062 = vrcp.f32 %v3200_v27  ;;  %v3203_v54 = vpop.xlane.xlu1 %3202  ;;  %13413 = vmatprep.mubr.msk.f32.mxu0 %vm14263_vm3, %v16750_v53  ;;  %v3278_v19 = vmul.f32 %v14055_v61, %v15058_v36  ;;  %v16751_v27 = vld [vmem:[#allocation15_spill] sm:$0xff] }
 0x47a   :  { %14064 = vrcp.f32 %v3203_v54  ;;  %13418 = vmatprep.mubr.msk.f32.mxu1 %vm14263_vm3, %v16750_v53  ;;  %13421 = vmatprep.subr.mxu0 %v16750_v53  ;;  %v3280_v10 = vmul.f32 %v14057_v62, %v15062_v63  ;;  %v16752_v62 = vld [vmem:[#allocation9_spill] sm:$0xff] }
 0x47b   :  { %13426 = vmatprep.subr.mxu1 %v16750_v53  ;;  %13414 = vmatmul.mubr.msk.f32.vlgmr.msra.gmra.mxu0 %vm3333_vm7, %v3278_v19 }
 0x47c   :  { %v14059_v9 = vpop.eup %14058  ;;  %13419 = vmatmul.mubr.msk.f32.vlgmr.msra.gmra.mxu1 %vm3333_vm7, %v3280_v10  ;;  %13422 = vmatpush3.msk.msra.mxu0 %vm3337_vm5, %v14897_v4  ;;  %v3206_v51 = vpop.xlane.xlu0 %3205 }
 0x47d   :  { %13427 = vmatpush3.msk.msra.mxu1 %vm3337_vm5, %v14891_v1  ;;  %14066 = vrcp.f32 %v3206_v51  ;;  %v3209_v36 = vpop.xlane.xlu1 %3208  ;;  %13423 = vmatprep.mubr.msk.f32.mxu0 %vm14263_vm3, %v16750_v53  ;;  %v3282_v63 = vmul.f32 %v14059_v9, %v15068_v60  ;;  %v16753_v51 = vld [vmem:[#allocation11_spill] sm:$0xff] }
 0x47e   :  { %14068 = vrcp.f32 %v3209_v36  ;;  %13431 = vmatprep.subr.mxu0 %v16750_v53  ;;  %13428 = vmatprep.mubr.msk.f32.mxu1 %vm14263_vm3, %v16750_v53  ;;  %v16754_v36 = vld [vmem:[#allocation8_spill] sm:$0xff] }
 0x47f   :  { %13424 = vmatmul.mubr.msk.f32.vlgmr.msra.gmra.mxu0 %vm3333_vm7, %v3282_v63  ;;  %13436 = vmatprep.subr.mxu1 %v16750_v53 }
 0x480   :  { %13432 = vmatpush3.msk.msra.mxu0 %vm3337_vm5, %v14913_v23  ;;  %v3212_v1 = vpop.xlane.xlu0 %3211  ;;  %13433 = vmatprep.mubr.msk.f32.mxu0 %vm14263_vm3, %v16750_v53 }
 0x481   :  { %14070 = vrcp.f32 %v3212_v1  ;;  %v3215_v4 = vpop.xlane.xlu1 %3214  ;;  %13441 = vmatprep.subr.mxu0 %v16750_v53 }
 0x482   :  { %v14061_v60 = vpop.eup %14060  ;;  %14072 = vrcp.f32 %v3215_v4 }
 0x483   :  { %v3284_v8 = vmul.f32 %v14061_v60, %v15078_v42  ;;  %v16755_v60 = vld [vmem:[#allocation13_spill] sm:$0xff] }
 0x484   :  { %v3218_v7 = vpop.xlane.xlu0 %3217 }
 0x485   :  { %14074 = vrcp.f32 %v3218_v7  ;;  %v3221_v49 = vpop.xlane.xlu1 %3220  ;;  %13429 = vmatmul.mubr.msk.f32.vlgmr.msra.gmra.mxu1 %vm3333_vm7, %v3284_v8  ;;  %v16756_v8 = vld [vmem:[#allocation10_spill] sm:$0xff] }
 0x486   :  { %v14063_v32 = vpop.eup %14062  ;;  %14076 = vrcp.f32 %v3221_v49  ;;  %13437 = vmatpush3.msk.msra.mxu1 %vm3337_vm5, %v14907_v17  ;;  %13438 = vmatprep.mubr.msk.f32.mxu1 %vm14263_vm3, %v16750_v53 }
 0x487   :  { %v14065_v23 = vpop.eup %14064  ;;  %13446 = vmatprep.subr.mxu1 %v16750_v53  ;;  %v3286_v33 = vmul.f32 %v14063_v32, %v15084_v38  ;;  %v16757_v32 = vld [vmem:[#allocation14_spill] sm:$0xff] }
 0x488   :  { %v3224_v14 = vpop.xlane.xlu0 %3223  ;;  %v3288_v42 = vmul.f32 %v14065_v23, %v15086_v31 }
 0x489   :  { %14078 = vrcp.f32 %v3224_v14  ;;  %v3227_v18 = vpop.xlane.xlu1 %3226  ;;  %13434 = vmatmul.mubr.msk.f32.vlgmr.msra.gmra.mxu0 %vm3333_vm7, %v3286_v33  ;;  %v16758_v33 = vld [vmem:[#allocation12_spill] sm:$0xff] }
 0x48a   :  { %v14067_v44 = vpop.eup %14066  ;;  %14080 = vrcp.f32 %v3227_v18  ;;  %13439 = vmatmul.mubr.msk.f32.vlgmr.msra.gmra.mxu1 %vm3333_vm7, %v3288_v42  ;;  %13442 = vmatpush3.msk.msra.mxu0 %vm3337_vm5, %v15013_v43  ;;  %v16759_v14 = vld [vmem:[#allocation16_spill] sm:$0xff] }
 0x48b   :  { %v14069_v17 = vpop.eup %14068  ;;  %13447 = vmatpush3.msk.msra.mxu1 %vm3337_vm5, %v14923_v30  ;;  %13443 = vmatprep.mubr.msk.f32.mxu0 %vm14263_vm3, %v16750_v53  ;;  %v3290_v38 = vmul.f32 %v14067_v44, %v15094_v16 }
 0x48c   :  { %13451 = vmatprep.subr.mxu0 %v16750_v53  ;;  %v3230_v31 = vpop.xlane.xlu0 %3229  ;;  %13448 = vmatprep.mubr.msk.f32.mxu1 %vm14263_vm3, %v16750_v53  ;;  %v3292_v39 = vmul.f32 %v14069_v17, %v15096_v50 }
 0x48d   :  { %14082 = vrcp.f32 %v3230_v31  ;;  %13456 = vmatprep.subr.mxu1 %v16750_v53  ;;  %v3233_v43 = vpop.xlane.xlu1 %3232  ;;  %13444 = vmatmul.mubr.msk.f32.vlgmr.msra.gmra.mxu0 %vm3333_vm7, %v3290_v38 }
 0x48e   :  { %v14071_v30 = vpop.eup %14070  ;;  %14084 = vrcp.f32 %v3233_v43  ;;  %13449 = vmatmul.mubr.msk.f32.vlgmr.msra.gmra.mxu1 %vm3333_vm7, %v3292_v39  ;;  %13452 = vmatpush3.msk.msra.mxu0 %vm3337_vm5, %v14929_v37 }
 0x48f   :  { %v14073_v16 = vpop.eup %14072  ;;  %13457 = vmatpush3.msk.msra.mxu1 %vm3337_vm5, %v14939_v48  ;;  %13453 = vmatprep.mubr.msk.f32.mxu0 %vm14263_vm3, %v16750_v53  ;;  %v3294_v50 = vmul.f32 %v14071_v30, %v15104_v24 }
 0x490   :  { %13461 = vmatprep.subr.mxu0 %v16750_v53  ;;  %v3236_v15 = vpop.xlane.xlu0 %3235  ;;  %13458 = vmatprep.mubr.msk.f32.mxu1 %vm14263_vm3, %v16750_v53  ;;  %v3296_v46 = vmul.f32 %v14073_v16, %v15106_v41 }
 0x491   :  { %14086 = vrcp.f32 %v3236_v15  ;;  %13466 = vmatprep.subr.mxu1 %v16750_v53  ;;  %v3239_v37 = vpop.xlane.xlu1 %3238  ;;  %13454 = vmatmul.mubr.msk.f32.vlgmr.msra.gmra.mxu0 %vm3333_vm7, %v3294_v50 }
 0x492   :  { %v14075_v48 = vpop.eup %14074  ;;  %14088 = vrcp.f32 %v3239_v37  ;;  %13459 = vmatmul.mubr.msk.f32.vlgmr.msra.gmra.mxu1 %vm3333_vm7, %v3296_v46  ;;  %13462 = vmatpush3.msk.msra.mxu0 %vm3337_vm5, %v14945_v56 }
 0x493   :  { %v14077_v24 = vpop.eup %14076  ;;  %13467 = vmatpush3.msk.msra.mxu1 %vm3337_vm5, %v14955_v13  ;;  %13463 = vmatprep.mubr.msk.f32.mxu0 %vm14263_vm3, %v16750_v53  ;;  %v3298_v41 = vmul.f32 %v14075_v48, %v15114_v55 }
 0x494   :  { %13471 = vmatprep.subr.mxu0 %v16750_v53  ;;  %v3242_v28 = vpop.xlane.xlu0 %3241  ;;  %13468 = vmatprep.mubr.msk.f32.mxu1 %vm14263_vm3, %v16750_v53  ;;  %v3300_v0 = vmul.f32 %v14077_v24, %v15116_v45 }
 0x495   :  { %14090 = vrcp.f32 %v3242_v28  ;;  %13476 = vmatprep.subr.mxu1 %v16750_v53  ;;  %v3245_v56 = vpop.xlane.xlu1 %3244  ;;  %13464 = vmatmul.mubr.msk.f32.vlgmr.msra.gmra.mxu0 %vm3333_vm7, %v3298_v41 }
 0x496   :  { %v14079_v13 = vpop.eup %14078  ;;  %14092 = vrcp.f32 %v3245_v56  ;;  %13469 = vmatmul.mubr.msk.f32.vlgmr.msra.gmra.mxu1 %vm3333_vm7, %v3300_v0  ;;  %13472 = vmatpush3.msk.msra.mxu0 %vm3337_vm5, %v14961_v20  ;;  %v16760_v0 = vld [vmem:[#allocation5_spill] sm:$0xff] }
 0x497   :  { %v14081_v55 = vpop.eup %14080  ;;  %13477 = vmatpush3.msk.msra.mxu1 %vm3337_vm5, %v14971_v40  ;;  %13473 = vmatprep.mubr.msk.f32.mxu0 %vm14263_vm3, %v16750_v53  ;;  %v3302_v45 = vmul.f32 %v14079_v13, %v15124_v5 }
 0x498   :  { %13481 = vmatprep.subr.mxu0 %v16750_v53  ;;  %v3248_v12 = vpop.xlane.xlu0 %3247  ;;  %13478 = vmatprep.mubr.msk.f32.mxu1 %vm14263_vm3, %v16750_v53  ;;  %v3304_v61 = vmul.f32 %v14081_v55, %v15126_v57 }
 0x499   :  { %14094 = vrcp.f32 %v3248_v12  ;;  %13486 = vmatprep.subr.mxu1 %v16750_v53  ;;  %v3251_v20 = vpop.xlane.xlu1 %3250  ;;  %13474 = vmatmul.mubr.msk.f32.vlgmr.msra.gmra.mxu0 %vm3333_vm7, %v3302_v45 }
 0x49a   :  { %v14083_v40 = vpop.eup %14082  ;;  %14096 = vrcp.f32 %v3251_v20  ;;  %13479 = vmatmul.mubr.msk.f32.vlgmr.msra.gmra.mxu1 %vm3333_vm7, %v3304_v61  ;;  %13482 = vmatpush3.msk.msra.mxu0 %vm3337_vm5, %v16751_v27 }
 0x49b   :  { %v14085_v5 = vpop.eup %14084  ;;  %13487 = vmatpush3.msk.msra.mxu1 %vm3337_vm5, %v16752_v62  ;;  %13483 = vmatprep.mubr.msk.f32.mxu0 %vm14263_vm3, %v16750_v53  ;;  %v3306_v57 = vmul.f32 %v14083_v40, %v15133_v25 }
 0x49c   :  { %13491 = vmatprep.subr.mxu0 %v16750_v53  ;;  %13488 = vmatprep.mubr.msk.f32.mxu1 %vm14263_vm3, %v16750_v53  ;;  %v3308_v54 = vmul.f32 %v14085_v5, %v15136_v2 }
 0x49d   :  { %v3254_v19 = vpop.xlane.xlu0 %3253  ;;  %13496 = vmatprep.subr.mxu1 %v16750_v53  ;;  %v3257_v10 = vpop.xlane.xlu1 %3256  ;;  %13484 = vmatmul.mubr.msk.f32.vlgmr.msra.gmra.mxu0 %vm3333_vm7, %v3306_v57 }
 0x49e   :  { %v14087_v9 = vpop.eup %14086  ;;  %14098 = vrcp.f32 %v3254_v19  ;;  %13489 = vmatmul.mubr.msk.f32.vlgmr.msra.gmra.mxu1 %vm3333_vm7, %v3308_v54  ;;  %13492 = vmatpush3.msk.msra.mxu0 %vm3337_vm5, %v16753_v51 }
 0x49f   :  { %v14089_v25 = vpop.eup %14088  ;;  %14100 = vrcp.f32 %v3257_v10  ;;  %13497 = vmatpush3.msk.msra.mxu1 %vm3337_vm5, %v16754_v36  ;;  %13493 = vmatprep.mubr.msk.f32.mxu0 %vm14263_vm3, %v16750_v53  ;;  %v3310_v2 = vmul.f32 %v14087_v9, %v15142_v22 }
 0x4a0   :  { %13501 = vmatprep.subr.mxu0 %v16750_v53  ;;  %13498 = vmatprep.mubr.msk.f32.mxu1 %vm14263_vm3, %v16750_v53  ;;  %v3312_v63 = vmul.f32 %v14089_v25, %v15145_v26 }
 0x4a1   :  { %v3260_v1 = vpop.xlane.xlu0 %3259  ;;  %13506 = vmatprep.subr.mxu1 %v16750_v53  ;;  %13494 = vmatmul.mubr.msk.f32.vlgmr.msra.gmra.mxu0 %vm3333_vm7, %v3310_v2 }
 0x4a2   :  { %v14091_v4 = vpop.eup %14090  ;;  %14102 = vrcp.f32 %v3260_v1  ;;  %13499 = vmatmul.mubr.msk.f32.vlgmr.msra.gmra.mxu1 %vm3333_vm7, %v3312_v63  ;;  %13502 = vmatpush3.msk.msra.mxu0 %vm3337_vm5, %v16755_v60 }
 0x4a3   :  { %v14093_v22 = vpop.eup %14092  ;;  %13507 = vmatpush3.msk.msra.mxu1 %vm3337_vm5, %v16756_v8  ;;  %13503 = vmatprep.mubr.msk.f32.mxu0 %vm14263_vm3, %v16750_v53  ;;  %v3314_v26 = vmul.f32 %v14091_v4, %v15151_v47 }
 0x4a4   :  { %13508 = vmatprep.mubr.msk.f32.mxu1 %vm14263_vm3, %v16750_v53  ;;  %13511 = vmatprep.subr.mxu0 %v16750_v53  ;;  %v3316_v7 = vmul.f32 %v14093_v22, %v15153_v52 }
 0x4a5   :  { %13516 = vmatprep.subr.mxu1 %v16750_v53  ;;  %13504 = vmatmul.mubr.msk.f32.vlgmr.msra.gmra.mxu0 %vm3333_vm7, %v3314_v26 }
 0x4a6   :  { %v14095_v49 = vpop.eup %14094  ;;  %13509 = vmatmul.mubr.msk.f32.vlgmr.msra.gmra.mxu1 %vm3333_vm7, %v3316_v7  ;;  %13512 = vmatpush3.msk.msra.mxu0 %vm3337_vm5, %v16757_v32 }
 0x4a7   :  { %v14097_v23 = vpop.eup %14096  ;;  %13517 = vmatpush3.msk.msra.mxu1 %vm3337_vm5, %v16758_v33  ;;  %13513 = vmatprep.mubr.msk.f32.mxu0 %vm14263_vm3, %v16750_v53  ;;  %v3318_v47 = vmul.f32 %v14095_v49, %v15159_v29 }
 0x4a8   :  { %13518 = vmatprep.mubr.msk.f32.mxu1 %vm14263_vm3, %v16750_v53  ;;  %13521 = vmatprep.subr.mxu0 %v16750_v53  ;;  %v3320_v52 = vmul.f32 %v14097_v23, %v15161_v11 }
 0x4a9   :  { %13526 = vmatprep.subr.mxu1 %v16750_v53  ;;  %13514 = vmatmul.mubr.msk.f32.vlgmr.msra.gmra.mxu0 %vm3333_vm7, %v3318_v47 }
 0x4aa   :  { %13519 = vmatmul.mubr.msk.f32.vlgmr.msra.gmra.mxu1 %vm3333_vm7, %v3320_v52  ;;  %13522 = vmatpush3.msk.msra.mxu0 %vm3337_vm5, %v16759_v14 }
 0x4ab   :  { %v14099_v42 = vpop.eup %14098  ;;  %13527 = vmatpush3.msk.msra.mxu1 %vm3337_vm5, %v15212_v3  ;;  %13523 = vmatprep.mubr.msk.f32.mxu0 %vm14263_vm3, %v16750_v53 }
 0x4ac   :  { %v14101_v29 = vpop.eup %14100  ;;  %13528 = vmatprep.mubr.msk.f32.mxu1 %vm14263_vm3, %v16750_v53  ;;  %13531 = vmatprep.subr.mxu0 %v16750_v53  ;;  %v3322_v11 = vmul.f32 %v14099_v42, %v15169_v59 }
 0x4ad   :  { %v3324_v18 = vmul.f32 %v14101_v29, %v15167_v58  ;;  %13536 = vmatprep.subr.mxu1 %v16750_v53 }
 0x4ae   :  { %13524 = vmatmul.mubr.msk.f32.vlgmr.msra.gmra.mxu0 %vm3333_vm7, %v3322_v11 }
 0x4af   :  { %v14103_v44 = vpop.eup %14102  ;;  %13529 = vmatmul.mubr.msk.f32.vlgmr.msra.gmra.mxu1 %vm3333_vm7, %v3324_v18  ;;  %13532 = vmatpush3.msk.msra.mxu0 %vm3337_vm5, %v15214_v35 }
 0x4b0   :  { %13533 = vmatprep.mubr.msk.f32.mxu0 %vm14263_vm3, %v16750_v53  ;;  %v3326_v3 = vmul.f32 %v14103_v44, %v15175_v34  ;;  %13541 = vmatprep.subr.mxu0 %v16750_v53 }
 0x4b1   :  { %13538 = vmatprep.mubr.msk.f32.mxu1 %vm14263_vm3, %v16750_v53 }
 0x4b2   :  { %13534 = vmatmul.mubr.msk.f32.vlgmr.msra.gmra.mxu0 %vm3333_vm7, %v3326_v3 }
 0x4b3   :  { %13543 = vmatprep.mubr.msk.f32.mxu0 %vm14263_vm3, %v16750_v53 }
 0x4ce   :  { %v3266_v58 = vpop.xlane.xlu0 %3265 }
 0x4cf   :  { %14104 = vrcp.f32 %v3266_v58  ;;  %v3263_v59 = vpop.xlane.xlu1 %3262 }
 0x4d0   :  { %14106 = vrcp.f32 %v3263_v59 }
 0x4d2   :  { %v5644_v35 = vpop.permute.xlu0 %5643 }
 0x4d3   :  { %v5721_v17 = vpop.permute.xlu1 %5720  ;;  %13537 = vmatpush3.msk.msra.mxu1 %vm3337_vm5, %v5644_v35 }
 0x4d4   :  { %13542 = vmatpush3.msk.msra.mxu0 %vm3337_vm5, %v5721_v17 }
 0x4dc   :  { %v14105_v34 = vpop.eup %14104 }
 0x4dd   :  { %v14107_v38 = vpop.eup %14106  ;;  %v3330_v31 = vmul.f32 %v14105_v34, %v15202_v6 }
 0x4de   :  { %v3328_v39 = vmul.f32 %v14107_v38, %v15204_v21 }
 0x4df   :  { %13544 = vmatmul.mubr.msk.f32.vlgmr.msra.gmra.mxu0 %vm3333_vm7, %v3330_v31 }
 0x4e0   :  { %13539 = vmatmul.mubr.msk.f32.vlgmr.msra.gmra.mxu1 %vm3333_vm7, %v3328_v39 }
 0x4fa   :  { %v3406_v43 = vpop.f32.mrf.mxu1 }
 0x4fc   :  { %v13390_v30 = vpop.f32.mrf.mxu1 }
 0x4fe   :  { %v3483_v16 = vpop.f32.mrf.mxu0 }
 0x4ff   :  { %v3560_v50 = vpop.f32.mrf.mxu1  ;;  %v5805_v37 = vcombine.low %v3406_v43, %v3483_v16 }
 0x500   :  { %v13395_v15 = vpop.f32.mrf.mxu0 }
 0x501   :  { %v13400_v46 = vpop.f32.mrf.mxu1  ;;  %v5813_v56 = vrot.slane %v5805_v37, %v16760_v0 }
 0x537   :  { %v3637_v48 = vpop.f32.mrf.mxu0 }
 0x538   :  { %v5806_v24 = vcombine.low %v3560_v50, %v3637_v48  ;;  %v3714_v41 = vpop.f32.mrf.mxu1 }
 0x539   :  { %v13405_v28 = vpop.f32.mrf.mxu0 }
 0x53a   :  { %v5820_v6 = vrot.slane %v5806_v24, %v16760_v0  ;;  %v13410_v21 = vpop.f32.mrf.mxu1 }
 0x53b   :  { %v3791_v13 = vpop.f32.mrf.mxu0 }
 0x53c   :  { %v5821_v55 = vcombine.low %v5813_v56, %v5820_v6  ;;  %v3868_v45 = vpop.f32.mrf.mxu1  ;;  %v5822_v61 = vcombine.low %v3714_v41, %v3791_v13 }
 0x53d   :  { %v13415_v12 = vpop.f32.mrf.mxu0 }
 0x53e   :  { %5841 = vst.msk [vmem:[#allocation3] sm:$0xff] %vm516_vm4, %v5821_v55  ;;  %v13420_v20 = vpop.f32.mrf.mxu1  ;;  %v5830_v62 = vrot.slane %v5822_v61, %v16760_v0 }
 0x53f   :  { %v3945_v40 = vpop.f32.mrf.mxu0 }
 0x540   :  { %v5823_v27 = vcombine.low %v3868_v45, %v3945_v40 }
 0x541   :  { %v13425_v5 = vpop.f32.mrf.mxu0 }
 0x542   :  { %v5837_v57 = vrot.slane %v5823_v27, %v16760_v0 }
 0x544   :  { %v5838_v54 = vcombine.low %v5830_v62, %v5837_v57 }
 0x545   :  { %v4022_v19 = vpop.f32.mrf.mxu1 }
 0x546   :  { %5842 = vst.msk [vmem:[#allocation3 + $0x8] sm:$0xff] %vm516_vm4, %v5838_v54 }
 0x547   :  { %v13430_v10 = vpop.f32.mrf.mxu1 }
 0x549   :  { %v4099_v9 = vpop.f32.mrf.mxu0 }
 0x54a   :  { %v4176_v51 = vpop.f32.mrf.mxu1  ;;  %v5851_v36 = vcombine.low %v4022_v19, %v4099_v9 }
 0x54b   :  { %v13435_v25 = vpop.f32.mrf.mxu0 }
 0x54c   :  { %v13440_v2 = vpop.f32.mrf.mxu1  ;;  %v5859_v22 = vrot.slane %v5851_v36, %v16760_v0 }
 0x54d   :  { %v4253_v63 = vpop.f32.mrf.mxu0 }
 0x54e   :  { %v5852_v1 = vcombine.low %v4176_v51, %v4253_v63  ;;  %v4330_v4 = vpop.f32.mrf.mxu1  ;;  %v173_v63 = vld [vmem:[%s16712_s4 + $0x18] sm:$0xff] }
 0x54f   :  { %v13445_v60 = vpop.f32.mrf.mxu0  ;;  %13546 = vmatprep.subr.mxu1 %v173_v63 }
 0x550   :  { %v5866_v8 = vrot.slane %v5852_v1, %v16760_v0  ;;  %v13450_v26 = vpop.f32.mrf.mxu1  ;;  %v172_v1 = vld [vmem:[%s16712_s4 + $0x10] sm:$0xff]  ;;  %13547 = vmatpush3.msra.mxu1 %v173_v63 }
 0x551   :  { %v4407_v7 = vpop.f32.mrf.mxu0  ;;  %13548 = vmatprep.subr.mxu1 %v172_v1 }
 0x552   :  { %v5867_v49 = vcombine.low %v5859_v22, %v5866_v8  ;;  %v4484_v32 = vpop.f32.mrf.mxu1  ;;  %v5868_v33 = vcombine.low %v4330_v4, %v4407_v7  ;;  %v171_v4 = vld [vmem:[%s16712_s4 + $0x8] sm:$0xff]  ;;  %13549 = vmatpush3.msra.mxu1 %v172_v1  ;;  %v170_v8 = vld [vmem:[%s16712_s4] sm:$0xff] }
 0x553   :  { %v13455_v23 = vpop.f32.mrf.mxu0  ;;  %13550 = vmatprep.subr.mxu1 %v171_v4 }
 0x554   :  { %v13460_v47 = vpop.f32.mrf.mxu1  ;;  %5885 = vrot.lane.b32.xlu0 %v5867_v49, %s14266_s23  ;;  %v5876_v11 = vrot.slane %v5868_v33, %v16760_v0  ;;  %13551 = vmatpush3.msra.mxu1 %v171_v4 }
 0x555   :  { %v4561_v52 = vpop.f32.mrf.mxu0  ;;  %13552 = vmatprep.subr.mxu1 %v170_v8 }
 0x556   :  { %v5869_v14 = vcombine.low %v4484_v32, %v4561_v52  ;;  %v4638_v42 = vpop.f32.mrf.mxu1  ;;  %13553 = vmatpush3.msra.mxu1 %v170_v8 }
 0x557   :  { %v13465_v29 = vpop.f32.mrf.mxu0 }
 0x558   :  { %v5883_v18 = vrot.slane %v5869_v14, %v16760_v0  ;;  %v13470_v44 = vpop.f32.mrf.mxu1 }
 0x559   :  { %v4715_v3 = vpop.f32.mrf.mxu0 }
 0x55a   :  { %v5884_v58 = vcombine.low %v5876_v11, %v5883_v18  ;;  %v4792_v59 = vpop.f32.mrf.mxu1  ;;  %v5902_v17 = vcombine.low %v4638_v42, %v4715_v3 }
 0x55b   :  { %v13475_v35 = vpop.f32.mrf.mxu0 }
 0x55c   :  { %v13480_v34 = vpop.f32.mrf.mxu1  ;;  %5887 = vrot.lane.b32.xlu1 %v5884_v58, %s14266_s23  ;;  %v5910_v30 = vrot.slane %v5902_v17, %v16760_v0  ;;  %v16761_v58 = vld [vmem:[#allocation4_spill] sm:$0xff]  ;;  %v15453_v35 = vld [vmem:[%s16711_s7] sm:$0xff] }
 0x55d   :  { %v4869_v38 = vpop.f32.mrf.mxu0 }
 0x55e   :  { %v5903_v31 = vcombine.low %v4792_v59, %v4869_v38  ;;  %v4946_v39 = vpop.f32.mrf.mxu1  ;;  %v16732_v59 = vsub.s32 1, %v16761_v58 }
 0x55f   :  { %v13485_v43 = vpop.f32.mrf.mxu0 }
 0x560   :  { %v5917_v16 = vrot.slane %v5903_v31, %v16760_v0  ;;  %v13490_v50 = vpop.f32.mrf.mxu1  ;;  %v6001_v17 = vrot.slane %v15453_v35, %v16732_v59 }
 0x561   :  { %v5023_v15 = vpop.f32.mrf.mxu0 }
 0x562   :  { %v5918_v46 = vcombine.low %v5910_v30, %v5917_v16  ;;  %v5100_v37 = vpop.f32.mrf.mxu1  ;;  %v5919_v24 = vcombine.low %v4946_v39, %v5023_v15  ;;  %v16762_v39 = vld [vmem:[#allocation7_spill] sm:$0xff]  ;;  %v16763_v16 = vld [vmem:[#allocation6_spill] sm:$0xff] }
 0x563   :  { %v13495_v48 = vpop.f32.mrf.mxu0 }
 0x564   :  { %v13500_v41 = vpop.f32.mrf.mxu1  ;;  %5936 = vrot.lane.b32.xlu0 %v5918_v46, %s14267_s24  ;;  %v5927_v13 = vrot.slane %v5919_v24, %v16760_v0 }
 0x565   :  { %v5177_v28 = vpop.f32.mrf.mxu0 }
 0x566   :  { %v5920_v56 = vcombine.low %v5100_v37, %v5177_v28  ;;  %v5254_v6 = vpop.f32.mrf.mxu1 }
 0x567   :  { %v13505_v21 = vpop.f32.mrf.mxu0 }
 0x568   :  { %v5934_v55 = vrot.slane %v5920_v56, %v16760_v0  ;;  %v13510_v45 = vpop.f32.mrf.mxu1 }
 0x569   :  { %v5331_v12 = vpop.f32.mrf.mxu0  ;;  %v177_v45 = vld [vmem:[%s16713_s5 + $0x18] sm:$0xff] }
 0x56a   :  { %v5935_v61 = vcombine.low %v5927_v13, %v5934_v55  ;;  %v5408_v20 = vpop.f32.mrf.mxu1  ;;  %v5953_v5 = vcombine.low %v5254_v6, %v5331_v12  ;;  %v176_v12 = vld [vmem:[%s16713_s5 + $0x10] sm:$0xff]  ;;  %13557 = vmatprep.subr.mxu0 %v177_v45 }
 0x56b   :  { %v13515_v40 = vpop.f32.mrf.mxu0  ;;  %13558 = vmatpush3.msra.mxu0 %v177_v45  ;;  %v12731_v45 = vld [vmem:[%s16709_s3 + $0x30] sm:$0xff] }
 0x56c   :  { %v13520_v27 = vpop.f32.mrf.mxu1  ;;  %5938 = vrot.lane.b32.xlu1 %v5935_v61, %s14267_s24  ;;  %v5961_v10 = vrot.slane %v5953_v5, %v16760_v0  ;;  %v175_v61 = vld [vmem:[%s16713_s5 + $0x8] sm:$0xff]  ;;  %13559 = vmatprep.subr.mxu0 %v176_v12  ;;  %v185_v40 = vld [vmem:[%s16714_s6 + $0x38] sm:$0xff] }
 0x56d   :  { %13560 = vmatpush3.msra.mxu0 %v176_v12  ;;  %v184_v27 = vld [vmem:[%s16714_s6 + $0x30] sm:$0xff]  ;;  %13568 = vmatprep.subr.mxu1 %v185_v40  ;;  %v183_v5 = vld [vmem:[%s16714_s6 + $0x28] sm:$0xff] }
 0x56e   :  { %v5485_v62 = vpop.f32.mrf.mxu0  ;;  %13561 = vmatprep.subr.mxu0 %v175_v61  ;;  %v12730_v12 = vld [vmem:[%s16709_s3 + $0x28] sm:$0xff] }
 0x56f   :  { %v5954_v57 = vcombine.low %v5408_v20, %v5485_v62  ;;  %v5562_v54 = vpop.f32.mrf.mxu1  ;;  %13562 = vmatpush3.msra.mxu0 %v175_v61  ;;  %v174_v20 = vld [vmem:[%s16713_s5] sm:$0xff] }
 0x570   :  { %v13525_v19 = vpop.f32.mrf.mxu0  ;;  %13563 = vmatprep.subr.mxu0 %v174_v20  ;;  %v182_v62 = vld [vmem:[%s16714_s6 + $0x20] sm:$0xff] }
 0x571   :  { %v5968_v9 = vrot.slane %v5954_v57, %v16760_v0  ;;  %v13530_v51 = vpop.f32.mrf.mxu1  ;;  %13564 = vmatpush3.msra.mxu0 %v174_v20  ;;  %v12729_v61 = vld [vmem:[%s16709_s3 + $0x20] sm:$0xff] }
 0x572   :  { %v5639_v25 = vpop.f32.mrf.mxu0 }
 0x573   :  { %v5969_v36 = vcombine.low %v5961_v10, %v5968_v9  ;;  %v5970_v60 = vcombine.low %v5562_v54, %v5639_v25  ;;  %v16731_v25 = vsub.s32 2, %v16761_v58 }
 0x574   :  { %v13535_v2 = vpop.f32.mrf.mxu0 }
 0x575   :  { %5987 = vrot.lane.b32.xlu0 %v5969_v36, %s14268_s25  ;;  %v5978_v23 = vrot.slane %v5970_v60, %v16760_v0  ;;  %v16730_v36 = vsub.s32 3, %v16761_v58  ;;  %v6115_v2 = vrot.slane %v15453_v35, %v16731_v25 }
 0x577   :  { %v6121_v4 = vrot.slane %v15453_v35, %v16730_v36 }
 0x59f   :  { %v5793_v22 = vpop.f32.mrf.mxu0 }
 0x5a0   :  { %v5716_v26 = vpop.f32.mrf.mxu1 }
 0x5a1   :  { %v5971_v7 = vcombine.low %v5716_v26, %v5793_v22  ;;  %v13545_v49 = vpop.f32.mrf.mxu0 }
 0x5a2   :  { %v13540_v32 = vpop.f32.mrf.mxu1 }
 0x5a3   :  { %v5985_v33 = vrot.slane %v5971_v7, %v16760_v0  ;;  %v181_v32 = vld [vmem:[%s16714_s6 + $0x18] sm:$0xff] }
 0x5a5   :  { %v5986_v47 = vcombine.low %v5978_v23, %v5985_v33  ;;  %v180_v23 = vld [vmem:[%s16714_s6 + $0x10] sm:$0xff]  ;;  %v179_v33 = vld [vmem:[%s16714_s6 + $0x8] sm:$0xff] }
 0x5a7   :  { %5989 = vrot.lane.b32.xlu1 %v5986_v47, %s14268_s25  ;;  %v178_v47 = vld [vmem:[%s16714_s6] sm:$0xff] }
 0x5c6   :  { %v5886_v52 = vpop.permute.xlu0 %5885 }
 0x5c7   :  { %5892 = vst.msk [vmem:[#allocation3] sm:$0xff] %vm5891_vm8, %v5886_v52  ;;  %v16729_v52 = vsub.s32 6, %v16761_v58 }
 0x5ce   :  { %v5888_v14 = vpop.permute.xlu1 %5887 }
 0x5cf   :  { %5893 = vst.msk [vmem:[#allocation3 + $0x8] sm:$0xff] %vm5891_vm8, %v5888_v14  ;;  %v6127_v14 = vrot.slane %v15453_v35, %v16729_v52 }
 0x5d6   :  { %v5937_v42 = vpop.permute.xlu0 %5936 }
 0x5d7   :  { %5943 = vst.msk [vmem:[#allocation3] sm:$0xff] %vm5942_vm9, %v5937_v42 }
 0x5de   :  { %v5939_v29 = vpop.permute.xlu1 %5938 }
 0x5df   :  { %5944 = vst.msk [vmem:[#allocation3 + $0x8] sm:$0xff] %vm5942_vm9, %v5939_v29 }
 0x5e7   :  { %v5988_v11 = vpop.permute.xlu0 %5987 }
 0x5e8   :  { %5994 = vst.msk [vmem:[#allocation3] sm:$0xff] %vm5993_vm10, %v5988_v11 }
 0x5ef   :  { %v5996_v18 = vld [vmem:[#allocation3] sm:$0xff] }
 0x5f0   :  { %13554 = vmatprep.mubr.msk.f32.mxu1 %vm191_vm1, %v5996_v18 }
 0x619   :  { %v5990_v44 = vpop.permute.xlu1 %5989 }
 0x61a   :  { %5995 = vst.msk [vmem:[#allocation3 + $0x8] sm:$0xff] %vm5993_vm10, %v5990_v44 }
 0x621   :  { %v5997_v3 = vld [vmem:[#allocation3 + $0x8] sm:$0xff] }
 0x622   :  { %13555 = vmatmul.mubr.msk.f32.vlgmr.msra.gmra.mxu1 %vm191_vm1, %v5997_v3 }
 0x623   :  { %13569 = vmatpush3.msra.mxu1 %v185_v40 }
 0x624   :  { %13570 = vmatprep.subr.mxu1 %v184_v27 }
 0x625   :  { %13571 = vmatpush3.msra.mxu1 %v184_v27 }
 0x626   :  { %13572 = vmatprep.subr.mxu1 %v183_v5 }
 0x627   :  { %13573 = vmatpush3.msra.mxu1 %v183_v5 }
 0x628   :  { %13574 = vmatprep.subr.mxu1 %v182_v62 }
 0x629   :  { %13575 = vmatpush3.msra.mxu1 %v182_v62 }
 0x62a   :  { %13576 = vmatprep.subr.mxu1 %v181_v32 }
 0x62b   :  { %13577 = vmatpush3.msra.mxu1 %v181_v32 }
 0x62c   :  { %13578 = vmatprep.subr.mxu1 %v180_v23 }
 0x62d   :  { %13579 = vmatpush3.msra.mxu1 %v180_v23 }
 0x62e   :  { %13580 = vmatprep.subr.mxu1 %v179_v33 }
 0x62f   :  { %13581 = vmatpush3.msra.mxu1 %v179_v33 }
 0x630   :  { %13582 = vmatprep.subr.mxu1 %v178_v47 }
 0x631   :  { %13583 = vmatpush3.msra.mxu1 %v178_v47 }
 0x632   :  { %13608 = vmatprep.subr.mxu1 %v16750_v53 }
 0x6e2   :  { %v13556_v34 = vpop.f32.mrf.mxu1 }
 0x6e3   :  { %v6080_v38 = vadd.f32 %v13556_v34, %v6001_v17 }
 0x6e4   :  { %v6074_v31 = vpop.f32.mrf.mxu1 }
 0x6e5   :  { %v6084_v43 = vadd.f32 %v6080_v38, %v16762_v39  ;;  %v6075_v30 = vadd.f32 %v6074_v31, %v6001_v17  ;;  %v16728_v17 = vsub.s32 7, %v16761_v58 }
 0x6e7   :  { %v6083_v50 = vadd.f32 %v6075_v30, %v16763_v16  ;;  %v6088_v15 = vsel %vm191_vm1, %v6084_v43, 0.0  ;;  %v6214_v34 = vrot.slane %v15453_v35, %v16728_v17 }
 0x6e8   :  { %6089 = vadd.xlane.f32.xlu1 %v6088_v15 }
 0x6e9   :  { %v6085_v46 = vsel %vm191_vm1, %v6083_v50, 0.0 }
 0x6ea   :  { %6086 = vadd.xlane.f32.xlu0 %v6085_v46 }
 0x771   :  { %v6090_v37 = vpop.xlane.xlu1 %6089 }
 0x772   :  { %v6093_v48 = vmul.f32 0.03125, %v6090_v37 }
 0x773   :  { %v6087_v24 = vpop.xlane.xlu0 %6086 }
 0x774   :  { %v6092_v41 = vmul.f32 0.03125, %v6087_v24  ;;  %v6095_v28 = vsub.f32 %v6084_v43, %v6093_v48 }
 0x776   :  { %v6094_v56 = vsub.f32 %v6083_v50, %v6092_v41  ;;  %v6097_v13 = vmul.f32 %v6095_v28, %v6095_v28 }
 0x778   :  { %v6096_v6 = vmul.f32 %v6094_v56, %v6094_v56  ;;  %v6101_v55 = vsel %vm191_vm1, %v6097_v13, 0.0 }
 0x77a   :  { %v6098_v21 = vsel %vm191_vm1, %v6096_v6, 0.0 }
 0x77b   :  { %6099 = vadd.xlane.f32.xlu0 %v6098_v21 }
 0x77f   :  { %6102 = vadd.xlane.f32.xlu0 %v6101_v55  ;;  %v12732_v55 = vld [vmem:[%s16709_s3 + $0x38] sm:$0xff] }
 0x780   :  { %13587 = vmatprep.subr.mxu0 %v12732_v55 }
 0x804   :  { %v6100_v57 = vpop.xlane.xlu0 %6099 }
 0x805   :  { %v6104_v54 = vmul.f32 0.03125, %v6100_v57 }
 0x807   :  { %v6106_v19 = vadd.f32 1e-05, %v6104_v54  ;;  %v16727_v54 = vsub.s32 4, %v16761_v58 }
 0x808   :  { %v6103_v10 = vpop.xlane.xlu0 %6102 }
 0x809   :  { %14108 = vrsqrt.f32 %v6106_v19  ;;  %v6105_v9 = vmul.f32 0.03125, %v6103_v10  ;;  %v6328_v10 = vrot.slane %v15453_v35, %v16727_v54 }
 0x80b   :  { %v6107_v51 = vadd.f32 1e-05, %v6105_v9  ;;  %v16726_v9 = vsub.s32 5, %v16761_v58 }
 0x80d   :  { %14110 = vrsqrt.f32 %v6107_v51 }
 0x816   :  { %v14109_v63 = vpop.eup %14108 }
 0x817   :  { %v6110_v1 = vmul.f32 %v14109_v63, %v6094_v56 }
 0x819   :  { %v6116_v60 = vmul.f32 %v6115_v2, %v6110_v1 }
 0x81a   :  { %v14111_v22 = vpop.eup %14110 }
 0x81b   :  { %v6111_v8 = vmul.f32 %v14111_v22, %v6095_v28  ;;  %v6122_v26 = vadd.f32 %v6121_v4, %v6116_v60 }
 0x81d   :  { %v6117_v7 = vmul.f32 %v6115_v2, %v6111_v8  ;;  %13565 = vmatprep.mubr.msk.f32.mxu0 %vm191_vm1, %v6122_v26 }
 0x81f   :  { %v6123_v49 = vadd.f32 %v6121_v4, %v6117_v7  ;;  %v6334_v4 = vrot.slane %v15453_v35, %v16726_v9  ;;  %v16766_v35 = vsub.s32 0, %v16761_v58 }
 0x821   :  { %13566 = vmatmul.mubr.msk.f32.vlgmr.msra.gmra.mxu0 %vm191_vm1, %v6123_v49 }
 0x822   :  { %13588 = vmatpush3.msra.mxu0 %v12732_v55 }
 0x823   :  { %13589 = vmatprep.subr.mxu0 %v12731_v45 }
 0x824   :  { %13590 = vmatpush3.msra.mxu0 %v12731_v45 }
 0x825   :  { %13591 = vmatprep.subr.mxu0 %v12730_v12 }
 0x826   :  { %13592 = vmatpush3.msra.mxu0 %v12730_v12 }
 0x827   :  { %13593 = vmatprep.subr.mxu0 %v12729_v61 }
 0x828   :  { %13594 = vmatpush3.msra.mxu0 %v12729_v61 }
 0x829   :  { %13598 = vmatprep.subr.mxu0 %v16750_v53 }
 0x8e1   :  { %v13567_v42 = vpop.f32.mrf.mxu0 }
 0x8e2   :  { %v6206_v29 = vadd.f32 %v13567_v42, %v6127_v14 }
 0x8e3   :  { %v6200_v11 = vpop.f32.mrf.mxu0 }
 0x8e4   :  { %v6201_v18 = vadd.f32 %v6200_v11, %v6127_v14  ;;  %v6210_v3 = vmax.f32 %v6206_v29, 0.0 }
 0x8e6   :  { %v6209_v44 = vmax.f32 %v6201_v18, 0.0 }
 0x8e8   :  { %13584 = vmatprep.mubr.msk.f32.mxu1 %vm6215_vm11, %v6209_v44 }
 0x8e9   :  { %13585 = vmatmul.mubr.msk.f32.vlgmr.msra.gmra.mxu1 %vm6215_vm11, %v6210_v3 }
 0x8ea   :  { %13610 = vmatprep.mubr.msk.f32.mxu1 %vm14263_vm3, %v16750_v53 }
 0x9a9   :  { %v13586_v38 = vpop.f32.mrf.mxu1 }
 0x9aa   :  { %v6294_v31 = vadd.f32 %v13586_v38, %v6214_v34 }
 0x9ab   :  { %v6288_v39 = vpop.f32.mrf.mxu1 }
 0x9ac   :  { %v6298_v43 = vadd.f32 %v6294_v31, %v6123_v49  ;;  %v6289_v30 = vadd.f32 %v6288_v39, %v6214_v34 }
 0x9ae   :  { %v6297_v16 = vadd.f32 %v6289_v30, %v6122_v26  ;;  %v6302_v50 = vsel %vm191_vm1, %v6298_v43, 0.0  ;;  %v12749_v26 = vld [vmem:[%s16711_s7 + $0x8] sm:$0xff] }
 0x9af   :  { %6303 = vadd.xlane.f32.xlu0 %v6302_v50  ;;  %v6366_v7 = vrot.slane %v12749_v26, %v16766_v35 }
 0x9b0   :  { %v6299_v15 = vsel %vm191_vm1, %v6297_v16, 0.0 }
 0x9b1   :  { %6300 = vadd.xlane.f32.xlu1 %v6299_v15 }
 0xa38   :  { %v6304_v46 = vpop.xlane.xlu0 %6303 }
 0xa39   :  { %v6306_v37 = vmul.f32 0.03125, %v6304_v46 }
 0xa3a   :  { %v6301_v48 = vpop.xlane.xlu1 %6300 }
 0xa3b   :  { %v6308_v24 = vsub.f32 %v6298_v43, %v6306_v37  ;;  %v6305_v41 = vmul.f32 0.03125, %v6301_v48 }
 0xa3d   :  { %v6307_v28 = vsub.f32 %v6297_v16, %v6305_v41  ;;  %v6310_v56 = vmul.f32 %v6308_v24, %v6308_v24 }
 0xa3f   :  { %v6314_v6 = vsel %vm191_vm1, %v6310_v56, 0.0  ;;  %v6309_v21 = vmul.f32 %v6307_v28, %v6307_v28 }
 0xa40   :  { %6315 = vadd.xlane.f32.xlu0 %v6314_v6 }
 0xa41   :  { %v6311_v13 = vsel %vm191_vm1, %v6309_v21, 0.0 }
 0xa42   :  { %6312 = vadd.xlane.f32.xlu1 %v6311_v13 }
 0xac9   :  { %v6316_v20 = vpop.xlane.xlu0 %6315 }
 0xaca   :  { %v6318_v40 = vmul.f32 0.03125, %v6316_v20 }
 0xacb   :  { %v6313_v27 = vpop.xlane.xlu1 %6312 }
 0xacc   :  { %v6320_v5 = vadd.f32 1e-05, %v6318_v40  ;;  %v6317_v62 = vmul.f32 0.03125, %v6313_v27 }
 0xace   :  { %14112 = vrsqrt.f32 %v6320_v5  ;;  %v6319_v57 = vadd.f32 1e-05, %v6317_v62 }
 0xad0   :  { %14114 = vrsqrt.f32 %v6319_v57 }
 0xadb   :  { %v14113_v19 = vpop.eup %14112 }
 0xadc   :  { %v6324_v51 = vmul.f32 %v14113_v19, %v6308_v24 }
 0xadd   :  { %v14115_v2 = vpop.eup %14114 }
 0xade   :  { %v6323_v63 = vmul.f32 %v14115_v2, %v6307_v28  ;;  %v6330_v1 = vmul.f32 %v6328_v10, %v6324_v51 }
 0xae0   :  { %v6329_v60 = vmul.f32 %v6328_v10, %v6323_v63  ;;  %v15550_v8 = vadd.f32 %v6334_v4, %v6330_v1 }
 0xae2   :  { %v15548_v22 = vadd.f32 %v6334_v4, %v6329_v60  ;;  %16765 = vst [vmem:[#allocation9_spill] sm:$0xff] %v15550_v8 }
 0xae4   :  { %16764 = vst [vmem:[#allocation15_spill] sm:$0xff] %v15548_v22  ;;  %13595 = vmatprep.mubr.msk.f32.mxu0 %vm191_vm1, %v15548_v22 }
 0xae5   :  { %13596 = vmatmul.mubr.msk.f32.vlgmr.msra.gmra.mxu0 %vm191_vm1, %v15550_v8 }
 0xae6   :  { %13600 = vmatprep.mubr.msk.f32.mxu0 %vm14263_vm3, %v16750_v53 }
 0xba5   :  { %v13597_v49 = vpop.f32.mrf.mxu0 }
 0xba6   :  { %v6445_v32 = vadd.f32 %v13597_v49, %v6366_v7 }
 0xba7   :  { %v6439_v23 = vpop.f32.mrf.mxu0 }
 0xba8   :  { %v6467_v33 = vcombine.high %v6445_v32, %v6445_v32  ;;  %v6474_v47 = vrot.slane %v6445_v32, %v16760_v0  ;;  %v6440_v14 = vadd.f32 %v6439_v23, %v6366_v7 }
 0xbaa   :  { %v6481_v42 = vrot.slane %v6467_v33, %v16760_v0  ;;  %v6482_v29 = vcombine.high %v6474_v47, %v6474_v47  ;;  %6496 = vst.msk [vmem:[#allocation2 + $0x8] sm:$0x3] %vm317_vm2, %v6474_v47  ;;  %v6450_v11 = vcombine.high %v6440_v14, %v6440_v14  ;;  %v6457_v18 = vrot.slane %v6440_v14, %v16760_v0 }
 0xbab   :  { %v6534_v30 = vrot.slane %v6474_v47, %v16760_v0 }
 0xbac   :  { %v6483_v44 = vcombine.high %v6481_v42, %v6481_v42  ;;  %6497 = vst.msk [vmem:[#allocation2 + $0xa] sm:$0x3] %vm317_vm2, %v6482_v29  ;;  %6498 = vst.msk [vmem:[#allocation2 + $0xc] sm:$0x3] %vm317_vm2, %v6481_v42  ;;  %v6464_v3 = vrot.slane %v6450_v11, %v16760_v0  ;;  %v6465_v34 = vcombine.high %v6457_v18, %v6457_v18 }
 0xbad   :  { %6492 = vst.msk [vmem:[#allocation2] sm:$0x3] %vm317_vm2, %v6457_v18  ;;  %v6506_v38 = vrot.slane %v6457_v18, %v16760_v0  ;;  %v6548_v50 = vrot.slane %v6481_v42, %v16760_v0  ;;  %v6541_v15 = vrot.slane %v6482_v29, %v16760_v0 }
 0xbae   :  { %6499 = vst.msk [vmem:[#allocation2 + $0xe] sm:$0x3] %vm317_vm2, %v6483_v44  ;;  %v6466_v31 = vcombine.high %v6464_v3, %v6464_v3  ;;  %6494 = vst.msk [vmem:[#allocation2 + $0x4] sm:$0x3] %vm317_vm2, %v6464_v3  ;;  %v6513_v39 = vrot.slane %v6465_v34, %v16760_v0  ;;  %v6520_v43 = vrot.slane %v6464_v3, %v16760_v0 }
 0xbaf   :  { %6493 = vst.msk [vmem:[#allocation2 + $0x2] sm:$0x3] %vm317_vm2, %v6465_v34  ;;  %6556 = vrot.lane.b32.xlu1 %v6506_v38, %s14259_s2  ;;  %v6555_v46 = vrot.slane %v6483_v44, %v16760_v0 }
 0xbb0   :  { %6495 = vst.msk [vmem:[#allocation2 + $0x6] sm:$0x3] %vm317_vm2, %v6466_v31  ;;  %6558 = vrot.lane.b32.xlu0 %v6513_v39, %s14259_s2  ;;  %v6527_v16 = vrot.slane %v6466_v31, %v16760_v0 }
 0xbb1   :  { %v15619_v41 = vld [vmem:[#allocation2 + $0x8] sm:$0x3] }
 0xbb3   :  { %6560 = vrot.lane.b32.xlu1 %v6520_v43, %s14259_s2  ;;  %v15627_v56 = vld [vmem:[#allocation2 + $0xc] sm:$0x3]  ;;  %v15631_v6 = vld [vmem:[#allocation2 + $0xa] sm:$0x3] }
 0xbb4   :  { %6564 = vrot.lane.b32.xlu0 %v6534_v30, %s14259_s2  ;;  %v15606_v37 = vld [vmem:[#allocation2] sm:$0x3] }
 0xbb5   :  { %v15611_v48 = vld [vmem:[#allocation2 + $0x4] sm:$0x3]  ;;  %v15635_v21 = vld [vmem:[#allocation2 + $0xe] sm:$0x3] }
 0xbb6   :  { %v15615_v24 = vld [vmem:[#allocation2 + $0x2] sm:$0x3] }
 0xbb7   :  { %6562 = vrot.lane.b32.xlu1 %v6527_v16, %s14259_s2  ;;  %v15623_v28 = vld [vmem:[#allocation2 + $0x6] sm:$0x3] }
 0xbb8   :  { %6568 = vrot.lane.b32.xlu0 %v6548_v50, %s14259_s2 }
 0xbbb   :  { %6566 = vrot.lane.b32.xlu1 %v6541_v15, %s14259_s2 }
 0xbbc   :  { %6588 = vrot.lane.b32.xlu0 %v6506_v38, %s14260_s20 }
 0xbbf   :  { %6570 = vrot.lane.b32.xlu1 %v6555_v46, %s14259_s2 }
 0xbc0   :  { %6592 = vrot.lane.b32.xlu0 %v6520_v43, %s14260_s20 }
 0xbc3   :  { %6590 = vrot.lane.b32.xlu1 %v6513_v39, %s14260_s20 }
 0xbc4   :  { %6596 = vrot.lane.b32.xlu0 %v6534_v30, %s14260_s20 }
 0xbc7   :  { %6594 = vrot.lane.b32.xlu1 %v6527_v16, %s14260_s20 }
 0xbc8   :  { %6600 = vrot.lane.b32.xlu0 %v6548_v50, %s14260_s20 }
 0xbcb   :  { %6598 = vrot.lane.b32.xlu1 %v6541_v15, %s14260_s20 }
 0xbcc   :  { %6620 = vrot.lane.b32.xlu0 %v6506_v38, %s14261_s1 }
 0xbcf   :  { %6602 = vrot.lane.b32.xlu1 %v6555_v46, %s14260_s20 }
 0xbd0   :  { %6624 = vrot.lane.b32.xlu0 %v6520_v43, %s14261_s1 }
 0xbd3   :  { %6622 = vrot.lane.b32.xlu1 %v6513_v39, %s14261_s1 }
 0xbd4   :  { %6628 = vrot.lane.b32.xlu0 %v6534_v30, %s14261_s1 }
 0xbd7   :  { %6626 = vrot.lane.b32.xlu1 %v6527_v16, %s14261_s1 }
 0xbd8   :  { %6632 = vrot.lane.b32.xlu0 %v6548_v50, %s14261_s1 }
 0xbdb   :  { %6630 = vrot.lane.b32.xlu1 %v6541_v15, %s14261_s1 }
 0xbdc   :  { %6685 = vrot.lane.b32.xlu0 %v15606_v37, %s14264_s21 }
 0xbdf   :  { %6634 = vrot.lane.b32.xlu1 %v6555_v46, %s14261_s1 }
 0xbe0   :  { %6839 = vrot.lane.b32.xlu0 %v15611_v48, %s14264_s21 }
 0xbe3   :  { %6762 = vrot.lane.b32.xlu1 %v15615_v24, %s14264_s21 }
 0xbe4   :  { %6993 = vrot.lane.b32.xlu0 %v15619_v41, %s14264_s21 }
 0xbe7   :  { %6916 = vrot.lane.b32.xlu1 %v15623_v28, %s14264_s21 }
 0xbe8   :  { %7147 = vrot.lane.b32.xlu0 %v15627_v56, %s14264_s21 }
 0xbeb   :  { %7070 = vrot.lane.b32.xlu1 %v15631_v6, %s14264_s21 }
 0xbef   :  { %7224 = vrot.lane.b32.xlu1 %v15635_v21, %s14264_s21 }
 0xc21   :  { %v6557_v13 = vpop.permute.xlu1 %6556 }
 0xc22   :  { %6580 = vst.msk [vmem:[#allocation2 + $0x10] sm:$0x3] %vm317_vm2, %v6557_v13  ;;  %v6559_v55 = vpop.permute.xlu0 %6558 }
 0xc23   :  { %6581 = vst.msk [vmem:[#allocation2 + $0x12] sm:$0x3] %vm317_vm2, %v6559_v55 }
 0xc25   :  { %v6561_v45 = vpop.permute.xlu1 %6560 }
 0xc26   :  { %6582 = vst.msk [vmem:[#allocation2 + $0x14] sm:$0x3] %vm317_vm2, %v6561_v45  ;;  %v6565_v12 = vpop.permute.xlu0 %6564 }
 0xc27   :  { %6584 = vst.msk [vmem:[#allocation2 + $0x18] sm:$0x3] %vm317_vm2, %v6565_v12 }
 0xc29   :  { %v6563_v61 = vpop.permute.xlu1 %6562  ;;  %v15643_v20 = vld [vmem:[#allocation2 + $0x10] sm:$0x3] }
 0xc2a   :  { %6583 = vst.msk [vmem:[#allocation2 + $0x16] sm:$0x3] %vm317_vm2, %v6563_v61  ;;  %7301 = vrot.lane.b32.xlu0 %v15643_v20, %s14264_s21  ;;  %v6569_v40 = vpop.permute.xlu0 %6568  ;;  %v15648_v27 = vld [vmem:[#allocation2 + $0x12] sm:$0x3] }
 0xc2b   :  { %6586 = vst.msk [vmem:[#allocation2 + $0x1c] sm:$0x3] %vm317_vm2, %v6569_v40  ;;  %7378 = vrot.lane.b32.xlu1 %v15648_v27, %s14264_s21 }
 0xc2d   :  { %v6567_v5 = vpop.permute.xlu1 %6566  ;;  %v15653_v62 = vld [vmem:[#allocation2 + $0x14] sm:$0x3] }
 0xc2e   :  { %6585 = vst.msk [vmem:[#allocation2 + $0x1a] sm:$0x3] %vm317_vm2, %v6567_v5  ;;  %7455 = vrot.lane.b32.xlu0 %v15653_v62, %s14264_s21  ;;  %v6589_v57 = vpop.permute.xlu0 %6588  ;;  %v15659_v10 = vld [vmem:[#allocation2 + $0x18] sm:$0x3] }
 0xc2f   :  { %6612 = vst.msk [vmem:[#allocation2 + $0x20] sm:$0x3] %vm317_vm2, %v6589_v57 }
 0xc31   :  { %v6571_v19 = vpop.permute.xlu1 %6570  ;;  %v15661_v51 = vld [vmem:[#allocation2 + $0x16] sm:$0x3] }
 0xc32   :  { %6587 = vst.msk [vmem:[#allocation2 + $0x1e] sm:$0x3] %vm317_vm2, %v6571_v19  ;;  %7609 = vrot.lane.b32.xlu0 %v15659_v10, %s14264_s21  ;;  %7532 = vrot.lane.b32.xlu1 %v15661_v51, %s14264_s21  ;;  %v6593_v2 = vpop.permute.xlu0 %6592  ;;  %v15669_v1 = vld [vmem:[#allocation2 + $0x1c] sm:$0x3] }
 0xc33   :  { %6614 = vst.msk [vmem:[#allocation2 + $0x24] sm:$0x3] %vm317_vm2, %v6593_v2 }
 0xc35   :  { %v6591_v63 = vpop.permute.xlu1 %6590  ;;  %v15671_v4 = vld [vmem:[#allocation2 + $0x1a] sm:$0x3] }
 0xc36   :  { %6613 = vst.msk [vmem:[#allocation2 + $0x22] sm:$0x3] %vm317_vm2, %v6591_v63  ;;  %7763 = vrot.lane.b32.xlu0 %v15669_v1, %s14264_s21  ;;  %7686 = vrot.lane.b32.xlu1 %v15671_v4, %s14264_s21  ;;  %v6597_v60 = vpop.permute.xlu0 %6596  ;;  %v15679_v35 = vld [vmem:[#allocation2 + $0x20] sm:$0x3] }
 0xc37   :  { %6616 = vst.msk [vmem:[#allocation2 + $0x28] sm:$0x3] %vm317_vm2, %v6597_v60 }
 0xc39   :  { %v6595_v26 = vpop.permute.xlu1 %6594  ;;  %v15681_v7 = vld [vmem:[#allocation2 + $0x1e] sm:$0x3] }
 0xc3a   :  { %6615 = vst.msk [vmem:[#allocation2 + $0x26] sm:$0x3] %vm317_vm2, %v6595_v26  ;;  %7917 = vrot.lane.b32.xlu0 %v15679_v35, %s14264_s21  ;;  %7840 = vrot.lane.b32.xlu1 %v15681_v7, %s14264_s21  ;;  %v6601_v49 = vpop.permute.xlu0 %6600  ;;  %v15689_v23 = vld [vmem:[#allocation2 + $0x24] sm:$0x3] }
 0xc3b   :  { %6618 = vst.msk [vmem:[#allocation2 + $0x2c] sm:$0x3] %vm317_vm2, %v6601_v49 }
 0xc3d   :  { %v6599_v32 = vpop.permute.xlu1 %6598  ;;  %v15691_v33 = vld [vmem:[#allocation2 + $0x22] sm:$0x3] }
 0xc3e   :  { %6617 = vst.msk [vmem:[#allocation2 + $0x2a] sm:$0x3] %vm317_vm2, %v6599_v32  ;;  %8071 = vrot.lane.b32.xlu0 %v15689_v23, %s14264_s21  ;;  %7994 = vrot.lane.b32.xlu1 %v15691_v33, %s14264_s21  ;;  %v6621_v47 = vpop.permute.xlu0 %6620  ;;  %v15699_v42 = vld [vmem:[#allocation2 + $0x28] sm:$0x3] }
 0xc3f   :  { %6644 = vst.msk [vmem:[#allocation2 + $0x30] sm:$0x3] %vm317_vm2, %v6621_v47 }
 0xc41   :  { %v6603_v14 = vpop.permute.xlu1 %6602  ;;  %v15701_v29 = vld [vmem:[#allocation2 + $0x26] sm:$0x3] }
 0xc42   :  { %6619 = vst.msk [vmem:[#allocation2 + $0x2e] sm:$0x3] %vm317_vm2, %v6603_v14  ;;  %8225 = vrot.lane.b32.xlu0 %v15699_v42, %s14264_s21  ;;  %8148 = vrot.lane.b32.xlu1 %v15701_v29, %s14264_s21  ;;  %v6625_v11 = vpop.permute.xlu0 %6624  ;;  %v15709_v44 = vld [vmem:[#allocation2 + $0x2c] sm:$0x3] }
 0xc43   :  { %6646 = vst.msk [vmem:[#allocation2 + $0x34] sm:$0x3] %vm317_vm2, %v6625_v11 }
 0xc45   :  { %v6623_v18 = vpop.permute.xlu1 %6622  ;;  %v15711_v3 = vld [vmem:[#allocation2 + $0x2a] sm:$0x3] }
 0xc46   :  { %6645 = vst.msk [vmem:[#allocation2 + $0x32] sm:$0x3] %vm317_vm2, %v6623_v18  ;;  %8379 = vrot.lane.b32.xlu0 %v15709_v44, %s14264_s21  ;;  %8302 = vrot.lane.b32.xlu1 %v15711_v3, %s14264_s21  ;;  %v6629_v34 = vpop.permute.xlu0 %6628  ;;  %v15719_v31 = vld [vmem:[#allocation2 + $0x30] sm:$0x3] }
 0xc47   :  { %6648 = vst.msk [vmem:[#allocation2 + $0x38] sm:$0x3] %vm317_vm2, %v6629_v34 }
 0xc49   :  { %v6627_v38 = vpop.permute.xlu1 %6626  ;;  %v15721_v39 = vld [vmem:[#allocation2 + $0x2e] sm:$0x3] }
 0xc4a   :  { %6647 = vst.msk [vmem:[#allocation2 + $0x36] sm:$0x3] %vm317_vm2, %v6627_v38  ;;  %8533 = vrot.lane.b32.xlu0 %v15719_v31, %s14264_s21  ;;  %8456 = vrot.lane.b32.xlu1 %v15721_v39, %s14264_s21  ;;  %v6633_v43 = vpop.permute.xlu0 %6632  ;;  %v15729_v16 = vld [vmem:[#allocation2 + $0x34] sm:$0x3] }
 0xc4b   :  { %6650 = vst.msk [vmem:[#allocation2 + $0x3c] sm:$0x3] %vm317_vm2, %v6633_v43 }
 0xc4d   :  { %v6631_v30 = vpop.permute.xlu1 %6630  ;;  %v15731_v50 = vld [vmem:[#allocation2 + $0x32] sm:$0x3] }
 0xc4e   :  { %6649 = vst.msk [vmem:[#allocation2 + $0x3a] sm:$0x3] %vm317_vm2, %v6631_v30  ;;  %8687 = vrot.lane.b32.xlu0 %v15729_v16, %s14264_s21  ;;  %8610 = vrot.lane.b32.xlu1 %v15731_v50, %s14264_s21  ;;  %v6686_v15 = vpop.permute.xlu0 %6685  ;;  %v15739_v13 = vld [vmem:[#allocation2 + $0x38] sm:$0x3] }
 0xc4f   :  { %13599 = vmatpush3.xpose.msk.msra.mxu0 %vm516_vm4, %v6686_v15 }
 0xc50   :  { %13603 = vmatprep.subr.mxu0 %v16750_v53 }
 0xc51   :  { %v6635_v46 = vpop.permute.xlu1 %6634  ;;  %v15741_v55 = vld [vmem:[#allocation2 + $0x36] sm:$0x3] }
 0xc52   :  { %6651 = vst.msk [vmem:[#allocation2 + $0x3e] sm:$0x3] %vm317_vm2, %v6635_v46  ;;  %8841 = vrot.lane.b32.xlu0 %v15739_v13, %s14264_s21  ;;  %8764 = vrot.lane.b32.xlu1 %v15741_v55, %s14264_s21  ;;  %v6840_v45 = vpop.permute.xlu0 %6839  ;;  %v15754_v61 = vld [vmem:[#allocation2 + $0x3c] sm:$0x3] }
 0xc53   :  { %13601 = vmatmul.mubr.msk.f32.vlgmr.msra.gmra.mxu0 %vm516_vm4, %v15606_v37  ;;  %13609 = vmatpush3.xpose.msk.msra.mxu1 %vm516_vm4, %v6840_v45 }
 0xc54   :  { %13605 = vmatprep.mubr.msk.f32.mxu0 %vm14263_vm3, %v16750_v53  ;;  %13618 = vmatprep.subr.mxu1 %v16750_v53 }
 0xc55   :  { %v6763_v12 = vpop.permute.xlu1 %6762  ;;  %v15756_v40 = vld [vmem:[#allocation2 + $0x3a] sm:$0x3] }
 0xc56   :  { %8995 = vrot.lane.b32.xlu0 %v15754_v61, %s14264_s21  ;;  %13604 = vmatpush3.xpose.msk.msra.mxu0 %vm516_vm4, %v6763_v12  ;;  %v6994_v5 = vpop.permute.xlu0 %6993 }
 0xc57   :  { %8918 = vrot.lane.b32.xlu1 %v15756_v40, %s14264_s21  ;;  %13611 = vmatmul.mubr.msk.f32.vlgmr.msra.gmra.mxu1 %vm516_vm4, %v15611_v48 }
 0xc58   :  { %13619 = vmatpush3.xpose.msk.msra.mxu1 %vm516_vm4, %v6994_v5  ;;  %13613 = vmatprep.subr.mxu0 %v16750_v53 }
 0xc59   :  { %13606 = vmatmul.mubr.msk.f32.vlgmr.msra.gmra.mxu0 %vm516_vm4, %v15615_v24  ;;  %v6917_v57 = vpop.permute.xlu1 %6916  ;;  %13620 = vmatprep.mubr.msk.f32.mxu1 %vm14263_vm3, %v16750_v53  ;;  %v15772_v19 = vld [vmem:[#allocation2 + $0x3e] sm:$0x3] }
 0xc5a   :  { %9577 = vrot.lane.b32.xlu0 %v15615_v24, %s14265_s22  ;;  %13614 = vmatpush3.xpose.msk.msra.mxu0 %vm516_vm4, %v6917_v57  ;;  %v7148_v2 = vpop.permute.xlu0 %7147 }
 0xc5b   :  { %9072 = vrot.lane.b32.xlu1 %v15772_v19, %s14264_s21  ;;  %13621 = vmatmul.mubr.msk.f32.vlgmr.msra.gmra.mxu1 %vm516_vm4, %v15619_v41 }
 0xc5c   :  { %13628 = vmatprep.subr.mxu1 %v16750_v53  ;;  %13615 = vmatprep.mubr.msk.f32.mxu0 %vm14263_vm3, %v16750_v53 }
 0xc5d   :  { %13629 = vmatpush3.xpose.msk.msra.mxu1 %vm516_vm4, %v7148_v2  ;;  %13616 = vmatmul.mubr.msk.f32.vlgmr.msra.gmra.mxu0 %vm516_vm4, %v15623_v28  ;;  %v7071_v24 = vpop.permute.xlu1 %7070 }
 0xc5e   :  { %13623 = vmatprep.subr.mxu0 %v16750_v53  ;;  %13630 = vmatprep.mubr.msk.f32.mxu1 %vm14263_vm3, %v16750_v53 }
 0xc5f   :  { %9731 = vrot.lane.b32.xlu0 %v15623_v28, %s14265_s22  ;;  %9500 = vrot.lane.b32.xlu1 %v15606_v37, %s14265_s22 }
 0xc60   :  { %13624 = vmatpush3.xpose.msk.msra.mxu0 %vm516_vm4, %v7071_v24  ;;  %13631 = vmatmul.mubr.msk.f32.vlgmr.msra.gmra.mxu1 %vm516_vm4, %v15627_v56 }
 0xc61   :  { %13625 = vmatprep.mubr.msk.f32.mxu0 %vm14263_vm3, %v16750_v53  ;;  %13633 = vmatprep.subr.mxu0 %v16750_v53  ;;  %v7225_v63 = vpop.permute.xlu1 %7224 }
 0xc62   :  { %13638 = vmatprep.subr.mxu1 %v16750_v53  ;;  %13640 = vmatprep.mubr.msk.f32.mxu1 %vm14263_vm3, %v16750_v53 }
 0xc63   :  { %13626 = vmatmul.mubr.msk.f32.vlgmr.msra.gmra.mxu0 %vm516_vm4, %v15631_v6  ;;  %9885 = vrot.lane.b32.xlu0 %v15631_v6, %s14265_s22 }
 0xc64   :  { %9654 = vrot.lane.b32.xlu1 %v15611_v48, %s14265_s22  ;;  %13634 = vmatpush3.xpose.msk.msra.mxu0 %vm516_vm4, %v7225_v63 }
 0xc65   :  { %13635 = vmatprep.mubr.msk.f32.mxu0 %vm14263_vm3, %v16750_v53  ;;  %13643 = vmatprep.subr.mxu0 %v16750_v53 }
 0xc67   :  { %13636 = vmatmul.mubr.msk.f32.vlgmr.msra.gmra.mxu0 %vm516_vm4, %v15635_v21  ;;  %10039 = vrot.lane.b32.xlu0 %v15635_v21, %s14265_s22 }
 0xc68   :  { %9808 = vrot.lane.b32.xlu1 %v15619_v41, %s14265_s22  ;;  %13645 = vmatprep.mubr.msk.f32.mxu0 %vm14263_vm3, %v16750_v53 }
 0xc6b   :  { %10193 = vrot.lane.b32.xlu0 %v15648_v27, %s14265_s22 }
 0xc6c   :  { %9962 = vrot.lane.b32.xlu1 %v15627_v56, %s14265_s22 }
 0xc6f   :  { %10501 = vrot.lane.b32.xlu0 %v15671_v4, %s14265_s22 }
 0xc70   :  { %10116 = vrot.lane.b32.xlu1 %v15643_v20, %s14265_s22 }
 0xc73   :  { %10655 = vrot.lane.b32.xlu0 %v15681_v7, %s14265_s22 }
 0xc74   :  { %10270 = vrot.lane.b32.xlu1 %v15653_v62, %s14265_s22 }
 0xc77   :  { %10809 = vrot.lane.b32.xlu0 %v15691_v33, %s14265_s22 }
 0xc78   :  { %10424 = vrot.lane.b32.xlu1 %v15659_v10, %s14265_s22 }
 0xc7b   :  { %11194 = vrot.lane.b32.xlu0 %v15709_v44, %s14265_s22 }
 0xc7c   :  { %10578 = vrot.lane.b32.xlu1 %v15669_v1, %s14265_s22 }
 0xc7f   :  { %11348 = vrot.lane.b32.xlu0 %v15719_v31, %s14265_s22 }
 0xc80   :  { %10732 = vrot.lane.b32.xlu1 %v15679_v35, %s14265_s22 }
 0xc83   :  { %11502 = vrot.lane.b32.xlu0 %v15729_v16, %s14265_s22 }
 0xc84   :  { %10886 = vrot.lane.b32.xlu1 %v15689_v23, %s14265_s22 }
 0xc87   :  { %10347 = vrot.lane.b32.xlu0 %v15661_v51, %s14265_s22 }
 0xc88   :  { %11040 = vrot.lane.b32.xlu1 %v15699_v42, %s14265_s22 }
 0xc8b   :  { %10963 = vrot.lane.b32.xlu0 %v15701_v29, %s14265_s22 }
 0xc8c   :  { %11117 = vrot.lane.b32.xlu1 %v15711_v3, %s14265_s22 }
 0xc90   :  { %11271 = vrot.lane.b32.xlu1 %v15721_v39, %s14265_s22 }
 0xc94   :  { %11425 = vrot.lane.b32.xlu1 %v15731_v50, %s14265_s22 }
 0xc98   :  { %11579 = vrot.lane.b32.xlu1 %v15741_v55, %s14265_s22 }
 0xc9c   :  { %v7302_v37 = vpop.permute.xlu0 %7301 }
 0xc9d   :  { %13639 = vmatpush3.xpose.msk.msra.mxu1 %vm516_vm4, %v7302_v37  ;;  %v7379_v48 = vpop.permute.xlu1 %7378 }
 0xc9e   :  { %13648 = vmatprep.subr.mxu1 %v16750_v53  ;;  %13644 = vmatpush3.xpose.msk.msra.mxu0 %vm516_vm4, %v7379_v48 }
 0xc9f   :  { %13653 = vmatprep.subr.mxu0 %v16750_v53 }
 0xca0   :  { %13641 = vmatmul.mubr.msk.f32.vlgmr.msra.gmra.mxu1 %vm516_vm4, %v15643_v20  ;;  %v7456_v41 = vpop.permute.xlu0 %7455 }
 0xca1   :  { %13649 = vmatpush3.xpose.msk.msra.mxu1 %vm516_vm4, %v7456_v41  ;;  %13650 = vmatprep.mubr.msk.f32.mxu1 %vm14263_vm3, %v16750_v53 }
 0xca2   :  { %13646 = vmatmul.mubr.msk.f32.vlgmr.msra.gmra.mxu0 %vm516_vm4, %v15648_v27  ;;  %13658 = vmatprep.subr.mxu1 %v16750_v53 }
 0xca3   :  { %13655 = vmatprep.mubr.msk.f32.mxu0 %vm14263_vm3, %v16750_v53 }
 0xca4   :  { %13651 = vmatmul.mubr.msk.f32.vlgmr.msra.gmra.mxu1 %vm516_vm4, %v15653_v62  ;;  %v7610_v28 = vpop.permute.xlu0 %7609  ;;  %v7533_v56 = vpop.permute.xlu1 %7532 }
 0xca5   :  { %13654 = vmatpush3.xpose.msk.msra.mxu0 %vm516_vm4, %v7533_v56  ;;  %13659 = vmatpush3.xpose.msk.msra.mxu1 %vm516_vm4, %v7610_v28 }
 0xca6   :  { %13660 = vmatprep.mubr.msk.f32.mxu1 %vm14263_vm3, %v16750_v53  ;;  %13668 = vmatprep.subr.mxu1 %v16750_v53 }
 0xca7   :  { %13663 = vmatprep.subr.mxu0 %v16750_v53 }
 0xca8   :  { %13661 = vmatmul.mubr.msk.f32.vlgmr.msra.gmra.mxu1 %vm516_vm4, %v15659_v10  ;;  %v7764_v6 = vpop.permute.xlu0 %7763  ;;  %13656 = vmatmul.mubr.msk.f32.vlgmr.msra.gmra.mxu0 %vm516_vm4, %v15661_v51  ;;  %v7687_v21 = vpop.permute.xlu1 %7686 }
 0xca9   :  { %13664 = vmatpush3.xpose.msk.msra.mxu0 %vm516_vm4, %v7687_v21  ;;  %13669 = vmatpush3.xpose.msk.msra.mxu1 %vm516_vm4, %v7764_v6 }
 0xcaa   :  { %13665 = vmatprep.mubr.msk.f32.mxu0 %vm14263_vm3, %v16750_v53  ;;  %13670 = vmatprep.mubr.msk.f32.mxu1 %vm14263_vm3, %v16750_v53 }
 0xcab   :  { %13678 = vmatprep.subr.mxu1 %v16750_v53  ;;  %13673 = vmatprep.subr.mxu0 %v16750_v53 }
 0xcac   :  { %13671 = vmatmul.mubr.msk.f32.vlgmr.msra.gmra.mxu1 %vm516_vm4, %v15669_v1  ;;  %v7918_v20 = vpop.permute.xlu0 %7917  ;;  %13666 = vmatmul.mubr.msk.f32.vlgmr.msra.gmra.mxu0 %vm516_vm4, %v15671_v4  ;;  %v7841_v27 = vpop.permute.xlu1 %7840 }
 0xcad   :  { %13674 = vmatpush3.xpose.msk.msra.mxu0 %vm516_vm4, %v7841_v27  ;;  %13679 = vmatpush3.xpose.msk.msra.mxu1 %vm516_vm4, %v7918_v20 }
 0xcae   :  { %13675 = vmatprep.mubr.msk.f32.mxu0 %vm14263_vm3, %v16750_v53  ;;  %13680 = vmatprep.mubr.msk.f32.mxu1 %vm14263_vm3, %v16750_v53 }
 0xcaf   :  { %13688 = vmatprep.subr.mxu1 %v16750_v53  ;;  %13683 = vmatprep.subr.mxu0 %v16750_v53 }
 0xcb0   :  { %13681 = vmatmul.mubr.msk.f32.vlgmr.msra.gmra.mxu1 %vm516_vm4, %v15679_v35  ;;  %v8072_v62 = vpop.permute.xlu0 %8071  ;;  %13676 = vmatmul.mubr.msk.f32.vlgmr.msra.gmra.mxu0 %vm516_vm4, %v15681_v7  ;;  %v7995_v10 = vpop.permute.xlu1 %7994 }
 0xcb1   :  { %13684 = vmatpush3.xpose.msk.msra.mxu0 %vm516_vm4, %v7995_v10  ;;  %13689 = vmatpush3.xpose.msk.msra.mxu1 %vm516_vm4, %v8072_v62 }
 0xcb2   :  { %13685 = vmatprep.mubr.msk.f32.mxu0 %vm14263_vm3, %v16750_v53  ;;  %13690 = vmatprep.mubr.msk.f32.mxu1 %vm14263_vm3, %v16750_v53 }
 0xcb3   :  { %13698 = vmatprep.subr.mxu1 %v16750_v53  ;;  %13693 = vmatprep.subr.mxu0 %v16750_v53 }
 0xcb4   :  { %13691 = vmatmul.mubr.msk.f32.vlgmr.msra.gmra.mxu1 %vm516_vm4, %v15689_v23  ;;  %v8226_v51 = vpop.permute.xlu0 %8225  ;;  %13686 = vmatmul.mubr.msk.f32.vlgmr.msra.gmra.mxu0 %vm516_vm4, %v15691_v33  ;;  %v8149_v1 = vpop.permute.xlu1 %8148 }
 0xcb5   :  { %13694 = vmatpush3.xpose.msk.msra.mxu0 %vm516_vm4, %v8149_v1  ;;  %13699 = vmatpush3.xpose.msk.msra.mxu1 %vm516_vm4, %v8226_v51 }
 0xcb6   :  { %13695 = vmatprep.mubr.msk.f32.mxu0 %vm14263_vm3, %v16750_v53  ;;  %13700 = vmatprep.mubr.msk.f32.mxu1 %vm14263_vm3, %v16750_v53 }
 0xcb7   :  { %13708 = vmatprep.subr.mxu1 %v16750_v53  ;;  %13703 = vmatprep.subr.mxu0 %v16750_v53 }
 0xcb8   :  { %13701 = vmatmul.mubr.msk.f32.vlgmr.msra.gmra.mxu1 %vm516_vm4, %v15699_v42  ;;  %v8380_v4 = vpop.permute.xlu0 %8379  ;;  %13696 = vmatmul.mubr.msk.f32.vlgmr.msra.gmra.mxu0 %vm516_vm4, %v15701_v29  ;;  %v8303_v60 = vpop.permute.xlu1 %8302 }
 0xcb9   :  { %13704 = vmatpush3.xpose.msk.msra.mxu0 %vm516_vm4, %v8303_v60  ;;  %13709 = vmatpush3.xpose.msk.msra.mxu1 %vm516_vm4, %v8380_v4 }
 0xcba   :  { %13705 = vmatprep.mubr.msk.f32.mxu0 %vm14263_vm3, %v16750_v53  ;;  %13710 = vmatprep.mubr.msk.f32.mxu1 %vm14263_vm3, %v16750_v53 }
 0xcbb   :  { %13718 = vmatprep.subr.mxu1 %v16750_v53  ;;  %13713 = vmatprep.subr.mxu0 %v16750_v53 }
 0xcbc   :  { %13711 = vmatmul.mubr.msk.f32.vlgmr.msra.gmra.mxu1 %vm516_vm4, %v15709_v44  ;;  %v8534_v26 = vpop.permute.xlu0 %8533  ;;  %13706 = vmatmul.mubr.msk.f32.vlgmr.msra.gmra.mxu0 %vm516_vm4, %v15711_v3  ;;  %v8457_v35 = vpop.permute.xlu1 %8456 }
 0xcbd   :  { %13714 = vmatpush3.xpose.msk.msra.mxu0 %vm516_vm4, %v8457_v35  ;;  %13719 = vmatpush3.xpose.msk.msra.mxu1 %vm516_vm4, %v8534_v26 }
 0xcbe   :  { %13715 = vmatprep.mubr.msk.f32.mxu0 %vm14263_vm3, %v16750_v53  ;;  %13720 = vmatprep.mubr.msk.f32.mxu1 %vm14263_vm3, %v16750_v53 }
 0xcbf   :  { %13728 = vmatprep.subr.mxu1 %v16750_v53  ;;  %13723 = vmatprep.subr.mxu0 %v16750_v53 }
 0xcc0   :  { %13721 = vmatmul.mubr.msk.f32.vlgmr.msra.gmra.mxu1 %vm516_vm4, %v15719_v31  ;;  %v8688_v7 = vpop.permute.xlu0 %8687  ;;  %13716 = vmatmul.mubr.msk.f32.vlgmr.msra.gmra.mxu0 %vm516_vm4, %v15721_v39  ;;  %v8611_v49 = vpop.permute.xlu1 %8610 }
 0xcc1   :  { %13724 = vmatpush3.xpose.msk.msra.mxu0 %vm516_vm4, %v8611_v49  ;;  %13729 = vmatpush3.xpose.msk.msra.mxu1 %vm516_vm4, %v8688_v7 }
 0xcc2   :  { %13725 = vmatprep.mubr.msk.f32.mxu0 %vm14263_vm3, %v16750_v53  ;;  %13730 = vmatprep.mubr.msk.f32.mxu1 %vm14263_vm3, %v16750_v53 }
 0xcc3   :  { %13738 = vmatprep.subr.mxu1 %v16750_v53  ;;  %13733 = vmatprep.subr.mxu0 %v16750_v53 }
 0xcc4   :  { %13731 = vmatmul.mubr.msk.f32.vlgmr.msra.gmra.mxu1 %vm516_vm4, %v15729_v16  ;;  %v8842_v32 = vpop.permute.xlu0 %8841  ;;  %13726 = vmatmul.mubr.msk.f32.vlgmr.msra.gmra.mxu0 %vm516_vm4, %v15731_v50  ;;  %v8765_v23 = vpop.permute.xlu1 %8764 }
 0xcc5   :  { %13734 = vmatpush3.xpose.msk.msra.mxu0 %vm516_vm4, %v8765_v23  ;;  %13739 = vmatpush3.xpose.msk.msra.mxu1 %vm516_vm4, %v8842_v32 }
 0xcc6   :  { %13735 = vmatprep.mubr.msk.f32.mxu0 %vm14263_vm3, %v16750_v53  ;;  %13740 = vmatprep.mubr.msk.f32.mxu1 %vm14263_vm3, %v16750_v53 }
 0xcc7   :  { %13748 = vmatprep.subr.mxu1 %v16750_v53  ;;  %13743 = vmatprep.subr.mxu0 %v16750_v53 }
 0xcc8   :  { %13741 = vmatmul.mubr.msk.f32.vlgmr.msra.gmra.mxu1 %vm516_vm4, %v15739_v13  ;;  %v8996_v33 = vpop.permute.xlu0 %8995  ;;  %13736 = vmatmul.mubr.msk.f32.vlgmr.msra.gmra.mxu0 %vm516_vm4, %v15741_v55 }
 0xcc9   :  { %v8919_v47 = vpop.permute.xlu1 %8918  ;;  %13749 = vmatpush3.xpose.msk.msra.mxu1 %vm516_vm4, %v8996_v33  ;;  %13745 = vmatprep.mubr.msk.f32.mxu0 %vm14263_vm3, %v16750_v53 }
 0xcca   :  { %13744 = vmatpush3.xpose.msk.msra.mxu0 %vm516_vm4, %v8919_v47  ;;  %13750 = vmatprep.mubr.msk.f32.mxu1 %vm14263_vm3, %v16750_v53 }
 0xccb   :  { %13753 = vmatprep.subr.mxu0 %v16750_v53  ;;  %13758 = vmatprep.subr.mxu1 %v16750_v53 }
 0xccc   :  { %13751 = vmatmul.mubr.msk.f32.vlgmr.msra.gmra.mxu1 %vm516_vm4, %v15754_v61  ;;  %v9578_v42 = vpop.permute.xlu0 %9577 }
 0xccd   :  { %13746 = vmatmul.mubr.msk.f32.vlgmr.msra.gmra.mxu0 %vm516_vm4, %v15756_v40  ;;  %v9073_v14 = vpop.permute.xlu1 %9072  ;;  %13760 = vmatprep.mubr.msk.f32.mxu1 %vm14263_vm3, %v16750_v53 }
 0xcce   :  { %13754 = vmatpush3.xpose.msk.msra.mxu0 %vm516_vm4, %v9073_v14  ;;  %13755 = vmatprep.mubr.msk.f32.mxu0 %vm14263_vm3, %v16750_v53 }
 0xccf   :  { %13763 = vmatprep.subr.mxu0 %v16750_v53 }
 0xcd1   :  { %13756 = vmatmul.mubr.msk.f32.vlgmr.msra.gmra.mxu0 %vm516_vm4, %v15772_v19  ;;  %v9501_v29 = vpop.permute.xlu1 %9500  ;;  %v16045_v48 = vpop.permute.xlu0 %9731 }
 0xcd2   :  { %13759 = vmatpush3.msk.msra.mxu1 %vm3337_vm5, %v9501_v29  ;;  %13764 = vmatpush3.msk.msra.mxu0 %vm3337_vm5, %v9578_v42 }
 0xcd3   :  { %13768 = vmatprep.subr.mxu1 %v16750_v53  ;;  %13765 = vmatprep.mubr.msk.f32.mxu0 %vm14263_vm3, %v16750_v53 }
 0xcd4   :  { %13773 = vmatprep.subr.mxu0 %v16750_v53 }
 0xcd5   :  { %v16049_v28 = vpop.permute.xlu0 %9885 }
 0xcd6   :  { %v16043_v37 = vpop.permute.xlu1 %9654 }
 0xcd9   :  { %v16059_v62 = vpop.permute.xlu0 %10039 }
 0xcda   :  { %v16047_v41 = vpop.permute.xlu1 %9808 }
 0xcdd   :  { %v16073_v49 = vpop.permute.xlu0 %10193 }
 0xcde   :  { %v16051_v56 = vpop.permute.xlu1 %9962 }
 0xce2   :  { %v16061_v10 = vpop.permute.xlu1 %10116 }
 0xce6   :  { %v16075_v32 = vpop.permute.xlu1 %10270 }
 0xd13   :  { %v16011_v11 = vpop.f32.mrf.mxu0 }
 0xd14   :  { %v9148_v18 = vsel %vm2978_vm6, %v16011_v11, -inf }
 0xd15   :  { %v13602_v44 = vpop.f32.mrf.mxu0  ;;  %9149 = vmax.xlane.f32.xlu0 %v9148_v18 }
 0xd17   :  { %v16015_v3 = vpop.f32.mrf.mxu1 }
 0xd18   :  { %v9154_v34 = vsel %vm2978_vm6, %v16015_v3, -inf }
 0xd19   :  { %v16019_v38 = vpop.f32.mrf.mxu0  ;;  %v13612_v31 = vpop.f32.mrf.mxu1  ;;  %9155 = vmax.xlane.f32.xlu0 %v9154_v34 }
 0xd1a   :  { %v9151_v39 = vsel %vm2978_vm6, %v16019_v38, -inf }
 0xd1b   :  { %v13607_v43 = vpop.f32.mrf.mxu0  ;;  %v16023_v30 = vpop.f32.mrf.mxu1  ;;  %9152 = vmax.xlane.f32.xlu1 %v9151_v39 }
 0xd1c   :  { %v9160_v15 = vsel %vm2978_vm6, %v16023_v30, -inf  ;;  %v16089_v39 = vpop.permute.xlu0 %10501  ;;  %v16091_v43 = vpop.permute.xlu1 %10424 }
 0xd1d   :  { %v16025_v16 = vpop.f32.mrf.mxu0  ;;  %v13622_v50 = vpop.f32.mrf.mxu1 }
 0xd1e   :  { %v9157_v46 = vsel %vm2978_vm6, %v16025_v16, -inf }
 0xd1f   :  { %9161 = vmax.xlane.f32.xlu1 %v9160_v15  ;;  %9158 = vmax.xlane.f32.xlu0 %v9157_v46  ;;  %v13617_v55 = vpop.f32.mrf.mxu0 }
 0xd20   :  { %v16031_v45 = vpop.f32.mrf.mxu1 }
 0xd21   :  { %v9166_v61 = vsel %vm2978_vm6, %v16031_v45, -inf }
 0xd22   :  { %v13632_v12 = vpop.f32.mrf.mxu1 }
 0xd23   :  { %v16035_v5 = vpop.f32.mrf.mxu0  ;;  %9167 = vmax.xlane.f32.xlu1 %v9166_v61 }
 0xd24   :  { %v9163_v57 = vsel %vm2978_vm6, %v16035_v5, -inf }
 0xd25   :  { %9164 = vmax.xlane.f32.xlu0 %v9163_v57  ;;  %v13627_v19 = vpop.f32.mrf.mxu0 }
 0xd27   :  { %v16039_v2 = vpop.f32.mrf.mxu0 }
 0xd28   :  { %v9169_v24 = vsel %vm2978_vm6, %v16039_v2, -inf }
 0xd29   :  { %9170 = vmax.xlane.f32.xlu0 %v9169_v24  ;;  %v13637_v63 = vpop.f32.mrf.mxu0  ;;  %v16105_v24 = vpop.permute.xlu0 %10655 }
 0xd2a   :  { %v16107_v63 = vpop.permute.xlu1 %10578 }
 0xd60   :  { %v16053_v6 = vpop.f32.mrf.mxu1 }
 0xd61   :  { %v9172_v21 = vsel %vm2978_vm6, %v16053_v6, -inf }
 0xd62   :  { %v13642_v20 = vpop.f32.mrf.mxu1  ;;  %9173 = vmax.xlane.f32.xlu1 %v9172_v21  ;;  %v16057_v27 = vpop.f32.mrf.mxu0 }
 0xd63   :  { %v9175_v51 = vsel %vm2978_vm6, %v16057_v27, -inf }
 0xd64   :  { %v16065_v1 = vpop.f32.mrf.mxu1  ;;  %9176 = vmax.xlane.f32.xlu0 %v9175_v51  ;;  %v13647_v4 = vpop.f32.mrf.mxu0 }
 0xd65   :  { %v9178_v60 = vsel %vm2978_vm6, %v16065_v1, -inf }
 0xd66   :  { %v13652_v26 = vpop.f32.mrf.mxu1  ;;  %9179 = vmax.xlane.f32.xlu1 %v9178_v60 }
 0xd68   :  { %v16069_v35 = vpop.f32.mrf.mxu0  ;;  %v16071_v7 = vpop.f32.mrf.mxu1 }
 0xd69   :  { %v9184_v23 = vsel %vm2978_vm6, %v16071_v7, -inf  ;;  %v9181_v33 = vsel %vm2978_vm6, %v16069_v35, -inf }
 0xd6a   :  { %v13662_v47 = vpop.f32.mrf.mxu1  ;;  %9185 = vmax.xlane.f32.xlu1 %v9184_v23  ;;  %9182 = vmax.xlane.f32.xlu0 %v9181_v33  ;;  %v13657_v14 = vpop.f32.mrf.mxu0 }
 0xd6c   :  { %v16081_v42 = vpop.f32.mrf.mxu0  ;;  %v16083_v29 = vpop.f32.mrf.mxu1 }
 0xd6d   :  { %v9190_v18 = vsel %vm2978_vm6, %v16083_v29, -inf  ;;  %v9187_v44 = vsel %vm2978_vm6, %v16081_v42, -inf }
 0xd6e   :  { %v13672_v34 = vpop.f32.mrf.mxu1  ;;  %9191 = vmax.xlane.f32.xlu1 %v9190_v18  ;;  %9188 = vmax.xlane.f32.xlu0 %v9187_v44  ;;  %v13667_v31 = vpop.f32.mrf.mxu0 }
 0xd6f   :  { %v16121_v18 = vpop.permute.xlu0 %10809  ;;  %v16123_v44 = vpop.permute.xlu1 %10732 }
 0xd70   :  { %v16093_v50 = vpop.f32.mrf.mxu0  ;;  %v16095_v15 = vpop.f32.mrf.mxu1 }
 0xd71   :  { %v9196_v46 = vsel %vm2978_vm6, %v16095_v15, -inf  ;;  %v9193_v55 = vsel %vm2978_vm6, %v16093_v50, -inf }
 0xd72   :  { %v13682_v12 = vpop.f32.mrf.mxu1  ;;  %9197 = vmax.xlane.f32.xlu1 %v9196_v46  ;;  %9194 = vmax.xlane.f32.xlu0 %v9193_v55  ;;  %v13677_v61 = vpop.f32.mrf.mxu0 }
 0xd74   :  { %v16101_v57 = vpop.f32.mrf.mxu0  ;;  %v16103_v19 = vpop.f32.mrf.mxu1 }
 0xd75   :  { %v9202_v21 = vsel %vm2978_vm6, %v16103_v19, -inf  ;;  %v9199_v20 = vsel %vm2978_vm6, %v16101_v57, -inf }
 0xd76   :  { %v13692_v51 = vpop.f32.mrf.mxu1  ;;  %9203 = vmax.xlane.f32.xlu1 %v9202_v21  ;;  %9200 = vmax.xlane.f32.xlu0 %v9199_v20  ;;  %v13687_v4 = vpop.f32.mrf.mxu0 }
 0xd77   :  { %v16137_v51 = vpop.permute.xlu0 %11194  ;;  %v16139_v4 = vpop.permute.xlu1 %10886 }
 0xd78   :  { %v16113_v60 = vpop.f32.mrf.mxu0  ;;  %v16115_v26 = vpop.f32.mrf.mxu1  ;;  %16767 = vst [vmem:[#allocation11_spill] sm:$0xff] %v16137_v51  ;;  %16768 = vst [vmem:[#allocation8_spill] sm:$0xff] %v16139_v4 }
 0xd79   :  { %v9208_v23 = vsel %vm2978_vm6, %v16115_v26, -inf  ;;  %v9205_v33 = vsel %vm2978_vm6, %v16113_v60, -inf }
 0xd7a   :  { %v13702_v47 = vpop.f32.mrf.mxu1  ;;  %9209 = vmax.xlane.f32.xlu1 %v9208_v23  ;;  %9206 = vmax.xlane.f32.xlu0 %v9205_v33  ;;  %v13697_v14 = vpop.f32.mrf.mxu0 }
 0xd7b   :  { %v16153_v17 = vpop.permute.xlu0 %11348 }
 0xd7c   :  { %v16125_v34 = vpop.f32.mrf.mxu0  ;;  %v16127_v31 = vpop.f32.mrf.mxu1  ;;  %16769 = vst [vmem:[#allocation13_spill] sm:$0xff] %v16153_v17 }
 0xd7d   :  { %v9214_v46 = vsel %vm2978_vm6, %v16127_v31, -inf  ;;  %v9211_v55 = vsel %vm2978_vm6, %v16125_v34, -inf }
 0xd7e   :  { %v13712_v12 = vpop.f32.mrf.mxu1  ;;  %9215 = vmax.xlane.f32.xlu1 %v9214_v46  ;;  %9212 = vmax.xlane.f32.xlu0 %v9211_v55  ;;  %v13707_v61 = vpop.f32.mrf.mxu0 }
 0xd80   :  { %v16133_v21 = vpop.f32.mrf.mxu0  ;;  %v16135_v20 = vpop.f32.mrf.mxu1 }
 0xd81   :  { %v9220_v23 = vsel %vm2978_vm6, %v16135_v20, -inf  ;;  %v9217_v33 = vsel %vm2978_vm6, %v16133_v21, -inf }
 0xd82   :  { %v13722_v47 = vpop.f32.mrf.mxu1  ;;  %9221 = vmax.xlane.f32.xlu1 %v9220_v23  ;;  %9218 = vmax.xlane.f32.xlu0 %v9217_v33  ;;  %v13717_v14 = vpop.f32.mrf.mxu0 }
 0xd83   :  { %v16155_v47 = vpop.permute.xlu1 %11040 }
 0xd84   :  { %v16145_v46 = vpop.f32.mrf.mxu0  ;;  %v16147_v55 = vpop.f32.mrf.mxu1  ;;  %16770 = vst [vmem:[#allocation10_spill] sm:$0xff] %v16155_v47 }
 0xd85   :  { %v9226_v12 = vsel %vm2978_vm6, %v16147_v55, -inf  ;;  %v9223_v61 = vsel %vm2978_vm6, %v16145_v46, -inf }
 0xd86   :  { %v13732_v9 = vpop.f32.mrf.mxu1  ;;  %9227 = vmax.xlane.f32.xlu1 %v9226_v12  ;;  %9224 = vmax.xlane.f32.xlu0 %v9223_v61  ;;  %v13727_v54 = vpop.f32.mrf.mxu0 }
 0xd87   :  { %v16167_v54 = vpop.permute.xlu0 %11502  ;;  %v16171_v25 = vpop.permute.xlu1 %11117 }
 0xd88   :  { %v16157_v23 = vpop.f32.mrf.mxu0  ;;  %v16159_v33 = vpop.f32.mrf.mxu1  ;;  %16771 = vst [vmem:[#allocation14_spill] sm:$0xff] %v16167_v54  ;;  %16772 = vst [vmem:[#allocation12_spill] sm:$0xff] %v16171_v25 }
 0xd89   :  { %v9232_v14 = vsel %vm2978_vm6, %v16159_v33, -inf  ;;  %v9229_v52 = vsel %vm2978_vm6, %v16157_v23, -inf }
 0xd8a   :  { %v13742_v36 = vpop.f32.mrf.mxu1  ;;  %9233 = vmax.xlane.f32.xlu1 %v9232_v14  ;;  %9230 = vmax.xlane.f32.xlu0 %v9229_v52  ;;  %v13737_v9 = vpop.f32.mrf.mxu0 }
 0xd8b   :  { %v16177_v14 = vpop.permute.xlu0 %10347  ;;  %v16179_v52 = vpop.permute.xlu1 %11271 }
 0xd8c   :  { %v16165_v12 = vpop.f32.mrf.mxu1  ;;  %16773 = vst [vmem:[#allocation16_spill] sm:$0xff] %v16179_v52 }
 0xd8d   :  { %v16169_v61 = vpop.f32.mrf.mxu0 }
 0xd8e   :  { %v13752_v59 = vpop.f32.mrf.mxu1  ;;  %v9235_v22 = vsel %vm2978_vm6, %v16169_v61, -inf }
 0xd8f   :  { %9236 = vmax.xlane.f32.xlu0 %v9235_v22  ;;  %v13747_v8 = vpop.f32.mrf.mxu0  ;;  %v16181_v9 = vpop.permute.xlu0 %10963 }
 0xd90   :  { %16774 = vst [vmem:[#allocation7_spill] sm:$0xff] %v16181_v9  ;;  %v16183_v0 = vpop.permute.xlu1 %11425 }
 0xd91   :  { %v16175_v58 = vpop.f32.mrf.mxu0  ;;  %16775 = vst [vmem:[#allocation6_spill] sm:$0xff] %v16183_v0 }
 0xd93   :  { %v13757_v36 = vpop.f32.mrf.mxu0 }
 0xd94   :  { %v16186_v59 = vpop.permute.xlu1 %11579 }
 0xd95   :  { %16776 = vst [vmem:[#allocation17_spill] sm:$0xff] %v16186_v59 }
 0xd9e   :  { %v9150_v54 = vpop.xlane.xlu0 %9149 }
 0xd9f   :  { %v9244_v17 = vsub.f32 %v16011_v11, %v9150_v54 }
 0xda1   :  { %v9276_v51 = vmul.f32 1.442695, %v9244_v17 }
 0xda2   :  { %v9156_v25 = vpop.xlane.xlu0 %9155 }
 0xda3   :  { %14116 = vpow2.f32 %v9276_v51  ;;  %v9246_v22 = vsub.f32 %v16015_v3, %v9156_v25  ;;  %v9238_v3 = vsel %vm2978_vm6, %v16165_v12, -inf }
 0xda4   :  { %v9153_v8 = vpop.xlane.xlu1 %9152 }
 0xda5   :  { %v9280_v36 = vmul.f32 1.442695, %v9246_v22  ;;  %v9245_v47 = vsub.f32 %v16019_v38, %v9153_v8  ;;  %v9241_v38 = vsel %vm2978_vm6, %v16175_v58, -inf }
 0xda7   :  { %14118 = vpow2.f32 %v9280_v36  ;;  %v9278_v52 = vmul.f32 1.442695, %v9245_v47 }
 0xda8   :  { %v9162_v47 = vpop.xlane.xlu1 %9161 }
 0xda9   :  { %14120 = vpow2.f32 %v9278_v52  ;;  %v9248_v54 = vsub.f32 %v16023_v30, %v9162_v47 }
 0xdab   :  { %v9284_v36 = vmul.f32 1.442695, %v9248_v54 }
 0xdac   :  { %v9168_v22 = vpop.xlane.xlu1 %9167 }
 0xdad   :  { %14122 = vpow2.f32 %v9284_v36 }
 0xdb0   :  { %v16190_v9 = vpop.eup %14116 }
 0xdb1   :  { %v9340_v0 = vsel %vm2978_vm6, %v16190_v9, 0.0 }
 0xdb2   :  { %9341 = vadd.xlane.f32.xlu1 %v9340_v0  ;;  %v9159_v0 = vpop.xlane.xlu0 %9158 }
 0xdb3   :  { %v9247_v8 = vsub.f32 %v16025_v16, %v9159_v0 }
 0xdb4   :  { %v16194_v11 = vpop.eup %14118 }
 0xdb5   :  { %v9346_v17 = vsel %vm2978_vm6, %v16194_v11, 0.0 }
 0xdb6   :  { %v16198_v51 = vpop.eup %14120  ;;  %9347 = vadd.xlane.f32.xlu1 %v9346_v17  ;;  %v9165_v52 = vpop.xlane.xlu0 %9164  ;;  %v9250_v17 = vsub.f32 %v16031_v45, %v9168_v22 }
 0xdb7   :  { %v9343_v25 = vsel %vm2978_vm6, %v16198_v51, 0.0 }
 0xdb8   :  { %9344 = vadd.xlane.f32.xlu0 %v9343_v25  ;;  %v9282_v25 = vmul.f32 1.442695, %v9247_v8 }
 0xdba   :  { %9239 = vmax.xlane.f32.xlu1 %v9238_v3  ;;  %v9249_v3 = vsub.f32 %v16035_v5, %v9165_v52  ;;  %14124 = vpow2.f32 %v9282_v25  ;;  %v16215_v30 = vpop.eup %14122 }
 0xdbb   :  { %v9352_v52 = vsel %vm2978_vm6, %v16215_v30, 0.0 }
 0xdbc   :  { %9242 = vmax.xlane.f32.xlu0 %v9241_v38  ;;  %v9171_v38 = vpop.xlane.xlu0 %9170  ;;  %v9286_v59 = vmul.f32 1.442695, %v9249_v3 }
 0xdbd   :  { %v9251_v4 = vsub.f32 %v16039_v2, %v9171_v38 }
 0xdc7   :  { %v16218_v45 = vpop.eup %14124 }
 0xdcb   :  { %11733 = vrot.lane.b32.xlu1 %v15756_v40, %s14265_s22  ;;  %v9288_v40 = vmul.f32 1.442695, %v9250_v17 }
 0xdcd   :  { %14126 = vpow2.f32 %v9288_v40 }
 0xdce   :  { %14128 = vpow2.f32 %v9286_v59 }
 0xdd2   :  { %11656 = vrot.lane.b32.xlu0 %v15739_v13, %s14265_s22  ;;  %v9290_v13 = vmul.f32 1.442695, %v9251_v4 }
 0xdd4   :  { %14130 = vpow2.f32 %v9290_v13 }
 0xdda   :  { %v16223_v22 = vpop.eup %14126 }
 0xddb   :  { %v16228_v8 = vpop.eup %14128 }
 0xde1   :  { %v16236_v40 = vpop.eup %14130 }
 0xdeb   :  { %v9174_v16 = vpop.xlane.xlu1 %9173 }
 0xdec   :  { %v9252_v0 = vsub.f32 %v16053_v6, %v9174_v16  ;;  %v9349_v6 = vsel %vm2978_vm6, %v16218_v45, 0.0 }
 0xded   :  { %v9177_v47 = vpop.xlane.xlu0 %9176 }
 0xdee   :  { %v9292_v5 = vmul.f32 1.442695, %v9252_v0  ;;  %v9253_v54 = vsub.f32 %v16057_v27, %v9177_v47  ;;  %v9358_v27 = vsel %vm2978_vm6, %v16223_v22, 0.0 }
 0xdef   :  { %9353 = vadd.xlane.f32.xlu1 %v9352_v52  ;;  %v9180_v2 = vpop.xlane.xlu1 %9179 }
 0xdf0   :  { %14132 = vpow2.f32 %v9292_v5  ;;  %v9294_v4 = vmul.f32 1.442695, %v9253_v54  ;;  %v9254_v59 = vsub.f32 %v16065_v1, %v9180_v2  ;;  %v9355_v1 = vsel %vm2978_vm6, %v16228_v8, 0.0 }
 0xdf1   :  { %9350 = vadd.xlane.f32.xlu0 %v9349_v6 }
 0xdf2   :  { %14134 = vpow2.f32 %v9294_v4  ;;  %v9296_v36 = vmul.f32 1.442695, %v9254_v59 }
 0xdf3   :  { %v9183_v17 = vpop.xlane.xlu0 %9182  ;;  %9359 = vadd.xlane.f32.xlu1 %v9358_v27  ;;  %v9186_v25 = vpop.xlane.xlu1 %9185 }
 0xdf4   :  { %14136 = vpow2.f32 %v9296_v36  ;;  %v9255_v3 = vsub.f32 %v16069_v35, %v9183_v17  ;;  %v9256_v38 = vsub.f32 %v16071_v7, %v9186_v25  ;;  %v9361_v35 = vsel %vm2978_vm6, %v16236_v40, 0.0 }
 0xdf5   :  { %9356 = vadd.xlane.f32.xlu0 %v9355_v1 }
 0xdf6   :  { %v9298_v13 = vmul.f32 1.442695, %v9255_v3  ;;  %v9300_v16 = vmul.f32 1.442695, %v9256_v38 }
 0xdf7   :  { %v9189_v0 = vpop.xlane.xlu0 %9188  ;;  %v9192_v47 = vpop.xlane.xlu1 %9191 }
 0xdf8   :  { %14138 = vpow2.f32 %v9298_v13  ;;  %v9257_v5 = vsub.f32 %v16081_v42, %v9189_v0  ;;  %v9258_v54 = vsub.f32 %v16083_v29, %v9192_v47 }
 0xdf9   :  { %14140 = vpow2.f32 %v9300_v16  ;;  %9362 = vadd.xlane.f32.xlu0 %v9361_v35 }
 0xdfa   :  { %v9302_v7 = vmul.f32 1.442695, %v9257_v5  ;;  %v9304_v52 = vmul.f32 1.442695, %v9258_v54 }
 0xdfb   :  { %v9195_v2 = vpop.xlane.xlu0 %9194  ;;  %v9198_v4 = vpop.xlane.xlu1 %9197 }
 0xdfc   :  { %14142 = vpow2.f32 %v9302_v7  ;;  %v9259_v59 = vsub.f32 %v16093_v50, %v9195_v2  ;;  %v9260_v6 = vsub.f32 %v16095_v15, %v9198_v4 }
 0xdfd   :  { %v16244_v36 = vpop.eup %14132  ;;  %14144 = vpow2.f32 %v9304_v52 }
 0xdfe   :  { %v9306_v42 = vmul.f32 1.442695, %v9259_v59  ;;  %v9308_v27 = vmul.f32 1.442695, %v9260_v6  ;;  %v9364_v29 = vsel %vm2978_vm6, %v16244_v36, 0.0 }
 0xdff   :  { %v16248_v17 = vpop.eup %14134  ;;  %v9201_v25 = vpop.xlane.xlu0 %9200  ;;  %9365 = vadd.xlane.f32.xlu1 %v9364_v29 }
 0xe00   :  { %v9204_v3 = vpop.xlane.xlu1 %9203  ;;  %14146 = vpow2.f32 %v9306_v42  ;;  %v9261_v38 = vsub.f32 %v16101_v57, %v9201_v25  ;;  %v9367_v15 = vsel %vm2978_vm6, %v16248_v17, 0.0 }
 0xe01   :  { %v9262_v50 = vsub.f32 %v16103_v19, %v9204_v3  ;;  %v16254_v1 = vpop.eup %14136  ;;  %14148 = vpow2.f32 %v9308_v27  ;;  %9368 = vadd.xlane.f32.xlu0 %v9367_v15 }
 0xe02   :  { %v9310_v13 = vmul.f32 1.442695, %v9261_v38  ;;  %v9370_v0 = vsel %vm2978_vm6, %v16254_v1, 0.0 }
 0xe03   :  { %v9312_v16 = vmul.f32 1.442695, %v9262_v50  ;;  %v9207_v47 = vpop.xlane.xlu0 %9206  ;;  %9371 = vadd.xlane.f32.xlu1 %v9370_v0 }
 0xe04   :  { %v9210_v5 = vpop.xlane.xlu1 %9209  ;;  %14150 = vpow2.f32 %v9310_v13  ;;  %v9263_v57 = vsub.f32 %v16113_v60, %v9207_v47 }
 0xe05   :  { %v9264_v19 = vsub.f32 %v16115_v26, %v9210_v5  ;;  %v16260_v54 = vpop.eup %14138  ;;  %14152 = vpow2.f32 %v9312_v16 }
 0xe06   :  { %v16262_v35 = vpop.eup %14140  ;;  %v9314_v7 = vmul.f32 1.442695, %v9263_v57  ;;  %v9373_v2 = vsel %vm2978_vm6, %v16260_v54, 0.0 }
 0xe07   :  { %v9316_v52 = vmul.f32 1.442695, %v9264_v19  ;;  %v9213_v4 = vpop.xlane.xlu0 %9212  ;;  %9374 = vadd.xlane.f32.xlu0 %v9373_v2  ;;  %v9376_v59 = vsel %vm2978_vm6, %v16262_v35, 0.0 }
 0xe08   :  { %v9216_v6 = vpop.xlane.xlu1 %9215  ;;  %14154 = vpow2.f32 %v9314_v7  ;;  %v9265_v60 = vsub.f32 %v16125_v34, %v9213_v4  ;;  %9377 = vadd.xlane.f32.xlu1 %v9376_v59 }
 0xe09   :  { %v9266_v26 = vsub.f32 %v16127_v31, %v9216_v6  ;;  %v16270_v42 = vpop.eup %14142  ;;  %14156 = vpow2.f32 %v9316_v52 }
 0xe0a   :  { %v16272_v27 = vpop.eup %14144  ;;  %v9318_v29 = vmul.f32 1.442695, %v9265_v60  ;;  %v9379_v3 = vsel %vm2978_vm6, %v16270_v42, 0.0 }
 0xe0b   :  { %v9320_v25 = vmul.f32 1.442695, %v9266_v26  ;;  %v9219_v38 = vpop.xlane.xlu0 %9218  ;;  %9380 = vadd.xlane.f32.xlu0 %v9379_v3  ;;  %v9382_v50 = vsel %vm2978_vm6, %v16272_v27, 0.0 }
 0xe0c   :  { %v9222_v15 = vpop.xlane.xlu1 %9221  ;;  %14158 = vpow2.f32 %v9318_v29  ;;  %v9267_v34 = vsub.f32 %v16133_v21, %v9219_v38  ;;  %9383 = vadd.xlane.f32.xlu1 %v9382_v50 }
 0xe0d   :  { %v9268_v31 = vsub.f32 %v16135_v20, %v9222_v15  ;;  %v16280_v13 = vpop.eup %14146  ;;  %14160 = vpow2.f32 %v9320_v25 }
 0xe0e   :  { %v16282_v16 = vpop.eup %14148  ;;  %v9322_v0 = vmul.f32 1.442695, %v9267_v34  ;;  %v9385_v5 = vsel %vm2978_vm6, %v16280_v13, 0.0 }
 0xe0f   :  { %v9324_v47 = vmul.f32 1.442695, %v9268_v31  ;;  %v9225_v57 = vpop.xlane.xlu0 %9224  ;;  %9386 = vadd.xlane.f32.xlu0 %v9385_v5  ;;  %v9388_v19 = vsel %vm2978_vm6, %v16282_v16, 0.0 }
 0xe10   :  { %v9228_v7 = vpop.xlane.xlu1 %9227  ;;  %14162 = vpow2.f32 %v9322_v0  ;;  %v9269_v21 = vsub.f32 %v16145_v46, %v9225_v57  ;;  %9389 = vadd.xlane.f32.xlu1 %v9388_v19 }
 0xe11   :  { %v9270_v20 = vsub.f32 %v16147_v55, %v9228_v7  ;;  %v16290_v52 = vpop.eup %14150  ;;  %14164 = vpow2.f32 %v9324_v47 }
 0xe12   :  { %v16292_v2 = vpop.eup %14152  ;;  %v9326_v4 = vmul.f32 1.442695, %v9269_v21  ;;  %v9391_v6 = vsel %vm2978_vm6, %v16290_v52, 0.0 }
 0xe13   :  { %v9328_v59 = vmul.f32 1.442695, %v9270_v20  ;;  %v9231_v60 = vpop.xlane.xlu0 %9230  ;;  %9392 = vadd.xlane.f32.xlu0 %v9391_v6  ;;  %v9394_v26 = vsel %vm2978_vm6, %v16292_v2, 0.0 }
 0xe14   :  { %v9234_v29 = vpop.xlane.xlu1 %9233  ;;  %14166 = vpow2.f32 %v9326_v4  ;;  %v9271_v46 = vsub.f32 %v16157_v23, %v9231_v60  ;;  %9395 = vadd.xlane.f32.xlu1 %v9394_v26 }
 0xe15   :  { %v9272_v55 = vsub.f32 %v16159_v33, %v9234_v29  ;;  %v16300_v25 = vpop.eup %14154  ;;  %14168 = vpow2.f32 %v9328_v59 }
 0xe16   :  { %v16302_v3 = vpop.eup %14156  ;;  %v9330_v38 = vmul.f32 1.442695, %v9271_v46  ;;  %v9397_v15 = vsel %vm2978_vm6, %v16300_v25, 0.0 }
 0xe17   :  { %v9332_v50 = vmul.f32 1.442695, %v9272_v55  ;;  %9398 = vadd.xlane.f32.xlu0 %v9397_v15  ;;  %v9400_v34 = vsel %vm2978_vm6, %v16302_v3, 0.0 }
 0xe18   :  { %14170 = vpow2.f32 %v9330_v38  ;;  %v9237_v31 = vpop.xlane.xlu0 %9236  ;;  %9401 = vadd.xlane.f32.xlu1 %v9400_v34 }
 0xe19   :  { %v16308_v23 = vpop.eup %14158  ;;  %14172 = vpow2.f32 %v9332_v50  ;;  %v9273_v33 = vsub.f32 %v16169_v61, %v9237_v31 }
 0xe1a   :  { %v16311_v0 = vpop.eup %14160  ;;  %v9403_v47 = vsel %vm2978_vm6, %v16308_v23, 0.0 }
 0xe1b   :  { %v9334_v5 = vmul.f32 1.442695, %v9273_v33  ;;  %9404 = vadd.xlane.f32.xlu0 %v9403_v47  ;;  %v9406_v57 = vsel %vm2978_vm6, %v16311_v0, 0.0 }
 0xe1c   :  { %9407 = vadd.xlane.f32.xlu1 %v9406_v57 }
 0xe1d   :  { %v16317_v19 = vpop.eup %14162  ;;  %14174 = vpow2.f32 %v9334_v5 }
 0xe1e   :  { %v16319_v7 = vpop.eup %14164  ;;  %v9409_v21 = vsel %vm2978_vm6, %v16317_v19, 0.0 }
 0xe1f   :  { %9410 = vadd.xlane.f32.xlu0 %v9409_v21  ;;  %v9412_v61 = vsel %vm2978_vm6, %v16319_v7, 0.0 }
 0xe20   :  { %9413 = vadd.xlane.f32.xlu1 %v9412_v61 }
 0xe21   :  { %v16325_v20 = vpop.eup %14166 }
 0xe22   :  { %v16327_v4 = vpop.eup %14168  ;;  %v9415_v59 = vsel %vm2978_vm6, %v16325_v20, 0.0 }
 0xe23   :  { %9416 = vadd.xlane.f32.xlu0 %v9415_v59  ;;  %v9418_v6 = vsel %vm2978_vm6, %v16327_v4, 0.0 }
 0xe24   :  { %9419 = vadd.xlane.f32.xlu1 %v9418_v6 }
 0xe25   :  { %v16333_v60 = vpop.eup %14170 }
 0xe26   :  { %v16335_v26 = vpop.eup %14172  ;;  %v9421_v29 = vsel %vm2978_vm6, %v16333_v60, 0.0 }
 0xe27   :  { %9422 = vadd.xlane.f32.xlu0 %v9421_v29  ;;  %v9424_v46 = vsel %vm2978_vm6, %v16335_v26, 0.0 }
 0xe28   :  { %9425 = vadd.xlane.f32.xlu1 %v9424_v46 }
 0xe2a   :  { %v16341_v55 = vpop.eup %14174 }
 0xe2b   :  { %v9427_v38 = vsel %vm2978_vm6, %v16341_v55, 0.0 }
 0xe2c   :  { %9428 = vadd.xlane.f32.xlu0 %v9427_v38 }
 0xe3b   :  { %v9342_v50 = vpop.xlane.xlu1 %9341 }
 0xe3c   :  { %14176 = vrcp.f32 %v9342_v50 }
 0xe3f   :  { %v9348_v15 = vpop.xlane.xlu1 %9347 }
 0xe40   :  { %14178 = vrcp.f32 %v9348_v15 }
 0xe41   :  { %v9345_v34 = vpop.xlane.xlu0 %9344 }
 0xe42   :  { %14180 = vrcp.f32 %v9345_v34 }
 0xe43   :  { %v9240_v31 = vpop.xlane.xlu1 %9239 }
 0xe44   :  { %v9274_v33 = vsub.f32 %v16165_v12, %v9240_v31 }
 0xe45   :  { %v9243_v47 = vpop.xlane.xlu0 %9242 }
 0xe46   :  { %v9336_v5 = vmul.f32 1.442695, %v9274_v33  ;;  %v9275_v57 = vsub.f32 %v16175_v58, %v9243_v47 }
 0xe47   :  { %v16378_v46 = vpop.permute.xlu1 %11733 }
 0xe48   :  { %14182 = vpow2.f32 %v9336_v5  ;;  %v9338_v21 = vmul.f32 1.442695, %v9275_v57 }
 0xe49   :  { %v14177_v61 = vpop.eup %14176  ;;  %v16380_v38 = vpop.permute.xlu0 %11656 }
 0xe4a   :  { %14184 = vpow2.f32 %v9338_v21  ;;  %v9437_v59 = vmul.f32 %v14177_v61, %v16190_v9 }
 0xe4c   :  { %13761 = vmatmul.mubr.msk.f32.vlgmr.msra.gmra.mxu1 %vm3333_vm7, %v9437_v59 }
 0xe4d   :  { %v14179_v6 = vpop.eup %14178  ;;  %13769 = vmatpush3.msk.msra.mxu1 %vm3337_vm5, %v16043_v37  ;;  %13770 = vmatprep.mubr.msk.f32.mxu1 %vm14263_vm3, %v16750_v53 }
 0xe4e   :  { %13778 = vmatprep.subr.mxu1 %v16750_v53  ;;  %v9441_v12 = vmul.f32 %v14179_v6, %v16194_v11 }
 0xe4f   :  { %v14181_v58 = vpop.eup %14180 }
 0xe50   :  { %13771 = vmatmul.mubr.msk.f32.vlgmr.msra.gmra.mxu1 %vm3333_vm7, %v9441_v12  ;;  %v9439_v29 = vmul.f32 %v14181_v58, %v16198_v51  ;;  %v14255_v51 = vld [vmem:[#allocation2 + $0x3e] sm:$0x3] }
 0xe51   :  { %13779 = vmatpush3.msk.msra.mxu1 %vm3337_vm5, %v16047_v41  ;;  %13780 = vmatprep.mubr.msk.f32.mxu1 %vm14263_vm3, %v16750_v53 }
 0xe52   :  { %13766 = vmatmul.mubr.msk.f32.vlgmr.msra.gmra.mxu0 %vm3333_vm7, %v9439_v29  ;;  %13788 = vmatprep.subr.mxu1 %v16750_v53 }
 0xe53   :  { %13774 = vmatpush3.msk.msra.mxu0 %vm3337_vm5, %v16045_v48  ;;  %13775 = vmatprep.mubr.msk.f32.mxu0 %vm14263_vm3, %v16750_v53  ;;  %v14256_v48 = vld [vmem:[#allocation2 + $0x3c] sm:$0x3] }
 0xe54   :  { %13783 = vmatprep.subr.mxu0 %v16750_v53 }
 0xe55   :  { %v16368_v37 = vpop.eup %14182 }
 0xe56   :  { %v9430_v41 = vsel %vm2978_vm6, %v16368_v37, 0.0 }
 0xe57   :  { %v16372_v9 = vpop.eup %14184  ;;  %9431 = vadd.xlane.f32.xlu1 %v9430_v41 }
 0xe58   :  { %v9433_v11 = vsel %vm2978_vm6, %v16372_v9, 0.0 }
 0xe59   :  { %9434 = vadd.xlane.f32.xlu0 %v9433_v11 }
 0xe68   :  { %11887 = vrot.lane.b32.xlu1 %v14255_v51, %s14265_s22 }
 0xe6f   :  { %11810 = vrot.lane.b32.xlu0 %v14256_v48, %s14265_s22 }
 0xe78   :  { %v9354_v50 = vpop.xlane.xlu1 %9353 }
 0xe79   :  { %14186 = vrcp.f32 %v9354_v50 }
 0xe7a   :  { %v9351_v15 = vpop.xlane.xlu0 %9350 }
 0xe7b   :  { %14188 = vrcp.f32 %v9351_v15 }
 0xe7c   :  { %v9360_v34 = vpop.xlane.xlu1 %9359 }
 0xe7d   :  { %14190 = vrcp.f32 %v9360_v34 }
 0xe7e   :  { %v9357_v31 = vpop.xlane.xlu0 %9356 }
 0xe7f   :  { %14192 = vrcp.f32 %v9357_v31 }
 0xe82   :  { %v9363_v33 = vpop.xlane.xlu0 %9362 }
 0xe83   :  { %14194 = vrcp.f32 %v9363_v33 }
 0xe86   :  { %v14187_v47 = vpop.eup %14186 }
 0xe87   :  { %v9445_v5 = vmul.f32 %v14187_v47, %v16215_v30 }
 0xe88   :  { %v14189_v57 = vpop.eup %14188  ;;  %v9366_v21 = vpop.xlane.xlu1 %9365 }
 0xe89   :  { %14196 = vrcp.f32 %v9366_v21  ;;  %13781 = vmatmul.mubr.msk.f32.vlgmr.msra.gmra.mxu1 %vm3333_vm7, %v9445_v5  ;;  %v9443_v61 = vmul.f32 %v14189_v57, %v16218_v45  ;;  %v16777_v21 = vld [vmem:[#allocation8_spill] sm:$0xff] }
 0xe8a   :  { %v14191_v59 = vpop.eup %14190  ;;  %13789 = vmatpush3.msk.msra.mxu1 %vm3337_vm5, %v16051_v56  ;;  %v9369_v6 = vpop.xlane.xlu0 %9368  ;;  %13790 = vmatprep.mubr.msk.f32.mxu1 %vm14263_vm3, %v16750_v53 }
 0xe8b   :  { %14198 = vrcp.f32 %v9369_v6  ;;  %13776 = vmatmul.mubr.msk.f32.vlgmr.msra.gmra.mxu0 %vm3333_vm7, %v9443_v61  ;;  %13798 = vmatprep.subr.mxu1 %v16750_v53  ;;  %v9449_v30 = vmul.f32 %v14191_v59, %v16223_v22  ;;  %v16778_v6 = vld [vmem:[#allocation7_spill] sm:$0xff] }
 0xe8c   :  { %v14193_v12 = vpop.eup %14192  ;;  %13784 = vmatpush3.msk.msra.mxu0 %vm3337_vm5, %v16049_v28  ;;  %v9372_v45 = vpop.xlane.xlu1 %9371  ;;  %13785 = vmatprep.mubr.msk.f32.mxu0 %vm14263_vm3, %v16750_v53 }
 0xe8d   :  { %14200 = vrcp.f32 %v9372_v45  ;;  %13791 = vmatmul.mubr.msk.f32.vlgmr.msra.gmra.mxu1 %vm3333_vm7, %v9449_v30  ;;  %13793 = vmatprep.subr.mxu0 %v16750_v53  ;;  %v9447_v56 = vmul.f32 %v14193_v12, %v16228_v8  ;;  %v16779_v12 = vld [vmem:[#allocation10_spill] sm:$0xff] }
 0xe8e   :  { %13799 = vmatpush3.msk.msra.mxu1 %vm3337_vm5, %v16061_v10  ;;  %13800 = vmatprep.mubr.msk.f32.mxu1 %vm14263_vm3, %v16750_v53 }
 0xe8f   :  { %13786 = vmatmul.mubr.msk.f32.vlgmr.msra.gmra.mxu0 %vm3333_vm7, %v9447_v56  ;;  %13808 = vmatprep.subr.mxu1 %v16750_v53 }
 0xe90   :  { %v14195_v28 = vpop.eup %14194  ;;  %13794 = vmatpush3.msk.msra.mxu0 %vm3337_vm5, %v16059_v62  ;;  %v9375_v22 = vpop.xlane.xlu0 %9374  ;;  %13795 = vmatprep.mubr.msk.f32.mxu0 %vm14263_vm3, %v16750_v53 }
 0xe91   :  { %v9451_v8 = vmul.f32 %v14195_v28, %v16236_v40  ;;  %14202 = vrcp.f32 %v9375_v22  ;;  %v9378_v58 = vpop.xlane.xlu1 %9377  ;;  %13803 = vmatprep.subr.mxu0 %v16750_v53  ;;  %v16780_v22 = vld [vmem:[#allocation12_spill] sm:$0xff] }
 0xe92   :  { %14204 = vrcp.f32 %v9378_v58  ;;  %v16781_v58 = vld [vmem:[#allocation11_spill] sm:$0xff] }
 0xe93   :  { %13796 = vmatmul.mubr.msk.f32.vlgmr.msra.gmra.mxu0 %vm3333_vm7, %v9451_v8 }
 0xe94   :  { %13804 = vmatpush3.msk.msra.mxu0 %vm3337_vm5, %v16073_v49  ;;  %v9381_v10 = vpop.xlane.xlu0 %9380  ;;  %13805 = vmatprep.mubr.msk.f32.mxu0 %vm14263_vm3, %v16750_v53 }
 0xe95   :  { %14206 = vrcp.f32 %v9381_v10  ;;  %v9384_v62 = vpop.xlane.xlu1 %9383  ;;  %13813 = vmatprep.subr.mxu0 %v16750_v53 }
 0xe96   :  { %v14197_v29 = vpop.eup %14196  ;;  %14208 = vrcp.f32 %v9384_v62 }
 0xe97   :  { %v9453_v40 = vmul.f32 %v14197_v29, %v16244_v36 }
 0xe98   :  { %v14199_v41 = vpop.eup %14198  ;;  %v9387_v11 = vpop.xlane.xlu0 %9386 }
 0xe99   :  { %v9455_v51 = vmul.f32 %v14199_v41, %v16248_v17  ;;  %14210 = vrcp.f32 %v9387_v11  ;;  %v9390_v48 = vpop.xlane.xlu1 %9389  ;;  %13801 = vmatmul.mubr.msk.f32.vlgmr.msra.gmra.mxu1 %vm3333_vm7, %v9453_v40  ;;  %v16783_v41 = vld [vmem:[#allocation13_spill] sm:$0xff] }
 0xe9a   :  { %v14201_v49 = vpop.eup %14200  ;;  %14212 = vrcp.f32 %v9390_v48  ;;  %13809 = vmatpush3.msk.msra.mxu1 %vm3337_vm5, %v16075_v32  ;;  %13810 = vmatprep.mubr.msk.f32.mxu1 %vm14263_vm3, %v16750_v53 }
 0xe9b   :  { %13806 = vmatmul.mubr.msk.f32.vlgmr.msra.gmra.mxu0 %vm3333_vm7, %v9455_v51  ;;  %13818 = vmatprep.subr.mxu1 %v16750_v53  ;;  %v9457_v36 = vmul.f32 %v14201_v49, %v16254_v1 }
 0xe9c   :  { %13814 = vmatpush3.msk.msra.mxu0 %vm3337_vm5, %v16177_v14  ;;  %v9393_v17 = vpop.xlane.xlu0 %9392  ;;  %13815 = vmatprep.mubr.msk.f32.mxu0 %vm14263_vm3, %v16750_v53 }
 0xe9d   :  { %14214 = vrcp.f32 %v9393_v17  ;;  %v9396_v50 = vpop.xlane.xlu1 %9395  ;;  %13811 = vmatmul.mubr.msk.f32.vlgmr.msra.gmra.mxu1 %vm3333_vm7, %v9457_v36  ;;  %13823 = vmatprep.subr.mxu0 %v16750_v53  ;;  %v16785_v36 = vld [vmem:[#allocation14_spill] sm:$0xff] }
 0xe9e   :  { %v14203_v32 = vpop.eup %14202  ;;  %14216 = vrcp.f32 %v9396_v50  ;;  %13819 = vmatpush3.msk.msra.mxu1 %vm3337_vm5, %v16091_v43  ;;  %13820 = vmatprep.mubr.msk.f32.mxu1 %vm14263_vm3, %v16750_v53 }
 0xe9f   :  { %v14205_v1 = vpop.eup %14204  ;;  %v9459_v14 = vmul.f32 %v14203_v32, %v16260_v54  ;;  %13828 = vmatprep.subr.mxu1 %v16750_v53 }
 0xea0   :  { %v9399_v15 = vpop.xlane.xlu0 %9398  ;;  %v9461_v34 = vmul.f32 %v14205_v1, %v16262_v35 }
 0xea1   :  { %14218 = vrcp.f32 %v9399_v15  ;;  %v9402_v31 = vpop.xlane.xlu1 %9401  ;;  %13816 = vmatmul.mubr.msk.f32.vlgmr.msra.gmra.mxu0 %vm3333_vm7, %v9459_v14 }
 0xea2   :  { %v14207_v33 = vpop.eup %14206  ;;  %14220 = vrcp.f32 %v9402_v31  ;;  %13821 = vmatmul.mubr.msk.f32.vlgmr.msra.gmra.mxu1 %vm3333_vm7, %v9461_v34  ;;  %13824 = vmatpush3.msk.msra.mxu0 %vm3337_vm5, %v16089_v39 }
 0xea3   :  { %v14209_v43 = vpop.eup %14208  ;;  %v9463_v47 = vmul.f32 %v14207_v33, %v16270_v42  ;;  %13829 = vmatpush3.msk.msra.mxu1 %vm3337_vm5, %v16107_v63  ;;  %13825 = vmatprep.mubr.msk.f32.mxu0 %vm14263_vm3, %v16750_v53 }
 0xea4   :  { %v9465_v54 = vmul.f32 %v14209_v43, %v16272_v27  ;;  %13833 = vmatprep.subr.mxu0 %v16750_v53  ;;  %v9405_v35 = vpop.xlane.xlu0 %9404  ;;  %13830 = vmatprep.mubr.msk.f32.mxu1 %vm14263_vm3, %v16750_v53 }
 0xea5   :  { %14222 = vrcp.f32 %v9405_v35  ;;  %13838 = vmatprep.subr.mxu1 %v16750_v53  ;;  %v9408_v39 = vpop.xlane.xlu1 %9407  ;;  %13826 = vmatmul.mubr.msk.f32.vlgmr.msra.gmra.mxu0 %vm3333_vm7, %v9463_v47 }
 0xea6   :  { %v14211_v42 = vpop.eup %14210  ;;  %14224 = vrcp.f32 %v9408_v39  ;;  %13831 = vmatmul.mubr.msk.f32.vlgmr.msra.gmra.mxu1 %vm3333_vm7, %v9465_v54  ;;  %13834 = vmatpush3.msk.msra.mxu0 %vm3337_vm5, %v16105_v24 }
 0xea7   :  { %v14213_v63 = vpop.eup %14212  ;;  %v9467_v27 = vmul.f32 %v14211_v42, %v16280_v13  ;;  %13839 = vmatpush3.msk.msra.mxu1 %vm3337_vm5, %v16123_v44  ;;  %13835 = vmatprep.mubr.msk.f32.mxu0 %vm14263_vm3, %v16750_v53 }
 0xea8   :  { %v9469_v5 = vmul.f32 %v14213_v63, %v16282_v16  ;;  %13843 = vmatprep.subr.mxu0 %v16750_v53  ;;  %v9411_v57 = vpop.xlane.xlu0 %9410  ;;  %13840 = vmatprep.mubr.msk.f32.mxu1 %vm14263_vm3, %v16750_v53 }
 0xea9   :  { %14226 = vrcp.f32 %v9411_v57  ;;  %13848 = vmatprep.subr.mxu1 %v16750_v53  ;;  %v9414_v24 = vpop.xlane.xlu1 %9413  ;;  %13836 = vmatmul.mubr.msk.f32.vlgmr.msra.gmra.mxu0 %vm3333_vm7, %v9467_v27 }
 0xeaa   :  { %v14215_v13 = vpop.eup %14214  ;;  %14228 = vrcp.f32 %v9414_v24  ;;  %13841 = vmatmul.mubr.msk.f32.vlgmr.msra.gmra.mxu1 %vm3333_vm7, %v9469_v5  ;;  %13844 = vmatpush3.msk.msra.mxu0 %vm3337_vm5, %v16121_v18 }
 0xeab   :  { %v14217_v44 = vpop.eup %14216  ;;  %v9471_v16 = vmul.f32 %v14215_v13, %v16290_v52  ;;  %13849 = vmatpush3.msk.msra.mxu1 %vm3337_vm5, %v16777_v21  ;;  %13845 = vmatprep.mubr.msk.f32.mxu0 %vm14263_vm3, %v16750_v53  ;;  %v16787_v13 = vld [vmem:[#allocation5_spill] sm:$0xff] }
 0xeac   :  { %v9473_v61 = vmul.f32 %v14217_v44, %v16292_v2  ;;  %13853 = vmatprep.subr.mxu0 %v16750_v53  ;;  %v9417_v59 = vpop.xlane.xlu0 %9416  ;;  %13850 = vmatprep.mubr.msk.f32.mxu1 %vm14263_vm3, %v16750_v53 }
 0xead   :  { %14230 = vrcp.f32 %v9417_v59  ;;  %13858 = vmatprep.subr.mxu1 %v16750_v53  ;;  %v9420_v18 = vpop.xlane.xlu1 %9419  ;;  %13846 = vmatmul.mubr.msk.f32.vlgmr.msra.gmra.mxu0 %vm3333_vm7, %v9471_v16 }
 0xeae   :  { %v14219_v52 = vpop.eup %14218  ;;  %14232 = vrcp.f32 %v9420_v18  ;;  %13851 = vmatmul.mubr.msk.f32.vlgmr.msra.gmra.mxu1 %vm3333_vm7, %v9473_v61  ;;  %13854 = vmatpush3.msk.msra.mxu0 %vm3337_vm5, %v16778_v6 }
 0xeaf   :  { %v14221_v2 = vpop.eup %14220  ;;  %v9475_v30 = vmul.f32 %v14219_v52, %v16300_v25  ;;  %13859 = vmatpush3.msk.msra.mxu1 %vm3337_vm5, %v16779_v12  ;;  %13855 = vmatprep.mubr.msk.f32.mxu0 %vm14263_vm3, %v16750_v53 }
 0xeb0   :  { %v9477_v45 = vmul.f32 %v14221_v2, %v16302_v3  ;;  %13863 = vmatprep.subr.mxu0 %v16750_v53  ;;  %v9423_v56 = vpop.xlane.xlu0 %9422  ;;  %13860 = vmatprep.mubr.msk.f32.mxu1 %vm14263_vm3, %v16750_v53 }
 0xeb1   :  { %14234 = vrcp.f32 %v9423_v56  ;;  %13868 = vmatprep.subr.mxu1 %v16750_v53  ;;  %v9426_v28 = vpop.xlane.xlu1 %9425  ;;  %13856 = vmatmul.mubr.msk.f32.vlgmr.msra.gmra.mxu0 %vm3333_vm7, %v9475_v30 }
 0xeb2   :  { %v14223_v25 = vpop.eup %14222  ;;  %14236 = vrcp.f32 %v9426_v28  ;;  %13861 = vmatmul.mubr.msk.f32.vlgmr.msra.gmra.mxu1 %vm3333_vm7, %v9477_v45  ;;  %13864 = vmatpush3.msk.msra.mxu0 %vm3337_vm5, %v16780_v22 }
 0xeb3   :  { %v14225_v3 = vpop.eup %14224  ;;  %v9479_v8 = vmul.f32 %v14223_v25, %v16308_v23  ;;  %13869 = vmatpush3.msk.msra.mxu1 %vm3337_vm5, %v16781_v58  ;;  %13865 = vmatprep.mubr.msk.f32.mxu0 %vm14263_vm3, %v16750_v53  ;;  %v16782_v23 = vld [vmem:[#allocation16_spill] sm:$0xff] }
 0xeb4   :  { %v9481_v10 = vmul.f32 %v14225_v3, %v16311_v0  ;;  %13873 = vmatprep.subr.mxu0 %v16750_v53  ;;  %13870 = vmatprep.mubr.msk.f32.mxu1 %vm14263_vm3, %v16750_v53 }
 0xeb5   :  { %v9429_v62 = vpop.xlane.xlu0 %9428  ;;  %13878 = vmatprep.subr.mxu1 %v16750_v53  ;;  %13866 = vmatmul.mubr.msk.f32.vlgmr.msra.gmra.mxu0 %vm3333_vm7, %v9479_v8 }
 0xeb6   :  { %v14227_v29 = vpop.eup %14226  ;;  %14238 = vrcp.f32 %v9429_v62  ;;  %13871 = vmatmul.mubr.msk.f32.vlgmr.msra.gmra.mxu1 %vm3333_vm7, %v9481_v10  ;;  %13874 = vmatpush3.msk.msra.mxu0 %vm3337_vm5, %v16782_v23 }
 0xeb7   :  { %v14229_v40 = vpop.eup %14228  ;;  %v9483_v0 = vmul.f32 %v14227_v29, %v16317_v19  ;;  %13879 = vmatpush3.msk.msra.mxu1 %vm3337_vm5, %v16783_v41  ;;  %13875 = vmatprep.mubr.msk.f32.mxu0 %vm14263_vm3, %v16750_v53  ;;  %v16784_v19 = vld [vmem:[#allocation6_spill] sm:$0xff] }
 0xeb8   :  { %v9485_v11 = vmul.f32 %v14229_v40, %v16319_v7  ;;  %13880 = vmatprep.mubr.msk.f32.mxu1 %vm14263_vm3, %v16750_v53  ;;  %13883 = vmatprep.subr.mxu0 %v16750_v53 }
 0xeb9   :  { %13888 = vmatprep.subr.mxu1 %v16750_v53  ;;  %13876 = vmatmul.mubr.msk.f32.vlgmr.msra.gmra.mxu0 %vm3333_vm7, %v9483_v0 }
 0xeba   :  { %v14231_v51 = vpop.eup %14230  ;;  %13881 = vmatmul.mubr.msk.f32.vlgmr.msra.gmra.mxu1 %vm3333_vm7, %v9485_v11  ;;  %13884 = vmatpush3.msk.msra.mxu0 %vm3337_vm5, %v16784_v19 }
 0xebb   :  { %v14233_v48 = vpop.eup %14232  ;;  %v9487_v49 = vmul.f32 %v14231_v51, %v16325_v20  ;;  %13889 = vmatpush3.msk.msra.mxu1 %vm3337_vm5, %v16785_v36  ;;  %13885 = vmatprep.mubr.msk.f32.mxu0 %vm14263_vm3, %v16750_v53  ;;  %v16786_v20 = vld [vmem:[#allocation17_spill] sm:$0xff] }
 0xebc   :  { %v9489_v7 = vmul.f32 %v14233_v48, %v16327_v4  ;;  %13890 = vmatprep.mubr.msk.f32.mxu1 %vm14263_vm3, %v16750_v53  ;;  %13893 = vmatprep.subr.mxu0 %v16750_v53 }
 0xebd   :  { %13898 = vmatprep.subr.mxu1 %v16750_v53  ;;  %13886 = vmatmul.mubr.msk.f32.vlgmr.msra.gmra.mxu0 %vm3333_vm7, %v9487_v49 }
 0xebe   :  { %v14235_v17 = vpop.eup %14234  ;;  %13891 = vmatmul.mubr.msk.f32.vlgmr.msra.gmra.mxu1 %vm3333_vm7, %v9489_v7  ;;  %13894 = vmatpush3.msk.msra.mxu0 %vm3337_vm5, %v16786_v20 }
 0xebf   :  { %v14237_v50 = vpop.eup %14236  ;;  %v9491_v32 = vmul.f32 %v14235_v17, %v16333_v60  ;;  %13899 = vmatpush3.msk.msra.mxu1 %vm3337_vm5, %v16380_v38  ;;  %13895 = vmatprep.mubr.msk.f32.mxu0 %vm14263_vm3, %v16750_v53 }
 0xec0   :  { %v9493_v4 = vmul.f32 %v14237_v50, %v16335_v26  ;;  %13900 = vmatprep.mubr.msk.f32.mxu1 %vm14263_vm3, %v16750_v53  ;;  %13903 = vmatprep.subr.mxu0 %v16750_v53 }
 0xec1   :  { %13896 = vmatmul.mubr.msk.f32.vlgmr.msra.gmra.mxu0 %vm3333_vm7, %v9491_v32  ;;  %13908 = vmatprep.subr.mxu1 %v16750_v53 }
 0xec2   :  { %13901 = vmatmul.mubr.msk.f32.vlgmr.msra.gmra.mxu1 %vm3333_vm7, %v9493_v4  ;;  %13904 = vmatpush3.msk.msra.mxu0 %vm3337_vm5, %v16378_v46 }
 0xec3   :  { %v14239_v60 = vpop.eup %14238  ;;  %13905 = vmatprep.mubr.msk.f32.mxu0 %vm14263_vm3, %v16750_v53  ;;  %13913 = vmatprep.subr.mxu0 %v16750_v53 }
 0xec4   :  { %v9495_v26 = vmul.f32 %v14239_v60, %v16341_v55  ;;  %13910 = vmatprep.mubr.msk.f32.mxu1 %vm14263_vm3, %v16750_v53 }
 0xec6   :  { %13906 = vmatmul.mubr.msk.f32.vlgmr.msra.gmra.mxu0 %vm3333_vm7, %v9495_v26 }
 0xec7   :  { %13915 = vmatprep.mubr.msk.f32.mxu0 %vm14263_vm3, %v16750_v53 }
 0xee0   :  { %v9432_v38 = vpop.xlane.xlu1 %9431 }
 0xee1   :  { %14240 = vrcp.f32 %v9432_v38 }
 0xee2   :  { %v9435_v1 = vpop.xlane.xlu0 %9434 }
 0xee3   :  { %14242 = vrcp.f32 %v9435_v1 }
 0xee4   :  { %v11888_v46 = vpop.permute.xlu1 %11887 }
 0xee5   :  { %13914 = vmatpush3.msk.msra.mxu0 %vm3337_vm5, %v11888_v46 }
 0xee6   :  { %v11811_v14 = vpop.permute.xlu0 %11810 }
 0xee7   :  { %13909 = vmatpush3.msk.msra.mxu1 %vm3337_vm5, %v11811_v14 }
 0xeee   :  { %v14241_v15 = vpop.eup %14240 }
 0xeef   :  { %v9497_v55 = vmul.f32 %v14241_v15, %v16368_v37 }
 0xef0   :  { %v14243_v34 = vpop.eup %14242 }
 0xef1   :  { %v9499_v31 = vmul.f32 %v14243_v34, %v16372_v9  ;;  %13911 = vmatmul.mubr.msk.f32.vlgmr.msra.gmra.mxu1 %vm3333_vm7, %v9497_v55 }
 0xef3   :  { %13916 = vmatmul.mubr.msk.f32.vlgmr.msra.gmra.mxu0 %vm3333_vm7, %v9499_v31 }
 0xf0c   :  { %v9573_v33 = vpop.f32.mrf.mxu1 }
 0xf0e   :  { %v13762_v43 = vpop.f32.mrf.mxu1 }
 0xf10   :  { %v9727_v47 = vpop.f32.mrf.mxu1 }
 0xf12   :  { %v9650_v54 = vpop.f32.mrf.mxu0  ;;  %v13772_v35 = vpop.f32.mrf.mxu1 }
 0xf13   :  { %v11972_v63 = vcombine.low %v9573_v33, %v9650_v54 }
 0xf14   :  { %v13767_v39 = vpop.f32.mrf.mxu0 }
 0xf15   :  { %v11980_v44 = vrot.slane %v11972_v63, %v16787_v13 }
 0xf49   :  { %v9881_v42 = vpop.f32.mrf.mxu1 }
 0xf4b   :  { %v9804_v27 = vpop.f32.mrf.mxu0  ;;  %v13782_v5 = vpop.f32.mrf.mxu1 }
 0xf4c   :  { %v11973_v57 = vcombine.low %v9727_v47, %v9804_v27 }
 0xf4d   :  { %v13777_v24 = vpop.f32.mrf.mxu0  ;;  %v10035_v37 = vpop.f32.mrf.mxu1 }
 0xf4e   :  { %v11987_v9 = vrot.slane %v11973_v57, %v16787_v13 }
 0xf4f   :  { %v9958_v16 = vpop.f32.mrf.mxu0  ;;  %v13792_v21 = vpop.f32.mrf.mxu1 }
 0xf50   :  { %v11988_v61 = vcombine.low %v11980_v44, %v11987_v9  ;;  %v11989_v18 = vcombine.low %v9881_v42, %v9958_v16 }
 0xf51   :  { %v13787_v59 = vpop.f32.mrf.mxu0 }
 0xf52   :  { %12008 = vst.msk [vmem:[#allocation3] sm:$0xff] %vm516_vm4, %v11988_v61  ;;  %v11997_v30 = vrot.slane %v11989_v18, %v16787_v13 }
 0xf53   :  { %v10112_v52 = vpop.f32.mrf.mxu0 }
 0xf54   :  { %v11990_v6 = vcombine.low %v10035_v37, %v10112_v52 }
 0xf55   :  { %v13797_v2 = vpop.f32.mrf.mxu0 }
 0xf56   :  { %v12004_v12 = vrot.slane %v11990_v6, %v16787_v13 }
 0xf58   :  { %v12005_v45 = vcombine.low %v11997_v30, %v12004_v12 }
 0xf59   :  { %v10189_v56 = vpop.f32.mrf.mxu1 }
 0xf5a   :  { %12009 = vst.msk [vmem:[#allocation3 + $0x8] sm:$0xff] %vm516_vm4, %v12005_v45 }
 0xf5b   :  { %v13802_v28 = vpop.f32.mrf.mxu1  ;;  %v10266_v25 = vpop.f32.mrf.mxu0 }
 0xf5c   :  { %v12018_v58 = vcombine.low %v10189_v56, %v10266_v25 }
 0xf5d   :  { %v13807_v22 = vpop.f32.mrf.mxu0  ;;  %v10343_v3 = vpop.f32.mrf.mxu1 }
 0xf5e   :  { %v12026_v40 = vrot.slane %v12018_v58, %v16787_v13 }
 0xf5f   :  { %v13812_v8 = vpop.f32.mrf.mxu1 }
 0xf61   :  { %v10420_v10 = vpop.f32.mrf.mxu0 }
 0xf62   :  { %v12019_v62 = vcombine.low %v10343_v3, %v10420_v10  ;;  %v10497_v29 = vpop.f32.mrf.mxu1  ;;  %v12736_v10 = vld [vmem:[%s16712_s4 + $0x38] sm:$0xff] }
 0xf63   :  { %v13817_v23 = vpop.f32.mrf.mxu0  ;;  %13918 = vmatprep.subr.mxu1 %v12736_v10 }
 0xf64   :  { %v12033_v0 = vrot.slane %v12019_v62, %v16787_v13  ;;  %v13822_v41 = vpop.f32.mrf.mxu1  ;;  %v12735_v62 = vld [vmem:[%s16712_s4 + $0x30] sm:$0xff]  ;;  %13919 = vmatpush3.msra.mxu1 %v12736_v10 }
 0xf65   :  { %v10574_v11 = vpop.f32.mrf.mxu0  ;;  %13920 = vmatprep.subr.mxu1 %v12735_v62 }
 0xf66   :  { %v12034_v51 = vcombine.low %v12026_v40, %v12033_v0  ;;  %v10651_v19 = vpop.f32.mrf.mxu1  ;;  %v12035_v49 = vcombine.low %v10497_v29, %v10574_v11  ;;  %v12734_v29 = vld [vmem:[%s16712_s4 + $0x28] sm:$0xff]  ;;  %13921 = vmatpush3.msra.mxu1 %v12735_v62  ;;  %v12733_v40 = vld [vmem:[%s16712_s4 + $0x20] sm:$0xff] }
 0xf67   :  { %v13827_v48 = vpop.f32.mrf.mxu0  ;;  %13922 = vmatprep.subr.mxu1 %v12734_v29 }
 0xf68   :  { %v13832_v36 = vpop.f32.mrf.mxu1  ;;  %12052 = vrot.lane.b32.xlu0 %v12034_v51, %s14266_s23  ;;  %v12043_v32 = vrot.slane %v12035_v49, %v16787_v13  ;;  %13923 = vmatpush3.msra.mxu1 %v12734_v29 }
 0xf69   :  { %v10728_v7 = vpop.f32.mrf.mxu0  ;;  %13924 = vmatprep.subr.mxu1 %v12733_v40 }
 0xf6a   :  { %v12036_v17 = vcombine.low %v10651_v19, %v10728_v7  ;;  %v10805_v20 = vpop.f32.mrf.mxu1  ;;  %13925 = vmatpush3.msra.mxu1 %v12733_v40 }
 0xf6b   :  { %v13837_v50 = vpop.f32.mrf.mxu0 }
 0xf6c   :  { %v12050_v4 = vrot.slane %v12036_v17, %v16787_v13  ;;  %v13842_v60 = vpop.f32.mrf.mxu1 }
 0xf6d   :  { %v10882_v26 = vpop.f32.mrf.mxu0 }
 0xf6e   :  { %v12051_v38 = vcombine.low %v12043_v32, %v12050_v4  ;;  %v10959_v1 = vpop.f32.mrf.mxu1  ;;  %v12068_v14 = vcombine.low %v10805_v20, %v10882_v26  ;;  %v16618_v26 = vld [vmem:[%s16711_s7 + $0x8] sm:$0xff] }
 0xf6f   :  { %v13847_v46 = vpop.f32.mrf.mxu0 }
 0xf70   :  { %v13852_v15 = vpop.f32.mrf.mxu1  ;;  %12054 = vrot.lane.b32.xlu1 %v12051_v38, %s14266_s23  ;;  %v12076_v43 = vrot.slane %v12068_v14, %v16787_v13  ;;  %v16788_v38 = vld [vmem:[#allocation4_spill] sm:$0xff] }
 0xf71   :  { %v11036_v55 = vpop.f32.mrf.mxu0  ;;  %v16793_v10 = vsub.s32 3, %v16788_v38 }
 0xf72   :  { %v12069_v34 = vcombine.low %v10959_v1, %v11036_v55  ;;  %v11113_v31 = vpop.f32.mrf.mxu1  ;;  %v16789_v1 = vsub.s32 1, %v16788_v38 }
 0xf73   :  { %v13857_v33 = vpop.f32.mrf.mxu0  ;;  %v12284_v62 = vrot.slane %v16618_v26, %v16793_v10 }
 0xf74   :  { %v12083_v47 = vrot.slane %v12069_v34, %v16787_v13  ;;  %v13862_v54 = vpop.f32.mrf.mxu1  ;;  %v12165_v46 = vrot.slane %v16618_v26, %v16789_v1  ;;  %v16790_v34 = vld [vmem:[#allocation9_spill] sm:$0xff] }
 0xf75   :  { %v11190_v35 = vpop.f32.mrf.mxu0 }
 0xf76   :  { %v12084_v39 = vcombine.low %v12076_v43, %v12083_v47  ;;  %v11267_v42 = vpop.f32.mrf.mxu1  ;;  %v12085_v27 = vcombine.low %v11113_v31, %v11190_v35  ;;  %v16791_v43 = vld [vmem:[#allocation15_spill] sm:$0xff] }
 0xf77   :  { %v13867_v63 = vpop.f32.mrf.mxu0 }
 0xf78   :  { %v13872_v5 = vpop.f32.mrf.mxu1  ;;  %12102 = vrot.lane.b32.xlu0 %v12084_v39, %s14267_s24  ;;  %v12093_v9 = vrot.slane %v12085_v27, %v16787_v13 }
 0xf79   :  { %v11344_v57 = vpop.f32.mrf.mxu0 }
 0xf7a   :  { %v12086_v24 = vcombine.low %v11267_v42, %v11344_v57  ;;  %v11421_v37 = vpop.f32.mrf.mxu1 }
 0xf7b   :  { %v13877_v44 = vpop.f32.mrf.mxu0 }
 0xf7c   :  { %v12100_v16 = vrot.slane %v12086_v24, %v16787_v13  ;;  %v13882_v21 = vpop.f32.mrf.mxu1 }
 0xf7d   :  { %v11498_v61 = vpop.f32.mrf.mxu0  ;;  %v12739_v21 = vld [vmem:[%s16713_s5 + $0x30] sm:$0xff] }
 0xf7e   :  { %v12101_v59 = vcombine.low %v12093_v9, %v12100_v16  ;;  %v11575_v18 = vpop.f32.mrf.mxu1  ;;  %v12118_v6 = vcombine.low %v11421_v37, %v11498_v61  ;;  %v12740_v16 = vld [vmem:[%s16713_s5 + $0x38] sm:$0xff]  ;;  %v12738_v61 = vld [vmem:[%s16713_s5 + $0x28] sm:$0xff] }
 0xf7f   :  { %v13887_v52 = vpop.f32.mrf.mxu0  ;;  %13929 = vmatprep.subr.mxu0 %v12740_v16 }
 0xf80   :  { %v13892_v2 = vpop.f32.mrf.mxu1  ;;  %12104 = vrot.lane.b32.xlu1 %v12101_v59, %s14267_s24  ;;  %v12126_v28 = vrot.slane %v12118_v6, %v16787_v13  ;;  %13930 = vmatpush3.msra.mxu0 %v12740_v16  ;;  %v12737_v59 = vld [vmem:[%s16713_s5 + $0x20] sm:$0xff]  ;;  %v12747_v52 = vld [vmem:[%s16714_s6 + $0x70] sm:$0xff]  ;;  %v12746_v6 = vld [vmem:[%s16714_s6 + $0x68] sm:$0xff] }
 0xf81   :  { %v11652_v30 = vpop.f32.mrf.mxu0  ;;  %13931 = vmatprep.subr.mxu0 %v12739_v21  ;;  %v12745_v2 = vld [vmem:[%s16714_s6 + $0x60] sm:$0xff] }
 0xf82   :  { %v12119_v12 = vcombine.low %v11575_v18, %v11652_v30  ;;  %v11729_v45 = vpop.f32.mrf.mxu1  ;;  %13932 = vmatpush3.msra.mxu0 %v12739_v21  ;;  %v12748_v18 = vld [vmem:[%s16714_s6 + $0x78] sm:$0xff] }
 0xf83   :  { %v13897_v56 = vpop.f32.mrf.mxu0  ;;  %13933 = vmatprep.subr.mxu0 %v12738_v61  ;;  %13940 = vmatprep.subr.mxu1 %v12748_v18 }
 0xf84   :  { %v12133_v25 = vrot.slane %v12119_v12, %v16787_v13  ;;  %v13902_v22 = vpop.f32.mrf.mxu1  ;;  %13934 = vmatpush3.msra.mxu0 %v12738_v61 }
 0xf85   :  { %13935 = vmatprep.subr.mxu0 %v12737_v59  ;;  %v16792_v22 = vsub.s32 2, %v16788_v38 }
 0xf86   :  { %v12134_v3 = vcombine.low %v12126_v28, %v12133_v25  ;;  %v11806_v8 = vpop.f32.mrf.mxu0  ;;  %13936 = vmatpush3.msra.mxu0 %v12737_v59 }
 0xf87   :  { %v12135_v0 = vcombine.low %v11729_v45, %v11806_v8  ;;  %13959 = vmatprep.subr.mxu0 %v16750_v53 }
 0xf88   :  { %v13907_v58 = vpop.f32.mrf.mxu0  ;;  %12152 = vrot.lane.b32.xlu0 %v12134_v3, %s14268_s25  ;;  %v12278_v3 = vrot.slane %v16618_v26, %v16792_v22 }
 0xf89   :  { %v12143_v48 = vrot.slane %v12135_v0, %v16787_v13 }
 0xfb1   :  { %v11883_v23 = vpop.f32.mrf.mxu1 }
 0xfb3   :  { %v13912_v41 = vpop.f32.mrf.mxu1  ;;  %v11960_v11 = vpop.f32.mrf.mxu0 }
 0xfb4   :  { %v12136_v51 = vcombine.low %v11883_v23, %v11960_v11 }
 0xfb5   :  { %v13917_v19 = vpop.f32.mrf.mxu0 }
 0xfb6   :  { %v12150_v49 = vrot.slane %v12136_v51, %v16787_v13  ;;  %v12744_v51 = vld [vmem:[%s16714_s6 + $0x58] sm:$0xff]  ;;  %v12743_v19 = vld [vmem:[%s16714_s6 + $0x50] sm:$0xff] }
 0xfb8   :  { %v12151_v36 = vcombine.low %v12143_v48, %v12150_v49  ;;  %v12742_v48 = vld [vmem:[%s16714_s6 + $0x48] sm:$0xff]  ;;  %v12741_v49 = vld [vmem:[%s16714_s6 + $0x40] sm:$0xff] }
 0xfba   :  { %12154 = vrot.lane.b32.xlu1 %v12151_v36, %s14268_s25  ;;  %v16794_v36 = vsub.s32 6, %v16788_v38 }
 0xfda   :  { %v12053_v7 = vpop.permute.xlu0 %12052 }
 0xfdb   :  { %12058 = vst.msk [vmem:[#allocation3] sm:$0xff] %vm5891_vm8, %v12053_v7  ;;  %v12290_v7 = vrot.slane %v16618_v26, %v16794_v36 }
 0xfe2   :  { %v12055_v17 = vpop.permute.xlu1 %12054 }
 0xfe3   :  { %12059 = vst.msk [vmem:[#allocation3 + $0x8] sm:$0xff] %vm5891_vm8, %v12055_v17 }
 0xfea   :  { %v12103_v20 = vpop.permute.xlu0 %12102 }
 0xfeb   :  { %12108 = vst.msk [vmem:[#allocation3] sm:$0xff] %vm5942_vm9, %v12103_v20 }
 0xff2   :  { %v12105_v50 = vpop.permute.xlu1 %12104 }
 0xff3   :  { %12109 = vst.msk [vmem:[#allocation3 + $0x8] sm:$0xff] %vm5942_vm9, %v12105_v50 }
 0xffa   :  { %v12153_v32 = vpop.permute.xlu0 %12152 }
 0xffb   :  { %12158 = vst.msk [vmem:[#allocation3] sm:$0xff] %vm5993_vm10, %v12153_v32 }
0x1002   :  { %v12160_v4 = vld [vmem:[#allocation3] sm:$0xff] }
0x1003   :  { %13926 = vmatprep.mubr.msk.f32.mxu1 %vm191_vm1, %v12160_v4 }
0x102c   :  { %v12155_v13 = vpop.permute.xlu1 %12154 }
0x102d   :  { %12159 = vst.msk [vmem:[#allocation3 + $0x8] sm:$0xff] %vm5993_vm10, %v12155_v13 }
0x1034   :  { %v12161_v60 = vld [vmem:[#allocation3 + $0x8] sm:$0xff] }
0x1035   :  { %13927 = vmatmul.mubr.msk.f32.vlgmr.msra.gmra.mxu1 %vm191_vm1, %v12161_v60  ;;  %v16795_v60 = vsub.s32 7, %v16788_v38 }
0x1036   :  { %13941 = vmatpush3.msra.mxu1 %v12748_v18 }
0x1037   :  { %13942 = vmatprep.subr.mxu1 %v12747_v52  ;;  %v12377_v1 = vrot.slane %v16618_v26, %v16795_v60 }
0x1038   :  { %13943 = vmatpush3.msra.mxu1 %v12747_v52  ;;  %v16796_v52 = vsub.s32 4, %v16788_v38 }
0x1039   :  { %13944 = vmatprep.subr.mxu1 %v12746_v6 }
0x103a   :  { %13945 = vmatpush3.msra.mxu1 %v12746_v6  ;;  %v12490_v6 = vrot.slane %v16618_v26, %v16796_v52 }
0x103b   :  { %13946 = vmatprep.subr.mxu1 %v12745_v2 }
0x103c   :  { %13947 = vmatpush3.msra.mxu1 %v12745_v2 }
0x103d   :  { %13948 = vmatprep.subr.mxu1 %v12744_v51 }
0x103e   :  { %13949 = vmatpush3.msra.mxu1 %v12744_v51 }
0x103f   :  { %13950 = vmatprep.subr.mxu1 %v12743_v19 }
0x1040   :  { %13951 = vmatpush3.msra.mxu1 %v12743_v19 }
0x1041   :  { %13952 = vmatprep.subr.mxu1 %v12742_v48 }
0x1042   :  { %13953 = vmatpush3.msra.mxu1 %v12742_v48 }
0x1043   :  { %13954 = vmatprep.subr.mxu1 %v12741_v49 }
0x1044   :  { %13955 = vmatpush3.msra.mxu1 %v12741_v49 }
0x10f5   :  { %v13928_v14 = vpop.f32.mrf.mxu1 }
0x10f6   :  { %v12244_v15 = vadd.f32 %v13928_v14, %v12165_v46 }
0x10f7   :  { %v12238_v55 = vpop.f32.mrf.mxu1 }
0x10f8   :  { %v12248_v31 = vadd.f32 %v12244_v15, %v16790_v34  ;;  %v12239_v33 = vadd.f32 %v12238_v55, %v12165_v46 }
0x10fa   :  { %v12247_v47 = vadd.f32 %v12239_v33, %v16791_v43  ;;  %v12252_v54 = vsel %vm191_vm1, %v12248_v31, 0.0 }
0x10fb   :  { %12253 = vadd.xlane.f32.xlu1 %v12252_v54 }
0x10fc   :  { %v12249_v35 = vsel %vm191_vm1, %v12247_v47, 0.0 }
0x10fd   :  { %12250 = vadd.xlane.f32.xlu0 %v12249_v35 }
0x1184   :  { %v12254_v39 = vpop.xlane.xlu1 %12253 }
0x1185   :  { %v12256_v42 = vmul.f32 0.03125, %v12254_v39 }
0x1186   :  { %v12251_v63 = vpop.xlane.xlu0 %12250 }
0x1187   :  { %v12255_v27 = vmul.f32 0.03125, %v12251_v63  ;;  %v12258_v5 = vsub.f32 %v12248_v31, %v12256_v42 }
0x1189   :  { %v12257_v57 = vsub.f32 %v12247_v47, %v12255_v27  ;;  %v12260_v44 = vmul.f32 %v12258_v5, %v12258_v5 }
0x118b   :  { %v12259_v24 = vmul.f32 %v12257_v57, %v12257_v57  ;;  %v12264_v9 = vsel %vm191_vm1, %v12260_v44, 0.0  ;;  %v14269_v44 = vmov 0  }
0x118c   :  { %13978 = vset.pattern.permute.xlu1 %v14269_v44  ;;  %13979 = vset.pattern.permute.xlu0 %v14269_v44 }
0x118d   :  { %v12261_v37 = vsel %vm191_vm1, %v12259_v24, 0.0 }
0x118e   :  { %12262 = vadd.xlane.f32.xlu0 %v12261_v37  ;;  %v12500_v37 = vld [vmem:[%s16715_s8 + $0x1] sm:$0x1] }
0x1192   :  { %12265 = vadd.xlane.f32.xlu0 %v12264_v9 }
0x1217   :  { %v12263_v30 = vpop.xlane.xlu0 %12262 }
0x1218   :  { %v12267_v12 = vmul.f32 0.03125, %v12263_v30  ;;  %v16797_v30 = vsub.s32 5, %v16788_v38 }
0x121a   :  { %v12269_v45 = vadd.f32 1e-05, %v12267_v12  ;;  %v12496_v12 = vrot.slane %v16618_v26, %v16797_v30 }
0x121b   :  { %v12266_v56 = vpop.xlane.xlu0 %12265 }
0x121c   :  { %14244 = vrsqrt.f32 %v12269_v45  ;;  %v12268_v28 = vmul.f32 0.03125, %v12266_v56 }
0x121e   :  { %v12270_v25 = vadd.f32 1e-05, %v12268_v28 }
0x1220   :  { %14246 = vrsqrt.f32 %v12270_v25 }
0x1229   :  { %v14245_v8 = vpop.eup %14244 }
0x122a   :  { %v12273_v58 = vmul.f32 %v14245_v8, %v12257_v57 }
0x122c   :  { %v12279_v29 = vmul.f32 %v12278_v3, %v12273_v58  ;;  %v12499_v58 = vld [vmem:[%s16715_s8] sm:$0x1] }
0x122d   :  { %v14247_v23 = vpop.eup %14246 }
0x122e   :  { %v12274_v40 = vmul.f32 %v14247_v23, %v12258_v5  ;;  %v12285_v0 = vadd.f32 %v12284_v62, %v12279_v29 }
0x1230   :  { %v12280_v41 = vmul.f32 %v12278_v3, %v12274_v40  ;;  %13937 = vmatprep.mubr.msk.f32.mxu0 %vm191_vm1, %v12285_v0 }
0x1232   :  { %v12286_v11 = vadd.f32 %v12284_v62, %v12280_v41 }
0x1234   :  { %13938 = vmatmul.mubr.msk.f32.vlgmr.msra.gmra.mxu0 %vm191_vm1, %v12286_v11 }
0x1235   :  { %13963 = vmatprep.mubr.msk.f32.mxu0 %vm14263_vm3, %v16750_v53 }
0x12f4   :  { %v13939_v17 = vpop.f32.mrf.mxu0 }
0x12f5   :  { %v12369_v20 = vadd.f32 %v13939_v17, %v12290_v7 }
0x12f6   :  { %v12363_v50 = vpop.f32.mrf.mxu0 }
0x12f7   :  { %v12364_v32 = vadd.f32 %v12363_v50, %v12290_v7  ;;  %v12373_v13 = vmax.f32 %v12369_v20, 0.0 }
0x12f9   :  { %v12372_v4 = vmax.f32 %v12364_v32, 0.0 }
0x12fb   :  { %13956 = vmatprep.mubr.msk.f32.mxu1 %vm6215_vm11, %v12372_v4 }
0x12fc   :  { %13957 = vmatmul.mubr.msk.f32.vlgmr.msra.gmra.mxu1 %vm6215_vm11, %v12373_v13 }
0x13bc   :  { %v13958_v46 = vpop.f32.mrf.mxu1 }
0x13bd   :  { %v12456_v14 = vadd.f32 %v13958_v46, %v12377_v1 }
0x13be   :  { %v12450_v15 = vpop.f32.mrf.mxu1 }
0x13bf   :  { %v12460_v55 = vadd.f32 %v12456_v14, %v12286_v11  ;;  %v12451_v34 = vadd.f32 %v12450_v15, %v12377_v1 }
0x13c1   :  { %v12459_v31 = vadd.f32 %v12451_v34, %v12285_v0  ;;  %v12464_v33 = vsel %vm191_vm1, %v12460_v55, 0.0 }
0x13c2   :  { %12465 = vadd.xlane.f32.xlu1 %v12464_v33 }
0x13c3   :  { %v12461_v43 = vsel %vm191_vm1, %v12459_v31, 0.0 }
0x13c4   :  { %12462 = vadd.xlane.f32.xlu0 %v12461_v43 }
0x144b   :  { %v12466_v47 = vpop.xlane.xlu1 %12465 }
0x144c   :  { %v12468_v54 = vmul.f32 0.03125, %v12466_v47 }
0x144d   :  { %v12463_v35 = vpop.xlane.xlu0 %12462 }
0x144e   :  { %v12470_v39 = vsub.f32 %v12460_v55, %v12468_v54  ;;  %v12467_v42 = vmul.f32 0.03125, %v12463_v35 }
0x1450   :  { %v12469_v63 = vsub.f32 %v12459_v31, %v12467_v42  ;;  %v12472_v27 = vmul.f32 %v12470_v39, %v12470_v39 }
0x1452   :  { %v12476_v5 = vsel %vm191_vm1, %v12472_v27, 0.0  ;;  %v12471_v57 = vmul.f32 %v12469_v63, %v12469_v63 }
0x1453   :  { %12477 = vadd.xlane.f32.xlu1 %v12476_v5 }
0x1454   :  { %v12473_v24 = vsel %vm191_vm1, %v12471_v57, 0.0 }
0x1455   :  { %12474 = vadd.xlane.f32.xlu0 %v12473_v24 }
0x1464   :  { %12503 = vperm.xlu1 %13978, %v12500_v37  }
0x14dc   :  { %v12478_v9 = vpop.xlane.xlu1 %12477 }
0x14dd   :  { %v12480_v16 = vmul.f32 0.03125, %v12478_v9 }
0x14de   :  { %v12475_v21 = vpop.xlane.xlu0 %12474 }
0x14df   :  { %v12482_v61 = vadd.f32 1e-05, %v12480_v16  ;;  %v12479_v59 = vmul.f32 0.03125, %v12475_v21 }
0x14e0   :  { %v12504_v26 = vpop.permute.xlu1 %12503 }
0x14e1   :  { %14248 = vrsqrt.f32 %v12482_v61  ;;  %v12481_v18 = vadd.f32 1e-05, %v12479_v59 }
0x14e3   :  { %14250 = vrsqrt.f32 %v12481_v18 }
0x14ee   :  { %v14249_v2 = vpop.eup %14248 }
0x14ef   :  { %v12486_v45 = vmul.f32 %v14249_v2, %v12470_v39 }
0x14f0   :  { %v14251_v56 = vpop.eup %14250 }
0x14f1   :  { %v12485_v28 = vmul.f32 %v14251_v56, %v12469_v63  ;;  %v12492_v25 = vmul.f32 %v12490_v6, %v12486_v45 }
0x14f3   :  { %v12498_v22 = vadd.f32 %v12496_v12, %v12492_v25  ;;  %v12491_v3 = vmul.f32 %v12490_v6, %v12485_v28 }
0x14f5   :  { %13960 = vmatpush3.xpose.msk.msra.mxu0 %vm191_vm1, %v12498_v22  ;;  %v12497_v8 = vadd.f32 %v12496_v12, %v12491_v3 }
0x14f6   :  { %13961 = vmatprep.subr.mxu0 %v16750_v53 }
0x14f9   :  { %13962 = vmatpush3.xpose.msk.msra.mxu0 %vm191_vm1, %v12497_v8 }
0x14fc   :  { %13964 = vmatmul.mubr.msk.f32.vlgmr.msra.gmra.mxu0 %vm191_vm1, %v12499_v58 }
0x15bc   :  { %v12581_v38 = vpop.f32.mrf.mxu0 }
0x15bd   :  { %v12582_v10 = vadd.f32 %v12581_v38, %v12504_v26 }
0x15be   :  { %v13965_v62 = vpop.f32.mrf.mxu0 }
0x15bf   :  { %12586 = vst.msk [vmem:[%s16716_s9] sm:$0x1] %vm12585_vm12, %v12582_v10 }

</bundles_post_ra>
